<compile_context>
chip_gen: v7x
topology: tpu7x:2x2x1
jax: 0.10.0
libtpu: 0.0.40
codegen_flags: <defaults>
</compile_context>

<pallas_src>
import jax
import jax.numpy as jnp
from jax.experimental import pallas as pl
from jax.experimental.pallas import tpu as pltpu


def lstm_recurrence_kernel(pre_ref, w_hh_ref, h_out_ref):
    """Recurrent part of the LSTM for one batch tile.

    pre_ref   : (T, B_tile, 4H) f32  precomputed x_t @ W_ih + (b_ih + b_hh)
    w_hh_ref  : (H, 4H)         f32  recurrent weights (resident across grid)
    h_out_ref : (B_tile, H)     f32  hidden state after the last timestep
    """
    T = pre_ref.shape[0]
    H = w_hh_ref.shape[0]
    B = h_out_ref.shape[0]

    w_hh = w_hh_ref[...]

    def step(t, carry):
        h_prev, c_prev = carry
        # pre_ref[t] is (B_tile, 4H); only the h @ W_hh matmul remains/step.
        gates = pre_ref[t] + jnp.dot(
            h_prev, w_hh, preferred_element_type=jnp.float32)
        # PyTorch gate order [i, f, g, o]; H is a multiple of 128 so the gate
        # slices stay lane-aligned (pure vreg selection, no shuffles).
        i_g = jax.nn.sigmoid(gates[:, 0 * H:1 * H])
        f_g = jax.nn.sigmoid(gates[:, 1 * H:2 * H])
        g_g = jnp.tanh(gates[:, 2 * H:3 * H])
        o_g = jax.nn.sigmoid(gates[:, 3 * H:4 * H])
        c_new = f_g * c_prev + i_g * g_g
        h_new = o_g * jnp.tanh(c_new)
        return (h_new, c_new)

    h0 = jnp.zeros((B, H), jnp.float32)
    c0 = jnp.zeros((B, H), jnp.float32)
    # Short static trip count: fully unroll so the LLO scheduler can overlap
    # each step's MXU push with the neighbouring steps' VPU/EUP work.
    h_last, _ = jax.lax.fori_loop(0, T, step, (h0, c0), unroll=True)
    h_out_ref[...] = h_last


def lstm_classifier_forward(x_tokens, params):
    """x_tokens: (B, T) int32 token ids. Returns (B, output_dim) logits."""
    emb = params["embedding"]           # (V, E)
    w_ih = params["w_ih"]               # (E, 4H)
    w_hh = params["w_hh"]               # (H, 4H)
    b = params["b"]                     # (1, 4H)  (b_ih + b_hh)
    w_fc = params["w_fc"]               # (H, O)
    b_fc = params["b_fc"]               # (1, O)

    B, T = x_tokens.shape
    H = w_hh.shape[0]
    G = 4 * H

    # Pad batch to a multiple of 8 (f32 sublane count), then tile it so each
    # grid step works on at most 128 rows (keeps per-block VMEM bounded and
    # lets megacore split big batches across TensorCores).
    B_pad = max(8, ((B + 7) // 8) * 8)
    B_tile = min(B_pad, 128)
    B_pad = ((B_pad + B_tile - 1) // B_tile) * B_tile
    n_btiles = B_pad // B_tile

    # Time-major embedding gather: (T, B, E) directly, no (B,T,E) transpose.
    x_emb = emb[x_tokens.T].astype(jnp.float32)
    if B_pad != B:
        x_emb = jnp.pad(x_emb, ((0, 0), (0, B_pad - B), (0, 0)))

    # Hoisted input projection: one big matmul over T*B_pad rows, bias folded.
    pre_gates = jnp.dot(x_emb, w_ih) + b            # (T, B_pad, 4H)

    cost = pl.CostEstimate(
        flops=2 * T * B_pad * H * G + 10 * T * B_pad * G,
        transcendentals=5 * T * B_pad * H,
        bytes_accessed=4 * (T * B_pad * G + H * G + B_pad * H),
    )

    h_last = pl.pallas_call(
        lstm_recurrence_kernel,
        out_shape=jax.ShapeDtypeStruct((B_pad, H), jnp.float32),
        grid=(n_btiles,),
        in_specs=[
            # Per-tile slab of pre-gates: full T and 4H, one batch tile.
            pl.BlockSpec((T, B_tile, G), lambda i: (0, i, 0)),
            # Recurrent weights: same block every step -> fetched once.
            pl.BlockSpec((H, G), lambda i: (0, 0)),
        ],
        out_specs=pl.BlockSpec((B_tile, H), lambda i: (i, 0)),
        compiler_params=pltpu.CompilerParams(
            dimension_semantics=("parallel",)),
        cost_estimate=cost,
    )(pre_gates, w_hh)

    # Final FC (O=4 is tiny and lane-sparse) stays in XLA, outside the kernel.
    return h_last[:B] @ w_fc + b_fc


def lstm_classifier_reference(x_tokens, params):
    """Pure-JAX reference (same math as torch nn.LSTM batch_first + fc)."""
    emb = params["embedding"]
    w_ih, w_hh, b = params["w_ih"], params["w_hh"], params["b"]
    w_fc, b_fc = params["w_fc"], params["b_fc"]
    H = w_hh.shape[0]

    x_emb = emb[x_tokens].astype(jnp.float32)   # (B, T, E)
    B = x_emb.shape[0]
    h = jnp.zeros((B, H), jnp.float32)
    c = jnp.zeros((B, H), jnp.float32)

    def step(carry, x_t):
        h, c = carry
        gates = x_t @ w_ih + h @ w_hh + b
        i = jax.nn.sigmoid(gates[:, 0 * H:1 * H])
        f = jax.nn.sigmoid(gates[:, 1 * H:2 * H])
        g = jnp.tanh(gates[:, 2 * H:3 * H])
        o = jax.nn.sigmoid(gates[:, 3 * H:4 * H])
        c = f * c + i * g
        h = o * jnp.tanh(c)
        return (h, c), None

    (h, c), _ = jax.lax.scan(step, (h, c), jnp.transpose(x_emb, (1, 0, 2)))
    return h @ w_fc + b_fc


def init_params(key, vocab_size, embedding_dim, hidden_dim, output_dim):
    ks = jax.random.split(key, 7)
    k = 1.0 / jnp.sqrt(hidden_dim)
    emb = jax.random.normal(ks[0], (vocab_size, embedding_dim), jnp.float32)
    w_ih = jax.random.uniform(ks[1], (embedding_dim, 4 * hidden_dim),
                              jnp.float32, -k, k)
    w_hh = jax.random.uniform(ks[2], (hidden_dim, 4 * hidden_dim),
                              jnp.float32, -k, k)
    b_ih = jax.random.uniform(ks[3], (4 * hidden_dim,), jnp.float32, -k, k)
    b_hh = jax.random.uniform(ks[4], (4 * hidden_dim,), jnp.float32, -k, k)
    kf = 1.0 / jnp.sqrt(hidden_dim)
    w_fc = jax.random.uniform(ks[5], (hidden_dim, output_dim),
                              jnp.float32, -kf, kf)
    b_fc = jax.random.uniform(ks[6], (output_dim,), jnp.float32, -kf, kf)
    return {
        "embedding": emb,
        "w_ih": w_ih,
        "w_hh": w_hh,
        "b": (b_ih + b_hh).reshape(1, -1),
        "w_fc": w_fc,
        "b_fc": b_fc.reshape(1, -1),
    }


if __name__ == "__main__":
    # Small shapes consistent with the module.
    vocab_size = 50
    embedding_dim = 128
    hidden_dim = 256
    output_dim = 4
    batch = 2
    seq_len = 8

    key = jax.random.PRNGKey(0)
    pkey, xkey = jax.random.split(key)
    params = init_params(pkey, vocab_size, embedding_dim, hidden_dim, output_dim)
    x_tokens = jax.random.randint(xkey, (batch, seq_len), 0, vocab_size,
                                  dtype=jnp.int32)

    logits = jax.block_until_ready(lstm_classifier_forward(x_tokens, params))
    ref = jax.block_until_ready(lstm_classifier_reference(x_tokens, params))

    assert logits.shape == (batch, output_dim)
    assert jnp.max(jnp.abs(logits - ref)) < 2e-3, "mismatch vs reference"

    print("KERNEL_OK")
</pallas_src>

<mosaic_0001>
module attributes {stable_mosaic.version = 11 : i64} {
  func.func @lstm_recurrence_kernel(%arg0: i32, %arg1: memref<8x8x1024xf32, #tpu.memory_space<vmem>>, %arg2: memref<256x1024xf32, #tpu.memory_space<vmem>>, %arg3: memref<8x256xf32, #tpu.memory_space<vmem>>) attributes {dimension_semantics = [#tpu.dimension_semantics<parallel>], iteration_bounds = array<i64: 1>, scalar_prefetch = 0 : i64, scratch_operands = 0 : i64, tpu.core_type = #tpu.core_type<tc>, window_params = [{transform_indices = @transform_0, window_bounds = array<i64: 8, 8, 1024>}, {pipeline_mode = #tpu.pipeline_mode<synchronous>, transform_indices = @transform_1, window_bounds = array<i64: 256, 1024>}, {transform_indices = @transform_2, window_bounds = array<i64: 8, 256>}]} {
    %c0 = arith.constant 0 : index
    %c0_0 = arith.constant 0 : index
    %0 = vector.load %arg2[%c0, %c0_0] : memref<256x1024xf32, #tpu.memory_space<vmem>>, vector<256x1024xf32>
    %cst = arith.constant 0.000000e+00 : f32
    %1 = vector.broadcast %cst : f32 to vector<8x256xf32>
    %cst_1 = arith.constant 0.000000e+00 : f32
    %2 = vector.broadcast %cst_1 : f32 to vector<8x256xf32>
    %c0_i32 = arith.constant 0 : i32
    %3 = arith.index_cast %c0_i32 : i32 to index
    %c0_2 = arith.constant 0 : index
    %c0_3 = arith.constant 0 : index
    %4 = vector.load %arg1[%3, %c0_2, %c0_3] : memref<8x8x1024xf32, #tpu.memory_space<vmem>>, vector<1x8x1024xf32>
    %5 = vector.shape_cast %4 : vector<1x8x1024xf32> to vector<8x1024xf32>
    %cst_4 = arith.constant dense<0.000000e+00> : vector<8x1024xf32>
    %6 = tpu.matmul %1, %0, %cst_4 {dimension_numbers = #tpu.dot_dimension_numbers<[1], [0], [0], [1], [0, 0, 1, 1], [], []>} : vector<8x256xf32>, vector<256x1024xf32>, vector<8x1024xf32> -> vector<8x1024xf32>
    %7 = arith.addf %5, %6 : vector<8x1024xf32>
    %8 = vector.extract_strided_slice %7 {offsets = [0, 0], sizes = [8, 256], strides = [1, 1]} : vector<8x1024xf32> to vector<8x256xf32>
    %9 = arith.negf %8 : vector<8x256xf32>
    %10 = math.exp %9 : vector<8x256xf32>
    %cst_5 = arith.constant 1.000000e+00 : f32
    %11 = vector.broadcast %cst_5 : f32 to vector<8x256xf32>
    %12 = arith.addf %11, %10 : vector<8x256xf32>
    %13 = arith.divf %11, %12 : vector<8x256xf32>
    %14 = vector.extract_strided_slice %7 {offsets = [0, 256], sizes = [8, 256], strides = [1, 1]} : vector<8x1024xf32> to vector<8x256xf32>
    %15 = arith.negf %14 : vector<8x256xf32>
    %16 = math.exp %15 : vector<8x256xf32>
    %cst_6 = arith.constant 1.000000e+00 : f32
    %17 = vector.broadcast %cst_6 : f32 to vector<8x256xf32>
    %18 = arith.addf %17, %16 : vector<8x256xf32>
    %19 = arith.divf %17, %18 : vector<8x256xf32>
    %20 = vector.extract_strided_slice %7 {offsets = [0, 512], sizes = [8, 256], strides = [1, 1]} : vector<8x1024xf32> to vector<8x256xf32>
    %21 = math.tanh %20 : vector<8x256xf32>
    %22 = vector.extract_strided_slice %7 {offsets = [0, 768], sizes = [8, 256], strides = [1, 1]} : vector<8x1024xf32> to vector<8x256xf32>
    %23 = arith.negf %22 : vector<8x256xf32>
    %24 = math.exp %23 : vector<8x256xf32>
    %cst_7 = arith.constant 1.000000e+00 : f32
    %25 = vector.broadcast %cst_7 : f32 to vector<8x256xf32>
    %26 = arith.addf %25, %24 : vector<8x256xf32>
    %27 = arith.divf %25, %26 : vector<8x256xf32>
    %28 = arith.mulf %19, %2 : vector<8x256xf32>
    %29 = arith.mulf %13, %21 : vector<8x256xf32>
    %30 = arith.addf %28, %29 : vector<8x256xf32>
    %31 = math.tanh %30 : vector<8x256xf32>
    %32 = arith.mulf %27, %31 : vector<8x256xf32>
    %c1_i32 = arith.constant 1 : i32
    %33 = arith.index_cast %c1_i32 : i32 to index
    %c0_8 = arith.constant 0 : index
    %c0_9 = arith.constant 0 : index
    %34 = vector.load %arg1[%33, %c0_8, %c0_9] : memref<8x8x1024xf32, #tpu.memory_space<vmem>>, vector<1x8x1024xf32>
    %35 = vector.shape_cast %34 : vector<1x8x1024xf32> to vector<8x1024xf32>
    %cst_10 = arith.constant dense<0.000000e+00> : vector<8x1024xf32>
    %36 = tpu.matmul %32, %0, %cst_10 {dimension_numbers = #tpu.dot_dimension_numbers<[1], [0], [0], [1], [0, 0, 1, 1], [], []>} : vector<8x256xf32>, vector<256x1024xf32>, vector<8x1024xf32> -> vector<8x1024xf32>
    %37 = arith.addf %35, %36 : vector<8x1024xf32>
    %38 = vector.extract_strided_slice %37 {offsets = [0, 0], sizes = [8, 256], strides = [1, 1]} : vector<8x1024xf32> to vector<8x256xf32>
    %39 = arith.negf %38 : vector<8x256xf32>
    %40 = math.exp %39 : vector<8x256xf32>
    %cst_11 = arith.constant 1.000000e+00 : f32
    %41 = vector.broadcast %cst_11 : f32 to vector<8x256xf32>
    %42 = arith.addf %41, %40 : vector<8x256xf32>
    %43 = arith.divf %41, %42 : vector<8x256xf32>
    %44 = vector.extract_strided_slice %37 {offsets = [0, 256], sizes = [8, 256], strides = [1, 1]} : vector<8x1024xf32> to vector<8x256xf32>
    %45 = arith.negf %44 : vector<8x256xf32>
    %46 = math.exp %45 : vector<8x256xf32>
    %cst_12 = arith.constant 1.000000e+00 : f32
    %47 = vector.broadcast %cst_12 : f32 to vector<8x256xf32>
    %48 = arith.addf %47, %46 : vector<8x256xf32>
    %49 = arith.divf %47, %48 : vector<8x256xf32>
    %50 = vector.extract_strided_slice %37 {offsets = [0, 512], sizes = [8, 256], strides = [1, 1]} : vector<8x1024xf32> to vector<8x256xf32>
    %51 = math.tanh %50 : vector<8x256xf32>
    %52 = vector.extract_strided_slice %37 {offsets = [0, 768], sizes = [8, 256], strides = [1, 1]} : vector<8x1024xf32> to vector<8x256xf32>
    %53 = arith.negf %52 : vector<8x256xf32>
    %54 = math.exp %53 : vector<8x256xf32>
    %cst_13 = arith.constant 1.000000e+00 : f32
    %55 = vector.broadcast %cst_13 : f32 to vector<8x256xf32>
    %56 = arith.addf %55, %54 : vector<8x256xf32>
    %57 = arith.divf %55, %56 : vector<8x256xf32>
    %58 = arith.mulf %49, %30 : vector<8x256xf32>
    %59 = arith.mulf %43, %51 : vector<8x256xf32>
    %60 = arith.addf %58, %59 : vector<8x256xf32>
    %61 = math.tanh %60 : vector<8x256xf32>
    %62 = arith.mulf %57, %61 : vector<8x256xf32>
    %c2_i32 = arith.constant 2 : i32
    %63 = arith.index_cast %c2_i32 : i32 to index
    %c0_14 = arith.constant 0 : index
    %c0_15 = arith.constant 0 : index
    %64 = vector.load %arg1[%63, %c0_14, %c0_15] : memref<8x8x1024xf32, #tpu.memory_space<vmem>>, vector<1x8x1024xf32>
    %65 = vector.shape_cast %64 : vector<1x8x1024xf32> to vector<8x1024xf32>
    %cst_16 = arith.constant dense<0.000000e+00> : vector<8x1024xf32>
    %66 = tpu.matmul %62, %0, %cst_16 {dimension_numbers = #tpu.dot_dimension_numbers<[1], [0], [0], [1], [0, 0, 1, 1], [], []>} : vector<8x256xf32>, vector<256x1024xf32>, vector<8x1024xf32> -> vector<8x1024xf32>
    %67 = arith.addf %65, %66 : vector<8x1024xf32>
    %68 = vector.extract_strided_slice %67 {offsets = [0, 0], sizes = [8, 256], strides = [1, 1]} : vector<8x1024xf32> to vector<8x256xf32>
    %69 = arith.negf %68 : vector<8x256xf32>
    %70 = math.exp %69 : vector<8x256xf32>
    %cst_17 = arith.constant 1.000000e+00 : f32
    %71 = vector.broadcast %cst_17 : f32 to vector<8x256xf32>
    %72 = arith.addf %71, %70 : vector<8x256xf32>
    %73 = arith.divf %71, %72 : vector<8x256xf32>
    %74 = vector.extract_strided_slice %67 {offsets = [0, 256], sizes = [8, 256], strides = [1, 1]} : vector<8x1024xf32> to vector<8x256xf32>
    %75 = arith.negf %74 : vector<8x256xf32>
    %76 = math.exp %75 : vector<8x256xf32>
    %cst_18 = arith.constant 1.000000e+00 : f32
    %77 = vector.broadcast %cst_18 : f32 to vector<8x256xf32>
    %78 = arith.addf %77, %76 : vector<8x256xf32>
    %79 = arith.divf %77, %78 : vector<8x256xf32>
    %80 = vector.extract_strided_slice %67 {offsets = [0, 512], sizes = [8, 256], strides = [1, 1]} : vector<8x1024xf32> to vector<8x256xf32>
    %81 = math.tanh %80 : vector<8x256xf32>
    %82 = vector.extract_strided_slice %67 {offsets = [0, 768], sizes = [8, 256], strides = [1, 1]} : vector<8x1024xf32> to vector<8x256xf32>
    %83 = arith.negf %82 : vector<8x256xf32>
    %84 = math.exp %83 : vector<8x256xf32>
    %cst_19 = arith.constant 1.000000e+00 : f32
    %85 = vector.broadcast %cst_19 : f32 to vector<8x256xf32>
    %86 = arith.addf %85, %84 : vector<8x256xf32>
    %87 = arith.divf %85, %86 : vector<8x256xf32>
    %88 = arith.mulf %79, %60 : vector<8x256xf32>
    %89 = arith.mulf %73, %81 : vector<8x256xf32>
    %90 = arith.addf %88, %89 : vector<8x256xf32>
    %91 = math.tanh %90 : vector<8x256xf32>
    %92 = arith.mulf %87, %91 : vector<8x256xf32>
    %c3_i32 = arith.constant 3 : i32
    %93 = arith.index_cast %c3_i32 : i32 to index
    %c0_20 = arith.constant 0 : index
    %c0_21 = arith.constant 0 : index
    %94 = vector.load %arg1[%93, %c0_20, %c0_21] : memref<8x8x1024xf32, #tpu.memory_space<vmem>>, vector<1x8x1024xf32>
    %95 = vector.shape_cast %94 : vector<1x8x1024xf32> to vector<8x1024xf32>
    %cst_22 = arith.constant dense<0.000000e+00> : vector<8x1024xf32>
    %96 = tpu.matmul %92, %0, %cst_22 {dimension_numbers = #tpu.dot_dimension_numbers<[1], [0], [0], [1], [0, 0, 1, 1], [], []>} : vector<8x256xf32>, vector<256x1024xf32>, vector<8x1024xf32> -> vector<8x1024xf32>
    %97 = arith.addf %95, %96 : vector<8x1024xf32>
    %98 = vector.extract_strided_slice %97 {offsets = [0, 0], sizes = [8, 256], strides = [1, 1]} : vector<8x1024xf32> to vector<8x256xf32>
    %99 = arith.negf %98 : vector<8x256xf32>
    %100 = math.exp %99 : vector<8x256xf32>
    %cst_23 = arith.constant 1.000000e+00 : f32
    %101 = vector.broadcast %cst_23 : f32 to vector<8x256xf32>
    %102 = arith.addf %101, %100 : vector<8x256xf32>
    %103 = arith.divf %101, %102 : vector<8x256xf32>
    %104 = vector.extract_strided_slice %97 {offsets = [0, 256], sizes = [8, 256], strides = [1, 1]} : vector<8x1024xf32> to vector<8x256xf32>
    %105 = arith.negf %104 : vector<8x256xf32>
    %106 = math.exp %105 : vector<8x256xf32>
    %cst_24 = arith.constant 1.000000e+00 : f32
    %107 = vector.broadcast %cst_24 : f32 to vector<8x256xf32>
    %108 = arith.addf %107, %106 : vector<8x256xf32>
    %109 = arith.divf %107, %108 : vector<8x256xf32>
    %110 = vector.extract_strided_slice %97 {offsets = [0, 512], sizes = [8, 256], strides = [1, 1]} : vector<8x1024xf32> to vector<8x256xf32>
    %111 = math.tanh %110 : vector<8x256xf32>
    %112 = vector.extract_strided_slice %97 {offsets = [0, 768], sizes = [8, 256], strides = [1, 1]} : vector<8x1024xf32> to vector<8x256xf32>
    %113 = arith.negf %112 : vector<8x256xf32>
    %114 = math.exp %113 : vector<8x256xf32>
    %cst_25 = arith.constant 1.000000e+00 : f32
    %115 = vector.broadcast %cst_25 : f32 to vector<8x256xf32>
    %116 = arith.addf %115, %114 : vector<8x256xf32>
    %117 = arith.divf %115, %116 : vector<8x256xf32>
    %118 = arith.mulf %109, %90 : vector<8x256xf32>
    %119 = arith.mulf %103, %111 : vector<8x256xf32>
    %120 = arith.addf %118, %119 : vector<8x256xf32>
    %121 = math.tanh %120 : vector<8x256xf32>
    %122 = arith.mulf %117, %121 : vector<8x256xf32>
    %c4_i32 = arith.constant 4 : i32
    %123 = arith.index_cast %c4_i32 : i32 to index
    %c0_26 = arith.constant 0 : index
    %c0_27 = arith.constant 0 : index
    %124 = vector.load %arg1[%123, %c0_26, %c0_27] : memref<8x8x1024xf32, #tpu.memory_space<vmem>>, vector<1x8x1024xf32>
    %125 = vector.shape_cast %124 : vector<1x8x1024xf32> to vector<8x1024xf32>
    %cst_28 = arith.constant dense<0.000000e+00> : vector<8x1024xf32>
    %126 = tpu.matmul %122, %0, %cst_28 {dimension_numbers = #tpu.dot_dimension_numbers<[1], [0], [0], [1], [0, 0, 1, 1], [], []>} : vector<8x256xf32>, vector<256x1024xf32>, vector<8x1024xf32> -> vector<8x1024xf32>
    %127 = arith.addf %125, %126 : vector<8x1024xf32>
    %128 = vector.extract_strided_slice %127 {offsets = [0, 0], sizes = [8, 256], strides = [1, 1]} : vector<8x1024xf32> to vector<8x256xf32>
    %129 = arith.negf %128 : vector<8x256xf32>
    %130 = math.exp %129 : vector<8x256xf32>
    %cst_29 = arith.constant 1.000000e+00 : f32
    %131 = vector.broadcast %cst_29 : f32 to vector<8x256xf32>
    %132 = arith.addf %131, %130 : vector<8x256xf32>
    %133 = arith.divf %131, %132 : vector<8x256xf32>
    %134 = vector.extract_strided_slice %127 {offsets = [0, 256], sizes = [8, 256], strides = [1, 1]} : vector<8x1024xf32> to vector<8x256xf32>
    %135 = arith.negf %134 : vector<8x256xf32>
    %136 = math.exp %135 : vector<8x256xf32>
    %cst_30 = arith.constant 1.000000e+00 : f32
    %137 = vector.broadcast %cst_30 : f32 to vector<8x256xf32>
    %138 = arith.addf %137, %136 : vector<8x256xf32>
    %139 = arith.divf %137, %138 : vector<8x256xf32>
    %140 = vector.extract_strided_slice %127 {offsets = [0, 512], sizes = [8, 256], strides = [1, 1]} : vector<8x1024xf32> to vector<8x256xf32>
    %141 = math.tanh %140 : vector<8x256xf32>
    %142 = vector.extract_strided_slice %127 {offsets = [0, 768], sizes = [8, 256], strides = [1, 1]} : vector<8x1024xf32> to vector<8x256xf32>
    %143 = arith.negf %142 : vector<8x256xf32>
    %144 = math.exp %143 : vector<8x256xf32>
    %cst_31 = arith.constant 1.000000e+00 : f32
    %145 = vector.broadcast %cst_31 : f32 to vector<8x256xf32>
    %146 = arith.addf %145, %144 : vector<8x256xf32>
    %147 = arith.divf %145, %146 : vector<8x256xf32>
    %148 = arith.mulf %139, %120 : vector<8x256xf32>
    %149 = arith.mulf %133, %141 : vector<8x256xf32>
    %150 = arith.addf %148, %149 : vector<8x256xf32>
    %151 = math.tanh %150 : vector<8x256xf32>
    %152 = arith.mulf %147, %151 : vector<8x256xf32>
    %c5_i32 = arith.constant 5 : i32
    %153 = arith.index_cast %c5_i32 : i32 to index
    %c0_32 = arith.constant 0 : index
    %c0_33 = arith.constant 0 : index
    %154 = vector.load %arg1[%153, %c0_32, %c0_33] : memref<8x8x1024xf32, #tpu.memory_space<vmem>>, vector<1x8x1024xf32>
    %155 = vector.shape_cast %154 : vector<1x8x1024xf32> to vector<8x1024xf32>
    %cst_34 = arith.constant dense<0.000000e+00> : vector<8x1024xf32>
    %156 = tpu.matmul %152, %0, %cst_34 {dimension_numbers = #tpu.dot_dimension_numbers<[1], [0], [0], [1], [0, 0, 1, 1], [], []>} : vector<8x256xf32>, vector<256x1024xf32>, vector<8x1024xf32> -> vector<8x1024xf32>
    %157 = arith.addf %155, %156 : vector<8x1024xf32>
    %158 = vector.extract_strided_slice %157 {offsets = [0, 0], sizes = [8, 256], strides = [1, 1]} : vector<8x1024xf32> to vector<8x256xf32>
    %159 = arith.negf %158 : vector<8x256xf32>
    %160 = math.exp %159 : vector<8x256xf32>
    %cst_35 = arith.constant 1.000000e+00 : f32
    %161 = vector.broadcast %cst_35 : f32 to vector<8x256xf32>
    %162 = arith.addf %161, %160 : vector<8x256xf32>
    %163 = arith.divf %161, %162 : vector<8x256xf32>
    %164 = vector.extract_strided_slice %157 {offsets = [0, 256], sizes = [8, 256], strides = [1, 1]} : vector<8x1024xf32> to vector<8x256xf32>
    %165 = arith.negf %164 : vector<8x256xf32>
    %166 = math.exp %165 : vector<8x256xf32>
    %cst_36 = arith.constant 1.000000e+00 : f32
    %167 = vector.broadcast %cst_36 : f32 to vector<8x256xf32>
    %168 = arith.addf %167, %166 : vector<8x256xf32>
    %169 = arith.divf %167, %168 : vector<8x256xf32>
    %170 = vector.extract_strided_slice %157 {offsets = [0, 512], sizes = [8, 256], strides = [1, 1]} : vector<8x1024xf32> to vector<8x256xf32>
    %171 = math.tanh %170 : vector<8x256xf32>
    %172 = vector.extract_strided_slice %157 {offsets = [0, 768], sizes = [8, 256], strides = [1, 1]} : vector<8x1024xf32> to vector<8x256xf32>
    %173 = arith.negf %172 : vector<8x256xf32>
    %174 = math.exp %173 : vector<8x256xf32>
    %cst_37 = arith.constant 1.000000e+00 : f32
    %175 = vector.broadcast %cst_37 : f32 to vector<8x256xf32>
    %176 = arith.addf %175, %174 : vector<8x256xf32>
    %177 = arith.divf %175, %176 : vector<8x256xf32>
    %178 = arith.mulf %169, %150 : vector<8x256xf32>
    %179 = arith.mulf %163, %171 : vector<8x256xf32>
    %180 = arith.addf %178, %179 : vector<8x256xf32>
    %181 = math.tanh %180 : vector<8x256xf32>
    %182 = arith.mulf %177, %181 : vector<8x256xf32>
    %c6_i32 = arith.constant 6 : i32
    %183 = arith.index_cast %c6_i32 : i32 to index
    %c0_38 = arith.constant 0 : index
    %c0_39 = arith.constant 0 : index
    %184 = vector.load %arg1[%183, %c0_38, %c0_39] : memref<8x8x1024xf32, #tpu.memory_space<vmem>>, vector<1x8x1024xf32>
    %185 = vector.shape_cast %184 : vector<1x8x1024xf32> to vector<8x1024xf32>
    %cst_40 = arith.constant dense<0.000000e+00> : vector<8x1024xf32>
    %186 = tpu.matmul %182, %0, %cst_40 {dimension_numbers = #tpu.dot_dimension_numbers<[1], [0], [0], [1], [0, 0, 1, 1], [], []>} : vector<8x256xf32>, vector<256x1024xf32>, vector<8x1024xf32> -> vector<8x1024xf32>
    %187 = arith.addf %185, %186 : vector<8x1024xf32>
    %188 = vector.extract_strided_slice %187 {offsets = [0, 0], sizes = [8, 256], strides = [1, 1]} : vector<8x1024xf32> to vector<8x256xf32>
    %189 = arith.negf %188 : vector<8x256xf32>
    %190 = math.exp %189 : vector<8x256xf32>
    %cst_41 = arith.constant 1.000000e+00 : f32
    %191 = vector.broadcast %cst_41 : f32 to vector<8x256xf32>
    %192 = arith.addf %191, %190 : vector<8x256xf32>
    %193 = arith.divf %191, %192 : vector<8x256xf32>
    %194 = vector.extract_strided_slice %187 {offsets = [0, 256], sizes = [8, 256], strides = [1, 1]} : vector<8x1024xf32> to vector<8x256xf32>
    %195 = arith.negf %194 : vector<8x256xf32>
    %196 = math.exp %195 : vector<8x256xf32>
    %cst_42 = arith.constant 1.000000e+00 : f32
    %197 = vector.broadcast %cst_42 : f32 to vector<8x256xf32>
    %198 = arith.addf %197, %196 : vector<8x256xf32>
    %199 = arith.divf %197, %198 : vector<8x256xf32>
    %200 = vector.extract_strided_slice %187 {offsets = [0, 512], sizes = [8, 256], strides = [1, 1]} : vector<8x1024xf32> to vector<8x256xf32>
    %201 = math.tanh %200 : vector<8x256xf32>
    %202 = vector.extract_strided_slice %187 {offsets = [0, 768], sizes = [8, 256], strides = [1, 1]} : vector<8x1024xf32> to vector<8x256xf32>
    %203 = arith.negf %202 : vector<8x256xf32>
    %204 = math.exp %203 : vector<8x256xf32>
    %cst_43 = arith.constant 1.000000e+00 : f32
    %205 = vector.broadcast %cst_43 : f32 to vector<8x256xf32>
    %206 = arith.addf %205, %204 : vector<8x256xf32>
    %207 = arith.divf %205, %206 : vector<8x256xf32>
    %208 = arith.mulf %199, %180 : vector<8x256xf32>
    %209 = arith.mulf %193, %201 : vector<8x256xf32>
    %210 = arith.addf %208, %209 : vector<8x256xf32>
    %211 = math.tanh %210 : vector<8x256xf32>
    %212 = arith.mulf %207, %211 : vector<8x256xf32>
    %c7_i32 = arith.constant 7 : i32
    %213 = arith.index_cast %c7_i32 : i32 to index
    %c0_44 = arith.constant 0 : index
    %c0_45 = arith.constant 0 : index
    %214 = vector.load %arg1[%213, %c0_44, %c0_45] : memref<8x8x1024xf32, #tpu.memory_space<vmem>>, vector<1x8x1024xf32>
    %215 = vector.shape_cast %214 : vector<1x8x1024xf32> to vector<8x1024xf32>
    %cst_46 = arith.constant dense<0.000000e+00> : vector<8x1024xf32>
    %216 = tpu.matmul %212, %0, %cst_46 {dimension_numbers = #tpu.dot_dimension_numbers<[1], [0], [0], [1], [0, 0, 1, 1], [], []>} : vector<8x256xf32>, vector<256x1024xf32>, vector<8x1024xf32> -> vector<8x1024xf32>
    %217 = arith.addf %215, %216 : vector<8x1024xf32>
    %218 = vector.extract_strided_slice %217 {offsets = [0, 0], sizes = [8, 256], strides = [1, 1]} : vector<8x1024xf32> to vector<8x256xf32>
    %219 = arith.negf %218 : vector<8x256xf32>
    %220 = math.exp %219 : vector<8x256xf32>
    %cst_47 = arith.constant 1.000000e+00 : f32
    %221 = vector.broadcast %cst_47 : f32 to vector<8x256xf32>
    %222 = arith.addf %221, %220 : vector<8x256xf32>
    %223 = arith.divf %221, %222 : vector<8x256xf32>
    %224 = vector.extract_strided_slice %217 {offsets = [0, 256], sizes = [8, 256], strides = [1, 1]} : vector<8x1024xf32> to vector<8x256xf32>
    %225 = arith.negf %224 : vector<8x256xf32>
    %226 = math.exp %225 : vector<8x256xf32>
    %cst_48 = arith.constant 1.000000e+00 : f32
    %227 = vector.broadcast %cst_48 : f32 to vector<8x256xf32>
    %228 = arith.addf %227, %226 : vector<8x256xf32>
    %229 = arith.divf %227, %228 : vector<8x256xf32>
    %230 = vector.extract_strided_slice %217 {offsets = [0, 512], sizes = [8, 256], strides = [1, 1]} : vector<8x1024xf32> to vector<8x256xf32>
    %231 = math.tanh %230 : vector<8x256xf32>
    %232 = vector.extract_strided_slice %217 {offsets = [0, 768], sizes = [8, 256], strides = [1, 1]} : vector<8x1024xf32> to vector<8x256xf32>
    %233 = arith.negf %232 : vector<8x256xf32>
    %234 = math.exp %233 : vector<8x256xf32>
    %cst_49 = arith.constant 1.000000e+00 : f32
    %235 = vector.broadcast %cst_49 : f32 to vector<8x256xf32>
    %236 = arith.addf %235, %234 : vector<8x256xf32>
    %237 = arith.divf %235, %236 : vector<8x256xf32>
    %238 = arith.mulf %229, %210 : vector<8x256xf32>
    %239 = arith.mulf %223, %231 : vector<8x256xf32>
    %240 = arith.addf %238, %239 : vector<8x256xf32>
    %241 = math.tanh %240 : vector<8x256xf32>
    %242 = arith.mulf %237, %241 : vector<8x256xf32>
    %c8_i32 = arith.constant 8 : i32
    %c0_50 = arith.constant 0 : index
    %c0_51 = arith.constant 0 : index
    %243 = vector.load %arg3[%c0_50, %c0_51] : memref<8x256xf32, #tpu.memory_space<vmem>>, vector<8x256xf32>
    tpu.vector_store %arg3[%c0_50, %c0_51], %242 {strides = array<i32>} : memref<8x256xf32, #tpu.memory_space<vmem>>, vector<8x256xf32>,
    return
  }
  func.func @transform_0(%arg0: i32) -> (i32, i32, i32) {
    %c0_i32 = arith.constant 0 : i32
    %c0_i32_0 = arith.constant 0 : i32
    %c0_i32_1 = arith.constant 0 : i32
    return %c0_i32, %arg0, %c0_i32_0 : i32, i32, i32
  }
  func.func @transform_1(%arg0: i32) -> (i32, i32) {
    %c0_i32 = arith.constant 0 : i32
    %c0_i32_0 = arith.constant 0 : i32
    %c0_i32_1 = arith.constant 0 : i32
    return %c0_i32, %c0_i32_0 : i32, i32
  }
  func.func @transform_2(%arg0: i32) -> (i32, i32) {
    %c0_i32 = arith.constant 0 : i32
    %c0_i32_0 = arith.constant 0 : i32
    return %arg0, %c0_i32 : i32, i32
  }
}

</mosaic_0001>

<bundles_post_ra>
// kernel: tpu_custom_call.1
= control target key start
LH: loop header
LB: loop body
LE: loop exit
PB: predicated region body
PF: predicated region fallthrough
CT: control target
= control target key end

     0   :  { %7 = vsyncpa [#allocation3], 0  ;;  %s6978_s0 = inlined_call_operand.hbm [shape: f32[8,8,1024], index: 0, kind: input, shape index: {}]   ;;  %s6979_s1 = inlined_call_operand.hbm [shape: f32[256,1024], index: 1, kind: input, shape index: {}]   ;;  %s6980_s2 = inlined_call_operand.hbm [shape: f32[8,256], index: 2, kind: output, shape index: {}]  }
   0x1   :  { %8 = vsyncpa [#allocation6], 0 }
   0x2   :  { %9 = vsyncpa [#allocation4], 0  ;;  %s5535_s9 = smov [#allocation2]   ;;  %s5463_s13 = scalar_lea.hbm %s6978_s0, 8192 }
   0x3   :  { %s15_s10 = sshll.u32 %s5535_s9, 4  ;;  %p5464_p0 = scmp.ne.s32.totalorder %s6978_s0, %s5463_s13  ;;  %s16_s10 = int_to_ptr.vmem [resolvable:$true] %s15_s10 }
   0x4   :  { %p5467_p1 = scmp.lt.u32.totalorder %s5463_s13, %s6978_s0 }
   0x6   :  { %p5469_p2 = pnand %p5467_p1, %p5464_p0 }
   0x8   :  { %5472 = shalt.err (!%p5469_p2)
}
   0x9   :  { %s5473_s18 = scalar_lea.vmem %s16_s10, 8192  ;;  %p5478_p4 = scmp.lt.s32.totalorder %s16_s10, %s16_s10 }
   0xa   :  { %p5474_p3 = scmp.ne.s32.totalorder %s16_s10, %s5473_s18  ;;  %p5479_p5 = scmp.lt.s32.totalorder %s5473_s18, %s5473_s18 }
   0xc   :  { %p5480_p6 = por %p5479_p5, %p5478_p4 }
   0xe   :  { %p5481_p7 = pnand %p5480_p6, %p5474_p3 }
  0x10   :  { %5484 = shalt.err (!%p5481_p7)
}
  0x11   :  { %s5536_s19 = smov 1024   ;;  %s5537_s20 = smov 64  }
  0x12   :  { %21 = dma.hbm_to_vmem [thread:$0]  %s6978_s0, 8192, %s16_s10, [#allocation3], %s5536_s19, %s5536_s19, %s5537_s20  }
  0x13   :  { %s5538_s23 = smov [#allocation5]   ;;  %s5485_s27 = scalar_lea.hbm %s6979_s1, 32768 }
  0x14   :  { %s27_s24 = sshll.u32 %s5538_s23, 4  ;;  %p5486_p8 = scmp.ne.s32.totalorder %s6979_s1, %s5485_s27  ;;  %s28_s24 = int_to_ptr.vmem [resolvable:$true] %s27_s24 }
  0x15   :  { %p5489_p9 = scmp.lt.u32.totalorder %s5485_s27, %s6979_s1 }
  0x17   :  { %p5491_p10 = pnand %p5489_p9, %p5486_p8 }
  0x19   :  { %5494 = shalt.err (!%p5491_p10)
}
  0x1a   :  { %s5495_s4 = scalar_lea.vmem %s28_s24, 32768  ;;  %p5500_p12 = scmp.lt.s32.totalorder %s28_s24, %s28_s24 }
  0x1b   :  { %p5496_p11 = scmp.ne.s32.totalorder %s28_s24, %s5495_s4  ;;  %p5501_p13 = scmp.lt.s32.totalorder %s5495_s4, %s5495_s4 }
  0x1d   :  { %p5502_p0 = por %p5501_p13, %p5500_p12 }
  0x1f   :  { %p5503_p1 = pnand %p5502_p0, %p5496_p11 }
  0x21   :  { %5506 = shalt.err (!%p5503_p1)
}
  0x22   :  { %33 = dma.hbm_to_vmem [thread:$0]  %s6979_s1, 32768, %s28_s24, [#allocation6], %s5536_s19, %s5536_s19, %s5537_s20  }
  0x23   :  { %5529 = dma.done.wait [#allocation3], 8192  }
  0x24   :  { %5530 = vsyncadd [#allocation3], 4294959104 }
  0x25   :  { %5531 = dma.done.wait [#allocation6], 32768  }
  0x26   :  { %5532 = vsyncadd [#allocation6], 4294934528  ;;  %v6981_v0 = vmov 0.0   ;;  %v41_v1 = vld [vmem:[#allocation5 + $0x8] sm:$0xff]  ;;  %v43_v3 = vld [vmem:[#allocation5 + $0x18] sm:$0xff]  ;;  %s5540_s1 = smov [#allocation7]  }
  0x27   :  { %368 = vmatprep.mubr.f32.mxu0 %v6981_v0  ;;  %439 = vmatprep.mubr.f32.mxu1 %v6981_v0  ;;  %v49_v2 = vld [vmem:[#allocation5 + $0x48] sm:$0xff]  ;;  %v51_v5 = vld [vmem:[#allocation5 + $0x58] sm:$0xff]  ;;  %v40_v6 = vld [vmem:[#allocation5] sm:$0xff]  ;;  %s3095_s6 = sshll.u32 %s5540_s1, 4  ;;  %s3096_s6 = int_to_ptr.vmem [resolvable:$true] %s3095_s6 }
  0x28   :  { %v5582_v4 = vpack.c.bf16 %v49_v2, %v41_v1  ;;  %v48_v7 = vld [vmem:[#allocation5 + $0x40] sm:$0xff]  ;;  %v5584_v8 = vpack.c.bf16 %v51_v5, %v43_v3  ;;  %v42_v10 = vld [vmem:[#allocation5 + $0x10] sm:$0xff]  ;;  %v57_v12 = vld [vmem:[#allocation5 + $0x88] sm:$0xff]  ;;  %s5507_s7 = scalar_lea.vmem %s3096_s6, 256  ;;  %p5512_p3 = scmp.lt.s32.totalorder %s3096_s6, %s3096_s6 }
  0x29   :  { %v5586_v9 = vpack.c.bf16 %v48_v7, %v40_v6  ;;  %v50_v11 = vld [vmem:[#allocation5 + $0x50] sm:$0xff]  ;;  %v65_v14 = vld [vmem:[#allocation5 + $0xc8] sm:$0xff]  ;;  %v59_v15 = vld [vmem:[#allocation5 + $0x98] sm:$0xff]  ;;  %p5508_p2 = scmp.ne.s32.totalorder %s3096_s6, %s5507_s7  ;;  %p5513_p4 = scmp.lt.s32.totalorder %s5507_s7, %s5507_s7 }
  0x2a   :  { %7251 = vst [vmem:[#allocation11_spill] sm:$0xff] %v5582_v4  ;;  %7252 = vst [vmem:[#allocation12_spill] sm:$0xff] %v5584_v8  ;;  %3154 = vmatprep.subr.bf16.mxu0 %v5582_v4  ;;  %v5589_v13 = vpack.c.bf16 %v50_v11, %v42_v10  ;;  %v67_v16 = vld [vmem:[#allocation5 + $0xd8] sm:$0xff]  ;;  %3218 = vmatprep.subr.bf16.mxu1 %v5584_v8  ;;  %v5593_v17 = vpack.c.bf16 %v65_v14, %v57_v12  ;;  %v56_v19 = vld [vmem:[#allocation5 + $0x80] sm:$0xff] }
  0x2b   :  { %7253 = vst [vmem:[#allocation13_spill] sm:$0xff] %v5586_v9  ;;  %3156 = vmatpush1.bf16.msra.mxu0 %v5586_v9  ;;  %v5595_v18 = vpack.c.bf16 %v67_v16, %v59_v15  ;;  %v64_v20 = vld [vmem:[#allocation5 + $0xc0] sm:$0xff]  ;;  %v58_v21 = vld [vmem:[#allocation5 + $0x90] sm:$0xff]  ;;  %v73_v24 = vld [vmem:[#allocation5 + $0x108] sm:$0xff]  ;;  %p5514_p5 = por %p5513_p4, %p5512_p3 }
  0x2c   :  { %7254 = vst [vmem:[#allocation14_spill] sm:$0xff] %v5589_v13  ;;  %7255 = vst [vmem:[#allocation15_spill] sm:$0xff] %v5593_v17  ;;  %3220 = vmatpush1.bf16.msra.mxu1 %v5589_v13  ;;  %v5598_v22 = vpack.c.bf16 %v64_v20, %v56_v19  ;;  %v66_v23 = vld [vmem:[#allocation5 + $0xd0] sm:$0xff]  ;;  %v81_v25 = vld [vmem:[#allocation5 + $0x148] sm:$0xff]  ;;  %3158 = vmatprep.subr.bf16.mxu0 %v5593_v17 }
  0x2d   :  { %7256 = vst [vmem:[#allocation16_spill] sm:$0xff] %v5595_v18  ;;  %3222 = vmatprep.subr.bf16.mxu1 %v5595_v18  ;;  %v5602_v26 = vpack.c.bf16 %v66_v23, %v58_v21  ;;  %v5604_v27 = vpack.c.bf16 %v81_v25, %v73_v24  ;;  %v75_v28 = vld [vmem:[#allocation5 + $0x118] sm:$0xff]  ;;  %v72_v30 = vld [vmem:[#allocation5 + $0x100] sm:$0xff]  ;;  %v74_v33 = vld [vmem:[#allocation5 + $0x110] sm:$0xff]  ;;  %p5515_p6 = pnand %p5514_p5, %p5508_p2 }
  0x2e   :  { %7257 = vst [vmem:[#allocation17_spill] sm:$0xff] %v5598_v22  ;;  %v83_v29 = vld [vmem:[#allocation5 + $0x158] sm:$0xff]  ;;  %v80_v32 = vld [vmem:[#allocation5 + $0x140] sm:$0xff]  ;;  %v82_v34 = vld [vmem:[#allocation5 + $0x150] sm:$0xff] }
  0x2f   :  { %7258 = vst [vmem:[#allocation18_spill] sm:$0xff] %v5602_v26  ;;  %7259 = vst [vmem:[#allocation19_spill] sm:$0xff] %v5604_v27  ;;  %v5606_v31 = vpack.c.bf16 %v83_v29, %v75_v28  ;;  %3160 = vmatpush1.bf16.msra.mxu0 %v5598_v22  ;;  %v5609_v35 = vpack.c.bf16 %v80_v32, %v72_v30  ;;  %v89_v36 = vld [vmem:[#allocation5 + $0x188] sm:$0xff]  ;;  %v91_v38 = vld [vmem:[#allocation5 + $0x198] sm:$0xff]  ;;  %v5613_v39 = vpack.c.bf16 %v82_v34, %v74_v33 }
  0x30   :  { %v97_v37 = vld [vmem:[#allocation5 + $0x1c8] sm:$0xff]  ;;  %3224 = vmatpush1.bf16.msra.mxu1 %v5602_v26  ;;  %3162 = vmatprep.subr.bf16.mxu0 %v5604_v27  ;;  %v99_v41 = vld [vmem:[#allocation5 + $0x1d8] sm:$0xff]  ;;  %v88_v42 = vld [vmem:[#allocation5 + $0x180] sm:$0xff] }
  0x31   :  { %7260 = vst [vmem:[#allocation20_spill] sm:$0xff] %v5606_v31  ;;  %7261 = vst [vmem:[#allocation21_spill] sm:$0xff] %v5609_v35  ;;  %v5615_v40 = vpack.c.bf16 %v97_v37, %v89_v36  ;;  %v96_v43 = vld [vmem:[#allocation5 + $0x1c0] sm:$0xff]  ;;  %3226 = vmatprep.subr.bf16.mxu1 %v5606_v31  ;;  %v5618_v44 = vpack.c.bf16 %v99_v41, %v91_v38  ;;  %v90_v45 = vld [vmem:[#allocation5 + $0x190] sm:$0xff] }
  0x32   :  { %7262 = vst [vmem:[#allocation22_spill] sm:$0xff] %v5613_v39  ;;  %v98_v46 = vld [vmem:[#allocation5 + $0x1d0] sm:$0xff]  ;;  %v105_v47 = vld [vmem:[#allocation5 + $0x208] sm:$0xff]  ;;  %v107_v49 = vld [vmem:[#allocation5 + $0x218] sm:$0xff]  ;;  %v5621_v51 = vpack.c.bf16 %v96_v43, %v88_v42 }
  0x33   :  { %7263 = vst [vmem:[#allocation23_spill] sm:$0xff] %v5615_v40  ;;  %7264 = vst [vmem:[#allocation24_spill] sm:$0xff] %v5618_v44  ;;  %v113_v48 = vld [vmem:[#allocation5 + $0x248] sm:$0xff]  ;;  %v115_v50 = vld [vmem:[#allocation5 + $0x258] sm:$0xff]  ;;  %3164 = vmatpush1.bf16.msra.mxu0 %v5609_v35  ;;  %v5625_v52 = vpack.c.bf16 %v98_v46, %v90_v45 }
  0x34   :  { %7265 = vst [vmem:[#allocation25_spill] sm:$0xff] %v5621_v51  ;;  %3228 = vmatpush1.bf16.msra.mxu1 %v5613_v39  ;;  %3166 = vmatprep.subr.bf16.mxu0 %v5615_v40  ;;  %v5627_v53 = vpack.c.bf16 %v113_v48, %v105_v47  ;;  %v104_v54 = vld [vmem:[#allocation5 + $0x200] sm:$0xff]  ;;  %v106_v56 = vld [vmem:[#allocation5 + $0x210] sm:$0xff]  ;;  %v5630_v57 = vpack.c.bf16 %v115_v50, %v107_v49  ;;  %v121_v59 = vld [vmem:[#allocation5 + $0x288] sm:$0xff] }
  0x35   :  { %7266 = vst [vmem:[#allocation26_spill] sm:$0xff] %v5625_v52  ;;  %v112_v55 = vld [vmem:[#allocation5 + $0x240] sm:$0xff]  ;;  %3230 = vmatprep.subr.bf16.mxu1 %v5618_v44  ;;  %v114_v58 = vld [vmem:[#allocation5 + $0x250] sm:$0xff]  ;;  %v129_v60 = vld [vmem:[#allocation5 + $0x2c8] sm:$0xff] }
  0x36   :  { %7267 = vst [vmem:[#allocation27_spill] sm:$0xff] %v5627_v53  ;;  %7268 = vst [vmem:[#allocation28_spill] sm:$0xff] %v5630_v57  ;;  %v123_v61 = vld [vmem:[#allocation5 + $0x298] sm:$0xff]  ;;  %v5633_v63 = vpack.c.bf16 %v112_v55, %v104_v54  ;;  %v5637_v1 = vpack.c.bf16 %v114_v58, %v106_v56  ;;  %v5639_v2 = vpack.c.bf16 %v129_v60, %v121_v59  ;;  %v120_v3 = vld [vmem:[#allocation5 + $0x280] sm:$0xff] }
  0x37   :  { %v131_v62 = vld [vmem:[#allocation5 + $0x2d8] sm:$0xff]  ;;  %3168 = vmatpush1.bf16.msra.mxu0 %v5621_v51  ;;  %v128_v5 = vld [vmem:[#allocation5 + $0x2c0] sm:$0xff]  ;;  %v122_v6 = vld [vmem:[#allocation5 + $0x290] sm:$0xff] }
  0x38   :  { %7269 = vst [vmem:[#allocation29_spill] sm:$0xff] %v5633_v63  ;;  %3232 = vmatpush1.bf16.msra.mxu1 %v5625_v52  ;;  %3170 = vmatprep.subr.bf16.mxu0 %v5627_v53  ;;  %7270 = vst [vmem:[#allocation30_spill] sm:$0xff] %v5637_v1  ;;  %v5642_v7 = vpack.c.bf16 %v131_v62, %v123_v61  ;;  %v130_v10 = vld [vmem:[#allocation5 + $0x2d0] sm:$0xff]  ;;  %v137_v11 = vld [vmem:[#allocation5 + $0x308] sm:$0xff]  ;;  %v5645_v16 = vpack.c.bf16 %v128_v5, %v120_v3 }
  0x39   :  { %7271 = vst [vmem:[#allocation31_spill] sm:$0xff] %v5639_v2  ;;  %3234 = vmatprep.subr.bf16.mxu1 %v5630_v57  ;;  %v145_v12 = vld [vmem:[#allocation5 + $0x348] sm:$0xff]  ;;  %v139_v14 = vld [vmem:[#allocation5 + $0x318] sm:$0xff]  ;;  %v5649_v19 = vpack.c.bf16 %v130_v10, %v122_v6  ;;  %v136_v21 = vld [vmem:[#allocation5 + $0x300] sm:$0xff] }
  0x3a   :  { %7272 = vst [vmem:[#allocation32_spill] sm:$0xff] %v5642_v7  ;;  %v147_v15 = vld [vmem:[#allocation5 + $0x358] sm:$0xff]  ;;  %7273 = vst [vmem:[#allocation33_spill] sm:$0xff] %v5645_v16  ;;  %v5651_v20 = vpack.c.bf16 %v145_v12, %v137_v11  ;;  %v144_v23 = vld [vmem:[#allocation5 + $0x340] sm:$0xff] }
  0x3b   :  { %3172 = vmatpush1.bf16.msra.mxu0 %v5633_v63  ;;  %7274 = vst [vmem:[#allocation34_spill] sm:$0xff] %v5649_v19  ;;  %v138_v24 = vld [vmem:[#allocation5 + $0x310] sm:$0xff]  ;;  %v5654_v25 = vpack.c.bf16 %v147_v15, %v139_v14  ;;  %v153_v29 = vld [vmem:[#allocation5 + $0x388] sm:$0xff]  ;;  %v155_v32 = vld [vmem:[#allocation5 + $0x398] sm:$0xff]  ;;  %v5657_v34 = vpack.c.bf16 %v144_v23, %v136_v21 }
  0x3c   :  { %3236 = vmatpush1.bf16.msra.mxu1 %v5637_v1  ;;  %3174 = vmatprep.subr.bf16.mxu0 %v5639_v2  ;;  %7275 = vst [vmem:[#allocation35_spill] sm:$0xff] %v5651_v20  ;;  %v146_v28 = vld [vmem:[#allocation5 + $0x350] sm:$0xff]  ;;  %v161_v30 = vld [vmem:[#allocation5 + $0x3c8] sm:$0xff]  ;;  %v163_v33 = vld [vmem:[#allocation5 + $0x3d8] sm:$0xff] }
  0x3d   :  { %3238 = vmatprep.subr.bf16.mxu1 %v5642_v7  ;;  %7276 = vst [vmem:[#allocation36_spill] sm:$0xff] %v5654_v25  ;;  %7277 = vst [vmem:[#allocation37_spill] sm:$0xff] %v5657_v34  ;;  %v5661_v36 = vpack.c.bf16 %v146_v28, %v138_v24  ;;  %v5663_v37 = vpack.c.bf16 %v161_v30, %v153_v29  ;;  %v152_v38 = vld [vmem:[#allocation5 + $0x380] sm:$0xff]  ;;  %v154_v42 = vld [vmem:[#allocation5 + $0x390] sm:$0xff]  ;;  %v5666_v43 = vpack.c.bf16 %v163_v33, %v155_v32 }
  0x3e   :  { %v160_v41 = vld [vmem:[#allocation5 + $0x3c0] sm:$0xff]  ;;  %v162_v45 = vld [vmem:[#allocation5 + $0x3d0] sm:$0xff]  ;;  %v169_v46 = vld [vmem:[#allocation5 + $0x408] sm:$0xff] }
  0x3f   :  { %3176 = vmatpush1.bf16.msra.mxu0 %v5645_v16  ;;  %7278 = vst [vmem:[#allocation38_spill] sm:$0xff] %v5661_v36  ;;  %7279 = vst [vmem:[#allocation39_spill] sm:$0xff] %v5663_v37  ;;  %v177_v47 = vld [vmem:[#allocation5 + $0x448] sm:$0xff]  ;;  %v171_v48 = vld [vmem:[#allocation5 + $0x418] sm:$0xff]  ;;  %v5669_v50 = vpack.c.bf16 %v160_v41, %v152_v38  ;;  %v5673_v54 = vpack.c.bf16 %v162_v45, %v154_v42 }
  0x40   :  { %3240 = vmatpush1.bf16.msra.mxu1 %v5649_v19  ;;  %3178 = vmatprep.subr.bf16.mxu0 %v5651_v20  ;;  %7280 = vst [vmem:[#allocation40_spill] sm:$0xff] %v5666_v43  ;;  %v179_v49 = vld [vmem:[#allocation5 + $0x458] sm:$0xff]  ;;  %v5675_v55 = vpack.c.bf16 %v177_v47, %v169_v46  ;;  %v168_v56 = vld [vmem:[#allocation5 + $0x400] sm:$0xff]  ;;  %v170_v59 = vld [vmem:[#allocation5 + $0x410] sm:$0xff] }
  0x41   :  { %3242 = vmatprep.subr.bf16.mxu1 %v5654_v25  ;;  %7281 = vst [vmem:[#allocation41_spill] sm:$0xff] %v5669_v50  ;;  %7282 = vst [vmem:[#allocation42_spill] sm:$0xff] %v5673_v54  ;;  %v176_v58 = vld [vmem:[#allocation5 + $0x440] sm:$0xff]  ;;  %v5678_v60 = vpack.c.bf16 %v179_v49, %v171_v48  ;;  %v178_v61 = vld [vmem:[#allocation5 + $0x450] sm:$0xff] }
  0x42   :  { %7283 = vst [vmem:[#allocation43_spill] sm:$0xff] %v5675_v55  ;;  %v185_v62 = vld [vmem:[#allocation5 + $0x488] sm:$0xff]  ;;  %v187_v5 = vld [vmem:[#allocation5 + $0x498] sm:$0xff]  ;;  %v5681_v10 = vpack.c.bf16 %v176_v58, %v168_v56  ;;  %v5685_v11 = vpack.c.bf16 %v178_v61, %v170_v59  ;;  %v184_v14 = vld [vmem:[#allocation5 + $0x480] sm:$0xff] }
  0x43   :  { %3180 = vmatpush1.bf16.msra.mxu0 %v5657_v34  ;;  %7284 = vst [vmem:[#allocation44_spill] sm:$0xff] %v5678_v60  ;;  %v193_v3 = vld [vmem:[#allocation5 + $0x4c8] sm:$0xff]  ;;  %v195_v6 = vld [vmem:[#allocation5 + $0x4d8] sm:$0xff]  ;;  %v192_v15 = vld [vmem:[#allocation5 + $0x4c0] sm:$0xff] }
  0x44   :  { %3244 = vmatpush1.bf16.msra.mxu1 %v5661_v36  ;;  %3182 = vmatprep.subr.bf16.mxu0 %v5663_v37  ;;  %7285 = vst [vmem:[#allocation45_spill] sm:$0xff] %v5681_v10  ;;  %7286 = vst [vmem:[#allocation46_spill] sm:$0xff] %v5685_v11  ;;  %v5687_v12 = vpack.c.bf16 %v193_v3, %v185_v62  ;;  %v186_v21 = vld [vmem:[#allocation5 + $0x490] sm:$0xff]  ;;  %v5690_v23 = vpack.c.bf16 %v195_v6, %v187_v5  ;;  %v201_v28 = vld [vmem:[#allocation5 + $0x508] sm:$0xff] }
  0x45   :  { %3246 = vmatprep.subr.bf16.mxu1 %v5666_v43  ;;  %v194_v24 = vld [vmem:[#allocation5 + $0x4d0] sm:$0xff]  ;;  %v209_v29 = vld [vmem:[#allocation5 + $0x548] sm:$0xff]  ;;  %v203_v30 = vld [vmem:[#allocation5 + $0x518] sm:$0xff]  ;;  %v5693_v33 = vpack.c.bf16 %v192_v15, %v184_v14 }
  0x46   :  { %7287 = vst [vmem:[#allocation47_spill] sm:$0xff] %v5687_v12  ;;  %7288 = vst [vmem:[#allocation48_spill] sm:$0xff] %v5690_v23  ;;  %v211_v32 = vld [vmem:[#allocation5 + $0x558] sm:$0xff]  ;;  %v5697_v38 = vpack.c.bf16 %v194_v24, %v186_v21  ;;  %v5699_v41 = vpack.c.bf16 %v209_v29, %v201_v28  ;;  %v200_v42 = vld [vmem:[#allocation5 + $0x500] sm:$0xff] }
  0x47   :  { %3184 = vmatpush1.bf16.msra.mxu0 %v5669_v50  ;;  %7289 = vst [vmem:[#allocation49_spill] sm:$0xff] %v5693_v33  ;;  %v208_v45 = vld [vmem:[#allocation5 + $0x540] sm:$0xff]  ;;  %v202_v46 = vld [vmem:[#allocation5 + $0x510] sm:$0xff]  ;;  %v5702_v47 = vpack.c.bf16 %v211_v32, %v203_v30  ;;  %v217_v49 = vld [vmem:[#allocation5 + $0x588] sm:$0xff] }
  0x48   :  { %3248 = vmatpush1.bf16.msra.mxu1 %v5673_v54  ;;  %3186 = vmatprep.subr.bf16.mxu0 %v5675_v55  ;;  %7290 = vst [vmem:[#allocation50_spill] sm:$0xff] %v5697_v38  ;;  %7291 = vst [vmem:[#allocation51_spill] sm:$0xff] %v5699_v41  ;;  %v210_v48 = vld [vmem:[#allocation5 + $0x550] sm:$0xff]  ;;  %v225_v56 = vld [vmem:[#allocation5 + $0x5c8] sm:$0xff]  ;;  %v5705_v61 = vpack.c.bf16 %v208_v45, %v200_v42 }
  0x49   :  { %3250 = vmatprep.subr.bf16.mxu1 %v5678_v60  ;;  %7292 = vst [vmem:[#allocation52_spill] sm:$0xff] %v5702_v47  ;;  %v219_v58 = vld [vmem:[#allocation5 + $0x598] sm:$0xff]  ;;  %v5709_v62 = vpack.c.bf16 %v210_v48, %v202_v46  ;;  %v5711_v3 = vpack.c.bf16 %v225_v56, %v217_v49  ;;  %v216_v5 = vld [vmem:[#allocation5 + $0x580] sm:$0xff]  ;;  %v218_v14 = vld [vmem:[#allocation5 + $0x590] sm:$0xff] }
  0x4a   :  { %v227_v59 = vld [vmem:[#allocation5 + $0x5d8] sm:$0xff]  ;;  %7293 = vst [vmem:[#allocation53_spill] sm:$0xff] %v5705_v61  ;;  %v224_v6 = vld [vmem:[#allocation5 + $0x5c0] sm:$0xff]  ;;  %v226_v21 = vld [vmem:[#allocation5 + $0x5d0] sm:$0xff] }
  0x4b   :  { %3188 = vmatpush1.bf16.msra.mxu0 %v5681_v10  ;;  %7294 = vst [vmem:[#allocation54_spill] sm:$0xff] %v5709_v62  ;;  %7295 = vst [vmem:[#allocation55_spill] sm:$0xff] %v5711_v3  ;;  %v5714_v15 = vpack.c.bf16 %v227_v59, %v219_v58  ;;  %v233_v24 = vld [vmem:[#allocation5 + $0x608] sm:$0xff]  ;;  %v235_v29 = vld [vmem:[#allocation5 + $0x618] sm:$0xff]  ;;  %v5717_v32 = vpack.c.bf16 %v224_v6, %v216_v5  ;;  %v5721_v42 = vpack.c.bf16 %v226_v21, %v218_v14 }
  0x4c   :  { %3252 = vmatpush1.bf16.msra.mxu1 %v5685_v11  ;;  %3190 = vmatprep.subr.bf16.mxu0 %v5687_v12  ;;  %v241_v28 = vld [vmem:[#allocation5 + $0x648] sm:$0xff]  ;;  %v243_v30 = vld [vmem:[#allocation5 + $0x658] sm:$0xff]  ;;  %v232_v46 = vld [vmem:[#allocation5 + $0x600] sm:$0xff] }
  0x4d   :  { %3254 = vmatprep.subr.bf16.mxu1 %v5690_v23  ;;  %7296 = vst [vmem:[#allocation56_spill] sm:$0xff] %v5714_v15  ;;  %7297 = vst [vmem:[#allocation57_spill] sm:$0xff] %v5717_v32  ;;  %v5723_v45 = vpack.c.bf16 %v241_v28, %v233_v24  ;;  %v240_v48 = vld [vmem:[#allocation5 + $0x640] sm:$0xff]  ;;  %v234_v49 = vld [vmem:[#allocation5 + $0x610] sm:$0xff]  ;;  %v5726_v56 = vpack.c.bf16 %v243_v30, %v235_v29 }
  0x4e   :  { %7298 = vst [vmem:[#allocation58_spill] sm:$0xff] %v5721_v42  ;;  %v242_v58 = vld [vmem:[#allocation5 + $0x650] sm:$0xff]  ;;  %v249_v59 = vld [vmem:[#allocation5 + $0x688] sm:$0xff]  ;;  %v251_v5 = vld [vmem:[#allocation5 + $0x698] sm:$0xff] }
  0x4f   :  { %3192 = vmatpush1.bf16.msra.mxu0 %v5693_v33  ;;  %7299 = vst [vmem:[#allocation59_spill] sm:$0xff] %v5723_v45  ;;  %7300 = vst [vmem:[#allocation60_spill] sm:$0xff] %v5726_v56  ;;  %v257_v0 = vld [vmem:[#allocation5 + $0x6c8] sm:$0xff]  ;;  %v259_v6 = vld [vmem:[#allocation5 + $0x6d8] sm:$0xff]  ;;  %v5733_v14 = vpack.c.bf16 %v242_v58, %v234_v49 }
  0x50   :  { %3256 = vmatpush1.bf16.msra.mxu1 %v5697_v38  ;;  %3194 = vmatprep.subr.bf16.mxu0 %v5699_v41  ;;  %v5735_v21 = vpack.c.bf16 %v257_v0, %v249_v59  ;;  %v248_v24 = vld [vmem:[#allocation5 + $0x680] sm:$0xff]  ;;  %v250_v29 = vld [vmem:[#allocation5 + $0x690] sm:$0xff]  ;;  %v5738_v30 = vpack.c.bf16 %v259_v6, %v251_v5 }
  0x51   :  { %3258 = vmatprep.subr.bf16.mxu1 %v5702_v47  ;;  %7302 = vst [vmem:[#allocation62_spill] sm:$0xff] %v5733_v14  ;;  %v256_v28 = vld [vmem:[#allocation5 + $0x6c0] sm:$0xff]  ;;  %v266_v5 = vld [vmem:[#allocation5 + $0x710] sm:$0xff] }
  0x52   :  { %7303 = vst [vmem:[#allocation63_spill] sm:$0xff] %v5735_v21  ;;  %7304 = vst [vmem:[#allocation64_spill] sm:$0xff] %v5738_v30  ;;  %v264_v58 = vld [vmem:[#allocation5 + $0x700] sm:$0xff] }
  0x53   :  { %3196 = vmatpush1.bf16.msra.mxu0 %v5705_v61  ;;  %v272_v59 = vld [vmem:[#allocation5 + $0x740] sm:$0xff]  ;;  %v93_v61 = vld [vmem:[#allocation5 + $0x1a8] sm:$0xff] }
  0x54   :  { %3260 = vmatpush1.bf16.msra.mxu1 %v5709_v62  ;;  %3198 = vmatprep.subr.bf16.mxu0 %v5711_v3  ;;  %v5729_v62 = vpack.c.bf16 %v240_v48, %v232_v46  ;;  %v265_v3 = vld [vmem:[#allocation5 + $0x708] sm:$0xff]  ;;  %v267_v46 = vld [vmem:[#allocation5 + $0x718] sm:$0xff] }
  0x55   :  { %3262 = vmatprep.subr.bf16.mxu1 %v5714_v15  ;;  %v258_v15 = vld [vmem:[#allocation5 + $0x6d0] sm:$0xff]  ;;  %v275_v48 = vld [vmem:[#allocation5 + $0x758] sm:$0xff] }
  0x56   :  { %7301 = vst [vmem:[#allocation61_spill] sm:$0xff] %v5729_v62  ;;  %v5745_v0 = vpack.c.bf16 %v258_v15, %v250_v29  ;;  %v5750_v6 = vpack.c.bf16 %v275_v48, %v267_v46  ;;  %v288_v29 = vld [vmem:[#allocation5 + $0x7c0] sm:$0xff]  ;;  %v282_v46 = vld [vmem:[#allocation5 + $0x790] sm:$0xff] }
  0x57   :  { %3200 = vmatpush1.bf16.msra.mxu0 %v5717_v32  ;;  %v273_v32 = vld [vmem:[#allocation5 + $0x748] sm:$0xff] }
  0x58   :  { %3264 = vmatpush1.bf16.msra.mxu1 %v5721_v42  ;;  %3202 = vmatprep.subr.bf16.mxu0 %v5723_v45  ;;  %v5741_v42 = vpack.c.bf16 %v256_v28, %v248_v24  ;;  %7306 = vst [vmem:[#allocation66_spill] sm:$0xff] %v5745_v0  ;;  %v5747_v49 = vpack.c.bf16 %v273_v32, %v265_v3  ;;  %7308 = vst [vmem:[#allocation68_spill] sm:$0xff] %v5750_v6  ;;  %v281_v45 = vld [vmem:[#allocation5 + $0x788] sm:$0xff]  ;;  %v283_v24 = vld [vmem:[#allocation5 + $0x798] sm:$0xff] }
  0x59   :  { %3266 = vmatprep.subr.bf16.mxu1 %v5726_v56  ;;  %v274_v56 = vld [vmem:[#allocation5 + $0x750] sm:$0xff]  ;;  %v291_v28 = vld [vmem:[#allocation5 + $0x7d8] sm:$0xff]  ;;  %v280_v32 = vld [vmem:[#allocation5 + $0x780] sm:$0xff] }
  0x5a   :  { %7305 = vst [vmem:[#allocation65_spill] sm:$0xff] %v5741_v42  ;;  %7307 = vst [vmem:[#allocation67_spill] sm:$0xff] %v5747_v49  ;;  %v5757_v3 = vpack.c.bf16 %v274_v56, %v266_v5  ;;  %v5762_v48 = vpack.c.bf16 %v291_v28, %v283_v24  ;;  %v44_v56 = vld [vmem:[#allocation5 + $0x20] sm:$0xff]  ;;  %v46_v24 = vld [vmem:[#allocation5 + $0x30] sm:$0xff] }
  0x5b   :  { %3204 = vmatpush1.bf16.msra.mxu0 %v5729_v62  ;;  %v289_v62 = vld [vmem:[#allocation5 + $0x7c8] sm:$0xff]  ;;  %v52_v5 = vld [vmem:[#allocation5 + $0x60] sm:$0xff] }
  0x5c   :  { %3268 = vmatpush1.bf16.msra.mxu1 %v5733_v14  ;;  %3206 = vmatprep.subr.bf16.mxu0 %v5735_v21  ;;  %v5753_v14 = vpack.c.bf16 %v272_v59, %v264_v58  ;;  %7310 = vst [vmem:[#allocation70_spill] sm:$0xff] %v5757_v3  ;;  %v5759_v15 = vpack.c.bf16 %v289_v62, %v281_v45  ;;  %7312 = vst [vmem:[#allocation72_spill] sm:$0xff] %v5762_v48  ;;  %v45_v21 = vld [vmem:[#allocation5 + $0x28] sm:$0xff]  ;;  %v47_v58 = vld [vmem:[#allocation5 + $0x38] sm:$0xff] }
  0x5d   :  { %3270 = vmatprep.subr.bf16.mxu1 %v5738_v30  ;;  %v290_v30 = vld [vmem:[#allocation5 + $0x7d0] sm:$0xff]  ;;  %v55_v59 = vld [vmem:[#allocation5 + $0x78] sm:$0xff] }
  0x5e   :  { %7309 = vst [vmem:[#allocation69_spill] sm:$0xff] %v5753_v14  ;;  %7311 = vst [vmem:[#allocation71_spill] sm:$0xff] %v5759_v15  ;;  %v5769_v62 = vpack.c.bf16 %v290_v30, %v282_v46  ;;  %v5774_v28 = vpack.c.bf16 %v55_v59, %v47_v58  ;;  %v60_v30 = vld [vmem:[#allocation5 + $0xa0] sm:$0xff]  ;;  %v62_v58 = vld [vmem:[#allocation5 + $0xb0] sm:$0xff] }
  0x5f   :  { %3208 = vmatpush1.bf16.msra.mxu0 %v5741_v42  ;;  %v53_v42 = vld [vmem:[#allocation5 + $0x68] sm:$0xff]  ;;  %v68_v46 = vld [vmem:[#allocation5 + $0xe0] sm:$0xff] }
  0x60   :  { %3272 = vmatpush1.bf16.msra.mxu1 %v5745_v0  ;;  %3210 = vmatprep.subr.bf16.mxu0 %v5747_v49  ;;  %v5765_v0 = vpack.c.bf16 %v288_v29, %v280_v32  ;;  %7314 = vst [vmem:[#allocation74_spill] sm:$0xff] %v5769_v62  ;;  %v5771_v45 = vpack.c.bf16 %v53_v42, %v45_v21  ;;  %7316 = vst [vmem:[#allocation76_spill] sm:$0xff] %v5774_v28  ;;  %v61_v49 = vld [vmem:[#allocation5 + $0xa8] sm:$0xff]  ;;  %v63_v32 = vld [vmem:[#allocation5 + $0xb8] sm:$0xff] }
  0x61   :  { %3274 = vmatprep.subr.bf16.mxu1 %v5750_v6  ;;  %v54_v6 = vld [vmem:[#allocation5 + $0x70] sm:$0xff]  ;;  %v71_v29 = vld [vmem:[#allocation5 + $0xf8] sm:$0xff] }
  0x62   :  { %7313 = vst [vmem:[#allocation73_spill] sm:$0xff] %v5765_v0  ;;  %7315 = vst [vmem:[#allocation75_spill] sm:$0xff] %v5771_v45  ;;  %v5781_v42 = vpack.c.bf16 %v54_v6, %v46_v24  ;;  %v5786_v59 = vpack.c.bf16 %v71_v29, %v63_v32  ;;  %v76_v24 = vld [vmem:[#allocation5 + $0x120] sm:$0xff]  ;;  %v78_v29 = vld [vmem:[#allocation5 + $0x130] sm:$0xff] }
  0x63   :  { %3212 = vmatpush1.bf16.msra.mxu0 %v5753_v14  ;;  %v69_v14 = vld [vmem:[#allocation5 + $0xe8] sm:$0xff]  ;;  %v84_v32 = vld [vmem:[#allocation5 + $0x160] sm:$0xff] }
  0x64   :  { %3276 = vmatpush1.bf16.msra.mxu1 %v5757_v3  ;;  %3214 = vmatprep.subr.bf16.mxu0 %v5759_v15  ;;  %v5777_v3 = vpack.c.bf16 %v52_v5, %v44_v56  ;;  %7318 = vst [vmem:[#allocation78_spill] sm:$0xff] %v5781_v42  ;;  %v5783_v21 = vpack.c.bf16 %v69_v14, %v61_v49  ;;  %7320 = vst [vmem:[#allocation80_spill] sm:$0xff] %v5786_v59  ;;  %v77_v15 = vld [vmem:[#allocation5 + $0x128] sm:$0xff]  ;;  %v7321_v56 = vmov 0.0   ;;  %v79_v5 = vld [vmem:[#allocation5 + $0x138] sm:$0xff] }
  0x65   :  { %3278 = vmatprep.subr.bf16.mxu1 %v5762_v48  ;;  %v70_v48 = vld [vmem:[#allocation5 + $0xf0] sm:$0xff]  ;;  %v5791_v14 = vpack.c.bf16 %v68_v46, %v60_v30  ;;  %v95_v30 = vld [vmem:[#allocation5 + $0x1b8] sm:$0xff] }
  0x66   :  { %7317 = vst [vmem:[#allocation77_spill] sm:$0xff] %v5777_v3  ;;  %7319 = vst [vmem:[#allocation79_spill] sm:$0xff] %v5783_v21  ;;  %v5795_v49 = vpack.c.bf16 %v70_v48, %v62_v58  ;;  %v103_v46 = vld [vmem:[#allocation5 + $0x1f8] sm:$0xff]  ;;  %v100_v58 = vld [vmem:[#allocation5 + $0x1e0] sm:$0xff] }
  0x67   :  { %3216 = vmatpush1.bf16.msra.mxu0 %v5765_v0  ;;  %v85_v0 = vld [vmem:[#allocation5 + $0x168] sm:$0xff]  ;;  %7322 = vst [vmem:[#allocation81_spill] sm:$0xff] %v5791_v14 }
  0x68   :  { %3280 = vmatpush1.bf16.msra.mxu1 %v5769_v62  ;;  %3282 = vmatprep.subr.bf16.mxu0 %v5771_v45  ;;  %v87_v62 = vld [vmem:[#allocation5 + $0x178] sm:$0xff]  ;;  %7323 = vst [vmem:[#allocation82_spill] sm:$0xff] %v5795_v49  ;;  %v5797_v6 = vpack.c.bf16 %v85_v0, %v77_v15  ;;  %v86_v45 = vld [vmem:[#allocation5 + $0x170] sm:$0xff]  ;;  %v5805_v0 = vpack.c.bf16 %v84_v32, %v76_v24 }
  0x69   :  { %3346 = vmatprep.subr.bf16.mxu1 %v5774_v28  ;;  %v5800_v28 = vpack.c.bf16 %v87_v62, %v79_v5  ;;  %v5809_v15 = vpack.c.bf16 %v86_v45, %v78_v29  ;;  %v92_v62 = vld [vmem:[#allocation5 + $0x1a0] sm:$0xff]  ;;  %v94_v5 = vld [vmem:[#allocation5 + $0x1b0] sm:$0xff]  ;;  %v111_v24 = vld [vmem:[#allocation5 + $0x238] sm:$0xff] }
  0x6a   :  { %369 = vmatmul.mubr.f32.vlgmr.msra.gmra.mrb[0].mxu0 %v7321_v56  ;;  %7324 = vst [vmem:[#allocation83_spill] sm:$0xff] %v5797_v6  ;;  %7326 = vst [vmem:[#allocation85_spill] sm:$0xff] %v5805_v0  ;;  %v119_v32 = vld [vmem:[#allocation5 + $0x278] sm:$0xff]  ;;  %v108_v45 = vld [vmem:[#allocation5 + $0x220] sm:$0xff] }
  0x6b   :  { %440 = vmatmul.mubr.f32.vlgmr.msra.gmra.mrb[0].mxu1 %v7321_v56  ;;  %3284 = vmatpush1.bf16.msra.mxu0 %v5777_v3  ;;  %7325 = vst [vmem:[#allocation84_spill] sm:$0xff] %v5800_v28  ;;  %v101_v3 = vld [vmem:[#allocation5 + $0x1e8] sm:$0xff]  ;;  %7327 = vst [vmem:[#allocation86_spill] sm:$0xff] %v5809_v15  ;;  %v116_v29 = vld [vmem:[#allocation5 + $0x260] sm:$0xff] }
  0x6c   :  { %3348 = vmatpush1.bf16.msra.mxu1 %v5781_v42  ;;  %3286 = vmatprep.subr.bf16.mxu0 %v5783_v21  ;;  %v5811_v48 = vpack.c.bf16 %v101_v3, %v93_v61  ;;  %v102_v21 = vld [vmem:[#allocation5 + $0x1f0] sm:$0xff]  ;;  %v109_v42 = vld [vmem:[#allocation5 + $0x228] sm:$0xff] }
  0x6d   :  { %3350 = vmatprep.subr.bf16.mxu1 %v5786_v59  ;;  %510 = vmatprep.mubr.f32.mxu0 %v7321_v56  ;;  %v5814_v59 = vpack.c.bf16 %v103_v46, %v95_v30  ;;  %v5821_v61 = vpack.c.bf16 %v102_v21, %v94_v5  ;;  %v110_v30 = vld [vmem:[#allocation5 + $0x230] sm:$0xff]  ;;  %v5826_v46 = vpack.c.bf16 %v119_v32, %v111_v24  ;;  %v132_v5 = vld [vmem:[#allocation5 + $0x2e0] sm:$0xff] }
  0x6e   :  { %581 = vmatprep.mubr.f32.mxu1 %v7321_v56  ;;  %7328 = vst [vmem:[#allocation87_spill] sm:$0xff] %v5811_v48  ;;  %v126_v24 = vld [vmem:[#allocation5 + $0x2b0] sm:$0xff] }
  0x6f   :  { %3288 = vmatpush1.bf16.msra.mxu0 %v5791_v14  ;;  %7329 = vst [vmem:[#allocation88_spill] sm:$0xff] %v5814_v59  ;;  %v117_v14 = vld [vmem:[#allocation5 + $0x268] sm:$0xff]  ;;  %7331 = vst [vmem:[#allocation90_spill] sm:$0xff] %v5821_v61 }
  0x70   :  { %3352 = vmatpush1.bf16.msra.mxu1 %v5795_v49  ;;  %3290 = vmatprep.subr.bf16.mxu0 %v5797_v6  ;;  %v5817_v49 = vpack.c.bf16 %v100_v58, %v92_v62  ;;  %v5823_v3 = vpack.c.bf16 %v117_v14, %v109_v42  ;;  %7333 = vst [vmem:[#allocation92_spill] sm:$0xff] %v5826_v46  ;;  %v125_v6 = vld [vmem:[#allocation5 + $0x2a8] sm:$0xff]  ;;  %v127_v62 = vld [vmem:[#allocation5 + $0x2b8] sm:$0xff]  ;;  %v124_v14 = vld [vmem:[#allocation5 + $0x2a0] sm:$0xff] }
  0x71   :  { %3354 = vmatprep.subr.bf16.mxu1 %v5800_v28  ;;  %v118_v28 = vld [vmem:[#allocation5 + $0x270] sm:$0xff]  ;;  %v135_v58 = vld [vmem:[#allocation5 + $0x2f8] sm:$0xff] }
  0x72   :  { %7330 = vst [vmem:[#allocation89_spill] sm:$0xff] %v5817_v49  ;;  %7332 = vst [vmem:[#allocation91_spill] sm:$0xff] %v5823_v3  ;;  %v5833_v42 = vpack.c.bf16 %v118_v28, %v110_v30  ;;  %v5838_v32 = vpack.c.bf16 %v135_v58, %v127_v62  ;;  %v148_v30 = vld [vmem:[#allocation5 + $0x360] sm:$0xff]  ;;  %v142_v62 = vld [vmem:[#allocation5 + $0x330] sm:$0xff] }
  0x73   :  { %3292 = vmatpush1.bf16.msra.mxu0 %v5805_v0  ;;  %v133_v0 = vld [vmem:[#allocation5 + $0x2e8] sm:$0xff] }
  0x74   :  { %3356 = vmatpush1.bf16.msra.mxu1 %v5809_v15  ;;  %3294 = vmatprep.subr.bf16.mxu0 %v5811_v48  ;;  %v5829_v15 = vpack.c.bf16 %v116_v29, %v108_v45  ;;  %7335 = vst [vmem:[#allocation94_spill] sm:$0xff] %v5833_v42  ;;  %v5835_v21 = vpack.c.bf16 %v133_v0, %v125_v6  ;;  %7337 = vst [vmem:[#allocation96_spill] sm:$0xff] %v5838_v32  ;;  %v141_v48 = vld [vmem:[#allocation5 + $0x328] sm:$0xff]  ;;  %v143_v45 = vld [vmem:[#allocation5 + $0x338] sm:$0xff] }
  0x75   :  { %3358 = vmatprep.subr.bf16.mxu1 %v5814_v59  ;;  %v134_v59 = vld [vmem:[#allocation5 + $0x2f0] sm:$0xff]  ;;  %v151_v29 = vld [vmem:[#allocation5 + $0x378] sm:$0xff]  ;;  %v140_v0 = vld [vmem:[#allocation5 + $0x320] sm:$0xff] }
  0x76   :  { %7334 = vst [vmem:[#allocation93_spill] sm:$0xff] %v5829_v15  ;;  %7336 = vst [vmem:[#allocation95_spill] sm:$0xff] %v5835_v21  ;;  %v5845_v28 = vpack.c.bf16 %v134_v59, %v126_v24  ;;  %v5850_v58 = vpack.c.bf16 %v151_v29, %v143_v45  ;;  %v164_v24 = vld [vmem:[#allocation5 + $0x3e0] sm:$0xff]  ;;  %v158_v45 = vld [vmem:[#allocation5 + $0x3b0] sm:$0xff] }
  0x77   :  { %3296 = vmatpush1.bf16.msra.mxu0 %v5817_v49  ;;  %v149_v49 = vld [vmem:[#allocation5 + $0x368] sm:$0xff] }
  0x78   :  { %3360 = vmatpush1.bf16.msra.mxu1 %v5821_v61  ;;  %3298 = vmatprep.subr.bf16.mxu0 %v5823_v3  ;;  %v5841_v61 = vpack.c.bf16 %v132_v5, %v124_v14  ;;  %7339 = vst [vmem:[#allocation98_spill] sm:$0xff] %v5845_v28  ;;  %v5847_v6 = vpack.c.bf16 %v149_v49, %v141_v48  ;;  %7341 = vst [vmem:[#allocation100_spill] sm:$0xff] %v5850_v58  ;;  %v157_v3 = vld [vmem:[#allocation5 + $0x3a8] sm:$0xff]  ;;  %v159_v14 = vld [vmem:[#allocation5 + $0x3b8] sm:$0xff] }
  0x79   :  { %3362 = vmatprep.subr.bf16.mxu1 %v5826_v46  ;;  %v150_v46 = vld [vmem:[#allocation5 + $0x370] sm:$0xff]  ;;  %v167_v5 = vld [vmem:[#allocation5 + $0x3f8] sm:$0xff]  ;;  %v156_v48 = vld [vmem:[#allocation5 + $0x3a0] sm:$0xff] }
  0x7a   :  { %7338 = vst [vmem:[#allocation97_spill] sm:$0xff] %v5841_v61  ;;  %7340 = vst [vmem:[#allocation99_spill] sm:$0xff] %v5847_v6  ;;  %v5857_v59 = vpack.c.bf16 %v150_v46, %v142_v62  ;;  %v5862_v29 = vpack.c.bf16 %v167_v5, %v159_v14  ;;  %v172_v46 = vld [vmem:[#allocation5 + $0x420] sm:$0xff]  ;;  %v174_v14 = vld [vmem:[#allocation5 + $0x430] sm:$0xff] }
  0x7b   :  { %3300 = vmatpush1.bf16.msra.mxu0 %v5829_v15  ;;  %v165_v15 = vld [vmem:[#allocation5 + $0x3e8] sm:$0xff]  ;;  %v180_v62 = vld [vmem:[#allocation5 + $0x460] sm:$0xff] }
  0x7c   :  { %3364 = vmatpush1.bf16.msra.mxu1 %v5833_v42  ;;  %3302 = vmatprep.subr.bf16.mxu0 %v5835_v21  ;;  %v5853_v42 = vpack.c.bf16 %v148_v30, %v140_v0  ;;  %7343 = vst [vmem:[#allocation102_spill] sm:$0xff] %v5857_v59  ;;  %v5859_v49 = vpack.c.bf16 %v165_v15, %v157_v3  ;;  %7345 = vst [vmem:[#allocation104_spill] sm:$0xff] %v5862_v29  ;;  %v173_v21 = vld [vmem:[#allocation5 + $0x428] sm:$0xff]  ;;  %v175_v0 = vld [vmem:[#allocation5 + $0x438] sm:$0xff] }
  0x7d   :  { %3366 = vmatprep.subr.bf16.mxu1 %v5838_v32  ;;  %v166_v32 = vld [vmem:[#allocation5 + $0x3f0] sm:$0xff]  ;;  %v183_v30 = vld [vmem:[#allocation5 + $0x478] sm:$0xff] }
  0x7e   :  { %7342 = vst [vmem:[#allocation101_spill] sm:$0xff] %v5853_v42  ;;  %7344 = vst [vmem:[#allocation103_spill] sm:$0xff] %v5859_v49  ;;  %v5869_v15 = vpack.c.bf16 %v166_v32, %v158_v45  ;;  %v5874_v5 = vpack.c.bf16 %v183_v30, %v175_v0  ;;  %v188_v32 = vld [vmem:[#allocation5 + $0x4a0] sm:$0xff]  ;;  %v190_v0 = vld [vmem:[#allocation5 + $0x4b0] sm:$0xff] }
  0x7f   :  { %3304 = vmatpush1.bf16.msra.mxu0 %v5841_v61  ;;  %v181_v61 = vld [vmem:[#allocation5 + $0x468] sm:$0xff]  ;;  %v196_v45 = vld [vmem:[#allocation5 + $0x4e0] sm:$0xff] }
  0x80   :  { %3368 = vmatpush1.bf16.msra.mxu1 %v5845_v28  ;;  %3306 = vmatprep.subr.bf16.mxu0 %v5847_v6  ;;  %v5865_v28 = vpack.c.bf16 %v164_v24, %v156_v48  ;;  %7347 = vst [vmem:[#allocation106_spill] sm:$0xff] %v5869_v15  ;;  %v5871_v3 = vpack.c.bf16 %v181_v61, %v173_v21  ;;  %7349 = vst [vmem:[#allocation108_spill] sm:$0xff] %v5874_v5  ;;  %v189_v6 = vld [vmem:[#allocation5 + $0x4a8] sm:$0xff]  ;;  %v191_v48 = vld [vmem:[#allocation5 + $0x4b8] sm:$0xff] }
  0x81   :  { %3370 = vmatprep.subr.bf16.mxu1 %v5850_v58  ;;  %v182_v58 = vld [vmem:[#allocation5 + $0x470] sm:$0xff]  ;;  %v199_v24 = vld [vmem:[#allocation5 + $0x4f8] sm:$0xff] }
  0x82   :  { %7346 = vst [vmem:[#allocation105_spill] sm:$0xff] %v5865_v28  ;;  %7348 = vst [vmem:[#allocation107_spill] sm:$0xff] %v5871_v3  ;;  %v5881_v61 = vpack.c.bf16 %v182_v58, %v174_v14  ;;  %v5886_v30 = vpack.c.bf16 %v199_v24, %v191_v48  ;;  %v204_v58 = vld [vmem:[#allocation5 + $0x520] sm:$0xff]  ;;  %v206_v48 = vld [vmem:[#allocation5 + $0x530] sm:$0xff] }
  0x83   :  { %3308 = vmatpush1.bf16.msra.mxu0 %v5853_v42  ;;  %v197_v42 = vld [vmem:[#allocation5 + $0x4e8] sm:$0xff]  ;;  %v212_v14 = vld [vmem:[#allocation5 + $0x560] sm:$0xff] }
  0x84   :  { %3372 = vmatpush1.bf16.msra.mxu1 %v5857_v59  ;;  %3310 = vmatprep.subr.bf16.mxu0 %v5859_v49  ;;  %v5877_v59 = vpack.c.bf16 %v180_v62, %v172_v46  ;;  %7351 = vst [vmem:[#allocation110_spill] sm:$0xff] %v5881_v61  ;;  %v5883_v21 = vpack.c.bf16 %v197_v42, %v189_v6  ;;  %7353 = vst [vmem:[#allocation112_spill] sm:$0xff] %v5886_v30  ;;  %v205_v49 = vld [vmem:[#allocation5 + $0x528] sm:$0xff]  ;;  %v207_v46 = vld [vmem:[#allocation5 + $0x538] sm:$0xff] }
  0x85   :  { %3374 = vmatprep.subr.bf16.mxu1 %v5862_v29  ;;  %v198_v29 = vld [vmem:[#allocation5 + $0x4f0] sm:$0xff]  ;;  %v215_v62 = vld [vmem:[#allocation5 + $0x578] sm:$0xff] }
  0x86   :  { %7350 = vst [vmem:[#allocation109_spill] sm:$0xff] %v5877_v59  ;;  %7352 = vst [vmem:[#allocation111_spill] sm:$0xff] %v5883_v21  ;;  %v5893_v42 = vpack.c.bf16 %v198_v29, %v190_v0  ;;  %v5898_v24 = vpack.c.bf16 %v215_v62, %v207_v46  ;;  %v220_v29 = vld [vmem:[#allocation5 + $0x5a0] sm:$0xff]  ;;  %v222_v46 = vld [vmem:[#allocation5 + $0x5b0] sm:$0xff] }
  0x87   :  { %3312 = vmatpush1.bf16.msra.mxu0 %v5865_v28  ;;  %v213_v28 = vld [vmem:[#allocation5 + $0x568] sm:$0xff]  ;;  %v228_v0 = vld [vmem:[#allocation5 + $0x5e0] sm:$0xff] }
  0x88   :  { %3376 = vmatpush1.bf16.msra.mxu1 %v5869_v15  ;;  %3314 = vmatprep.subr.bf16.mxu0 %v5871_v3  ;;  %v5889_v15 = vpack.c.bf16 %v196_v45, %v188_v32  ;;  %7355 = vst [vmem:[#allocation114_spill] sm:$0xff] %v5893_v42  ;;  %v5895_v6 = vpack.c.bf16 %v213_v28, %v205_v49  ;;  %7357 = vst [vmem:[#allocation116_spill] sm:$0xff] %v5898_v24  ;;  %v221_v3 = vld [vmem:[#allocation5 + $0x5a8] sm:$0xff]  ;;  %v223_v32 = vld [vmem:[#allocation5 + $0x5b8] sm:$0xff] }
  0x89   :  { %3378 = vmatprep.subr.bf16.mxu1 %v5874_v5  ;;  %v214_v5 = vld [vmem:[#allocation5 + $0x570] sm:$0xff]  ;;  %v231_v45 = vld [vmem:[#allocation5 + $0x5f8] sm:$0xff] }
  0x8a   :  { %7354 = vst [vmem:[#allocation113_spill] sm:$0xff] %v5889_v15  ;;  %7356 = vst [vmem:[#allocation115_spill] sm:$0xff] %v5895_v6  ;;  %v5905_v28 = vpack.c.bf16 %v214_v5, %v206_v48  ;;  %v5910_v62 = vpack.c.bf16 %v231_v45, %v223_v32  ;;  %v236_v5 = vld [vmem:[#allocation5 + $0x620] sm:$0xff]  ;;  %v238_v32 = vld [vmem:[#allocation5 + $0x630] sm:$0xff] }
  0x8b   :  { %3316 = vmatpush1.bf16.msra.mxu0 %v5877_v59  ;;  %v229_v59 = vld [vmem:[#allocation5 + $0x5e8] sm:$0xff]  ;;  %v244_v48 = vld [vmem:[#allocation5 + $0x660] sm:$0xff] }
  0x8c   :  { %3380 = vmatpush1.bf16.msra.mxu1 %v5881_v61  ;;  %3318 = vmatprep.subr.bf16.mxu0 %v5883_v21  ;;  %v5901_v61 = vpack.c.bf16 %v212_v14, %v204_v58  ;;  %7359 = vst [vmem:[#allocation118_spill] sm:$0xff] %v5905_v28  ;;  %v5907_v49 = vpack.c.bf16 %v229_v59, %v221_v3  ;;  %7361 = vst [vmem:[#allocation120_spill] sm:$0xff] %v5910_v62  ;;  %v237_v21 = vld [vmem:[#allocation5 + $0x628] sm:$0xff]  ;;  %v239_v58 = vld [vmem:[#allocation5 + $0x638] sm:$0xff] }
  0x8d   :  { %3382 = vmatprep.subr.bf16.mxu1 %v5886_v30  ;;  %v230_v30 = vld [vmem:[#allocation5 + $0x5f0] sm:$0xff]  ;;  %v247_v14 = vld [vmem:[#allocation5 + $0x678] sm:$0xff] }
  0x8e   :  { %7358 = vst [vmem:[#allocation117_spill] sm:$0xff] %v5901_v61  ;;  %7360 = vst [vmem:[#allocation119_spill] sm:$0xff] %v5907_v49  ;;  %v5917_v59 = vpack.c.bf16 %v230_v30, %v222_v46  ;;  %v5922_v45 = vpack.c.bf16 %v247_v14, %v239_v58  ;;  %v252_v30 = vld [vmem:[#allocation5 + $0x6a0] sm:$0xff]  ;;  %v254_v58 = vld [vmem:[#allocation5 + $0x6b0] sm:$0xff] }
  0x8f   :  { %3320 = vmatpush1.bf16.msra.mxu0 %v5889_v15  ;;  %v245_v15 = vld [vmem:[#allocation5 + $0x668] sm:$0xff]  ;;  %v260_v46 = vld [vmem:[#allocation5 + $0x6e0] sm:$0xff] }
  0x90   :  { %3384 = vmatpush1.bf16.msra.mxu1 %v5893_v42  ;;  %3322 = vmatprep.subr.bf16.mxu0 %v5895_v6  ;;  %v5913_v42 = vpack.c.bf16 %v228_v0, %v220_v29  ;;  %7363 = vst [vmem:[#allocation122_spill] sm:$0xff] %v5917_v59  ;;  %v5919_v3 = vpack.c.bf16 %v245_v15, %v237_v21  ;;  %7365 = vst [vmem:[#allocation124_spill] sm:$0xff] %v5922_v45  ;;  %v253_v6 = vld [vmem:[#allocation5 + $0x6a8] sm:$0xff]  ;;  %v255_v29 = vld [vmem:[#allocation5 + $0x6b8] sm:$0xff] }
  0x91   :  { %3386 = vmatprep.subr.bf16.mxu1 %v5898_v24  ;;  %v246_v24 = vld [vmem:[#allocation5 + $0x670] sm:$0xff]  ;;  %v263_v0 = vld [vmem:[#allocation5 + $0x6f8] sm:$0xff] }
  0x92   :  { %7362 = vst [vmem:[#allocation121_spill] sm:$0xff] %v5913_v42  ;;  %7364 = vst [vmem:[#allocation123_spill] sm:$0xff] %v5919_v3  ;;  %v5929_v15 = vpack.c.bf16 %v246_v24, %v238_v32  ;;  %v5934_v14 = vpack.c.bf16 %v263_v0, %v255_v29  ;;  %v268_v24 = vld [vmem:[#allocation5 + $0x720] sm:$0xff]  ;;  %v270_v29 = vld [vmem:[#allocation5 + $0x730] sm:$0xff] }
  0x93   :  { %3324 = vmatpush1.bf16.msra.mxu0 %v5901_v61  ;;  %v261_v61 = vld [vmem:[#allocation5 + $0x6e8] sm:$0xff]  ;;  %v276_v32 = vld [vmem:[#allocation5 + $0x760] sm:$0xff] }
  0x94   :  { %3388 = vmatpush1.bf16.msra.mxu1 %v5905_v28  ;;  %3326 = vmatprep.subr.bf16.mxu0 %v5907_v49  ;;  %v5925_v28 = vpack.c.bf16 %v244_v48, %v236_v5  ;;  %7367 = vst [vmem:[#allocation126_spill] sm:$0xff] %v5929_v15  ;;  %v5931_v21 = vpack.c.bf16 %v261_v61, %v253_v6  ;;  %7369 = vst [vmem:[#allocation128_spill] sm:$0xff] %v5934_v14  ;;  %v269_v49 = vld [vmem:[#allocation5 + $0x728] sm:$0xff]  ;;  %v271_v5 = vld [vmem:[#allocation5 + $0x738] sm:$0xff] }
  0x95   :  { %3390 = vmatprep.subr.bf16.mxu1 %v5910_v62  ;;  %v262_v62 = vld [vmem:[#allocation5 + $0x6f0] sm:$0xff]  ;;  %v279_v48 = vld [vmem:[#allocation5 + $0x778] sm:$0xff] }
  0x96   :  { %7366 = vst [vmem:[#allocation125_spill] sm:$0xff] %v5925_v28  ;;  %7368 = vst [vmem:[#allocation127_spill] sm:$0xff] %v5931_v21  ;;  %v5941_v61 = vpack.c.bf16 %v262_v62, %v254_v58  ;;  %v5946_v0 = vpack.c.bf16 %v279_v48, %v271_v5  ;;  %v284_v62 = vld [vmem:[#allocation5 + $0x7a0] sm:$0xff]  ;;  %v286_v48 = vld [vmem:[#allocation5 + $0x7b0] sm:$0xff] }
  0x97   :  { %3328 = vmatpush1.bf16.msra.mxu0 %v5913_v42  ;;  %v277_v42 = vld [vmem:[#allocation5 + $0x768] sm:$0xff]  ;;  %v292_v58 = vld [vmem:[#allocation5 + $0x7e0] sm:$0xff] }
  0x98   :  { %3392 = vmatpush1.bf16.msra.mxu1 %v5917_v59  ;;  %3330 = vmatprep.subr.bf16.mxu0 %v5919_v3  ;;  %v5937_v59 = vpack.c.bf16 %v260_v46, %v252_v30  ;;  %7371 = vst [vmem:[#allocation130_spill] sm:$0xff] %v5941_v61  ;;  %v5943_v6 = vpack.c.bf16 %v277_v42, %v269_v49  ;;  %7373 = vst [vmem:[#allocation132_spill] sm:$0xff] %v5946_v0  ;;  %v285_v3 = vld [vmem:[#allocation5 + $0x7a8] sm:$0xff]  ;;  %v287_v30 = vld [vmem:[#allocation5 + $0x7b8] sm:$0xff] }
  0x99   :  { %3394 = vmatprep.subr.bf16.mxu1 %v5922_v45  ;;  %v278_v45 = vld [vmem:[#allocation5 + $0x770] sm:$0xff]  ;;  %v295_v46 = vld [vmem:[#allocation5 + $0x7f8] sm:$0xff] }
  0x9a   :  { %7370 = vst [vmem:[#allocation129_spill] sm:$0xff] %v5937_v59  ;;  %7372 = vst [vmem:[#allocation131_spill] sm:$0xff] %v5943_v6  ;;  %v5953_v42 = vpack.c.bf16 %v278_v45, %v270_v29  ;;  %v5958_v5 = vpack.c.bf16 %v295_v46, %v287_v30  ;;  %v7385_v29 = vld [vmem:[#allocation58_spill] sm:$0xff]  ;;  %v7386_v30 = vld [vmem:[#allocation59_spill] sm:$0xff] }
  0x9b   :  { %3332 = vmatpush1.bf16.msra.mxu0 %v5925_v28  ;;  %v293_v28 = vld [vmem:[#allocation5 + $0x7e8] sm:$0xff]  ;;  %v7387_v46 = vld [vmem:[#allocation60_spill] sm:$0xff] }
  0x9c   :  { %3396 = vmatpush1.bf16.msra.mxu1 %v5929_v15  ;;  %3334 = vmatprep.subr.bf16.mxu0 %v5931_v21  ;;  %v5949_v15 = vpack.c.bf16 %v276_v32, %v268_v24  ;;  %7375 = vst [vmem:[#allocation134_spill] sm:$0xff] %v5953_v42  ;;  %v5955_v49 = vpack.c.bf16 %v293_v28, %v285_v3  ;;  %7377 = vst [vmem:[#allocation136_spill] sm:$0xff] %v5958_v5  ;;  %v7381_v28 = vld [vmem:[#allocation54_spill] sm:$0xff]  ;;  %v7382_v3 = vld [vmem:[#allocation55_spill] sm:$0xff] }
  0x9d   :  { %3398 = vmatprep.subr.bf16.mxu1 %v5934_v14  ;;  %v294_v14 = vld [vmem:[#allocation5 + $0x7f0] sm:$0xff]  ;;  %v5961_v24 = vpack.c.bf16 %v292_v58, %v284_v62  ;;  %v7384_v32 = vld [vmem:[#allocation57_spill] sm:$0xff]  ;;  %v7389_v58 = vld [vmem:[#allocation62_spill] sm:$0xff] }
  0x9e   :  { %7374 = vst [vmem:[#allocation133_spill] sm:$0xff] %v5949_v15  ;;  %7376 = vst [vmem:[#allocation135_spill] sm:$0xff] %v5955_v49  ;;  %v5965_v45 = vpack.c.bf16 %v294_v14, %v286_v48  ;;  %v7383_v14 = vld [vmem:[#allocation56_spill] sm:$0xff]  ;;  %v7388_v62 = vld [vmem:[#allocation61_spill] sm:$0xff] }
  0x9f   :  { %3336 = vmatpush1.bf16.msra.mxu0 %v5937_v59  ;;  %7378 = vst [vmem:[#allocation137_spill] sm:$0xff] %v5961_v24  ;;  %v7390_v48 = vld [vmem:[#allocation63_spill] sm:$0xff] }
  0xa0   :  { %3400 = vmatpush1.bf16.msra.mxu1 %v5941_v61  ;;  %3338 = vmatprep.subr.bf16.mxu0 %v5943_v6  ;;  %7379 = vst [vmem:[#allocation138_spill] sm:$0xff] %v5965_v45 }
  0xa1   :  { %3402 = vmatprep.subr.bf16.mxu1 %v5946_v0 }
  0xa3   :  { %3340 = vmatpush1.bf16.msra.mxu0 %v5949_v15 }
  0xa4   :  { %3404 = vmatpush1.bf16.msra.mxu1 %v5953_v42  ;;  %3342 = vmatprep.subr.bf16.mxu0 %v5955_v49 }
  0xa5   :  { %3406 = vmatprep.subr.bf16.mxu1 %v5958_v5 }
  0xa7   :  { %3344 = vmatpush1.bf16.msra.mxu0 %v5961_v24 }
  0xa8   :  { %3408 = vmatpush1.bf16.msra.mxu1 %v5965_v45  ;;  %3410 = vmatprep.subr.bf16.mxu0 %v5582_v4 }
  0xa9   :  { %3474 = vmatprep.subr.bf16.mxu1 %v5584_v8 }
  0xaa   :  { %511 = vmatmul.mubr.f32.vlgmr.msra.gmra.mrb[2].mxu0 %v7321_v56 }
  0xab   :  { %582 = vmatmul.mubr.f32.vlgmr.msra.gmra.mrb[2].mxu1 %v7321_v56  ;;  %3412 = vmatpush1.bf16.msra.mxu0 %v5586_v9  ;;  %v7380_v56 = vld [vmem:[#allocation53_spill] sm:$0xff] }
  0xac   :  { %3476 = vmatpush1.bf16.msra.mxu1 %v5589_v13  ;;  %3414 = vmatprep.subr.bf16.mxu0 %v5593_v17 }
  0xad   :  { %3478 = vmatprep.subr.bf16.mxu1 %v5595_v18 }
  0xaf   :  { %3416 = vmatpush1.bf16.msra.mxu0 %v5598_v22 }
  0xb0   :  { %3480 = vmatpush1.bf16.msra.mxu1 %v5602_v26  ;;  %3418 = vmatprep.subr.bf16.mxu0 %v5604_v27 }
  0xb1   :  { %3482 = vmatprep.subr.bf16.mxu1 %v5606_v31 }
  0xb3   :  { %3420 = vmatpush1.bf16.msra.mxu0 %v5609_v35 }
  0xb4   :  { %3484 = vmatpush1.bf16.msra.mxu1 %v5613_v39  ;;  %3422 = vmatprep.subr.bf16.mxu0 %v5615_v40 }
  0xb5   :  { %3486 = vmatprep.subr.bf16.mxu1 %v5618_v44 }
  0xb7   :  { %3424 = vmatpush1.bf16.msra.mxu0 %v5621_v51 }
  0xb8   :  { %3488 = vmatpush1.bf16.msra.mxu1 %v5625_v52  ;;  %3426 = vmatprep.subr.bf16.mxu0 %v5627_v53 }
  0xb9   :  { %3490 = vmatprep.subr.bf16.mxu1 %v5630_v57 }
  0xbb   :  { %3428 = vmatpush1.bf16.msra.mxu0 %v5633_v63 }
  0xbc   :  { %3492 = vmatpush1.bf16.msra.mxu1 %v5637_v1  ;;  %3430 = vmatprep.subr.bf16.mxu0 %v5639_v2 }
  0xbd   :  { %3494 = vmatprep.subr.bf16.mxu1 %v5642_v7 }
  0xbf   :  { %3432 = vmatpush1.bf16.msra.mxu0 %v5645_v16 }
  0xc0   :  { %3496 = vmatpush1.bf16.msra.mxu1 %v5649_v19  ;;  %3434 = vmatprep.subr.bf16.mxu0 %v5651_v20 }
  0xc1   :  { %3498 = vmatprep.subr.bf16.mxu1 %v5654_v25 }
  0xc3   :  { %3436 = vmatpush1.bf16.msra.mxu0 %v5657_v34 }
  0xc4   :  { %3500 = vmatpush1.bf16.msra.mxu1 %v5661_v36  ;;  %3438 = vmatprep.subr.bf16.mxu0 %v5663_v37 }
  0xc5   :  { %3502 = vmatprep.subr.bf16.mxu1 %v5666_v43 }
  0xc7   :  { %3440 = vmatpush1.bf16.msra.mxu0 %v5669_v50 }
  0xc8   :  { %3504 = vmatpush1.bf16.msra.mxu1 %v5673_v54  ;;  %3442 = vmatprep.subr.bf16.mxu0 %v5675_v55 }
  0xc9   :  { %3506 = vmatprep.subr.bf16.mxu1 %v5678_v60 }
  0xcb   :  { %3444 = vmatpush1.bf16.msra.mxu0 %v5681_v10 }
  0xcc   :  { %3508 = vmatpush1.bf16.msra.mxu1 %v5685_v11  ;;  %3446 = vmatprep.subr.bf16.mxu0 %v5687_v12 }
  0xcd   :  { %3510 = vmatprep.subr.bf16.mxu1 %v5690_v23 }
  0xcf   :  { %3448 = vmatpush1.bf16.msra.mxu0 %v5693_v33  ;;  %v299_v33 = vld [vmem:[#allocation2 + $0x18] sm:$0xff] }
  0xd0   :  { %3512 = vmatpush1.bf16.msra.mxu1 %v5697_v38  ;;  %3450 = vmatprep.subr.bf16.mxu0 %v5699_v41  ;;  %v296_v41 = vld [vmem:[#allocation2] sm:$0xff]  ;;  %v297_v38 = vld [vmem:[#allocation2 + $0x8] sm:$0xff] }
  0xd1   :  { %3514 = vmatprep.subr.bf16.mxu1 %v5702_v47 }
  0xd3   :  { %3452 = vmatpush1.bf16.msra.mxu0 %v7380_v56  ;;  %v7391_v56 = vld [vmem:[#allocation64_spill] sm:$0xff] }
  0xd4   :  { %3516 = vmatpush1.bf16.msra.mxu1 %v7381_v28  ;;  %3454 = vmatprep.subr.bf16.mxu0 %v7382_v3  ;;  %v7392_v28 = vld [vmem:[#allocation65_spill] sm:$0xff]  ;;  %v7393_v3 = vld [vmem:[#allocation66_spill] sm:$0xff] }
  0xd5   :  { %3518 = vmatprep.subr.bf16.mxu1 %v7383_v14  ;;  %v7394_v14 = vld [vmem:[#allocation67_spill] sm:$0xff] }
  0xd7   :  { %3456 = vmatpush1.bf16.msra.mxu0 %v7384_v32  ;;  %v7395_v32 = vld [vmem:[#allocation68_spill] sm:$0xff] }
  0xd8   :  { %3520 = vmatpush1.bf16.msra.mxu1 %v7385_v29  ;;  %3458 = vmatprep.subr.bf16.mxu0 %v7386_v30  ;;  %v7396_v29 = vld [vmem:[#allocation69_spill] sm:$0xff]  ;;  %v7397_v30 = vld [vmem:[#allocation70_spill] sm:$0xff] }
  0xd9   :  { %3522 = vmatprep.subr.bf16.mxu1 %v7387_v46  ;;  %v7398_v46 = vld [vmem:[#allocation71_spill] sm:$0xff] }
  0xdb   :  { %3460 = vmatpush1.bf16.msra.mxu0 %v7388_v62  ;;  %v7399_v62 = vld [vmem:[#allocation72_spill] sm:$0xff] }
  0xdc   :  { %3524 = vmatpush1.bf16.msra.mxu1 %v7389_v58  ;;  %3462 = vmatprep.subr.bf16.mxu0 %v7390_v48  ;;  %v7400_v58 = vld [vmem:[#allocation73_spill] sm:$0xff]  ;;  %v7401_v48 = vld [vmem:[#allocation74_spill] sm:$0xff] }
  0xdd   :  { %3526 = vmatprep.subr.bf16.mxu1 %v7391_v56  ;;  %v7402_v56 = vld [vmem:[#allocation75_spill] sm:$0xff] }
  0xdf   :  { %3464 = vmatpush1.bf16.msra.mxu0 %v7392_v28  ;;  %v7403_v28 = vld [vmem:[#allocation76_spill] sm:$0xff] }
  0xe0   :  { %3528 = vmatpush1.bf16.msra.mxu1 %v7393_v3  ;;  %3466 = vmatprep.subr.bf16.mxu0 %v7394_v14 }
  0xe1   :  { %3530 = vmatprep.subr.bf16.mxu1 %v7395_v32 }
  0xe3   :  { %3468 = vmatpush1.bf16.msra.mxu0 %v7396_v29  ;;  %v298_v29 = vld [vmem:[#allocation2 + $0x10] sm:$0xff] }
  0xe4   :  { %3532 = vmatpush1.bf16.msra.mxu1 %v7397_v30  ;;  %3470 = vmatprep.subr.bf16.mxu0 %v7398_v46 }
  0xe5   :  { %3534 = vmatprep.subr.bf16.mxu1 %v7399_v62 }
  0xe7   :  { %3472 = vmatpush1.bf16.msra.mxu0 %v7400_v58 }
  0xe8   :  { %3536 = vmatpush1.bf16.msra.mxu1 %v7401_v48  ;;  %3538 = vmatprep.subr.bf16.mxu0 %v7402_v56 }
  0xe9   :  { %3602 = vmatprep.subr.bf16.mxu1 %v7403_v28 }
 0x13d   :  { %v370_v3 = vpop.f32.mrb[0].mxu0 }
 0x13e   :  { %v441_v14 = vpop.f32.mrb[0].mxu1  ;;  %v372_v47 = vpop.f32.mrb[1].mxu0  ;;  %v588_v30 = vadd.f32 %v370_v3, %v296_v41  ;;  %v300_v3 = vld [vmem:[#allocation2 + $0x20] sm:$0xff] }
 0x13f   :  { %v443_v32 = vpop.f32.mrb[1].mxu1  ;;  %v590_v46 = vadd.f32 %v441_v14, %v298_v29  ;;  %v589_v23 = vadd.f32 %v372_v47, %v297_v38  ;;  %v302_v38 = vld [vmem:[#allocation2 + $0x30] sm:$0xff] }
 0x140   :  { %v591_v62 = vadd.f32 %v443_v32, %v299_v33  ;;  %v3105_v12 = vmul.f32 -1.442695, %v588_v30  ;;  %v301_v33 = vld [vmem:[#allocation2 + $0x28] sm:$0xff] }
 0x141   :  { %v3107_v58 = vmul.f32 -1.442695, %v590_v46  ;;  %v3106_v11 = vmul.f32 -1.442695, %v589_v23  ;;  %v303_v23 = vld [vmem:[#allocation2 + $0x38] sm:$0xff] }
 0x142   :  { %v3108_v48 = vmul.f32 -1.442695, %v591_v62  ;;  %5207 = vpow2.f32 %v3105_v12 }
 0x143   :  { %5209 = vpow2.f32 %v3107_v58 }
 0x144   :  { %5211 = vpow2.f32 %v3106_v11 }
 0x145   :  { %5213 = vpow2.f32 %v3108_v48 }
 0x14c   :  { %v5208_v28 = vpop.eup %5207 }
 0x14d   :  { %v5210_v56 = vpop.eup %5209  ;;  %v602_v55 = vadd.f32 1.0, %v5208_v28 }
 0x14e   :  { %v5212_v10 = vpop.eup %5211  ;;  %v614_v54 = vadd.f32 1.0, %v5210_v56 }
 0x14f   :  { %v5214_v60 = vpop.eup %5213  ;;  %v603_v50 = vadd.f32 1.0, %v5212_v10  ;;  %5215 = vrcp.f32 %v602_v55 }
 0x150   :  { %v615_v41 = vadd.f32 1.0, %v5214_v60  ;;  %5217 = vrcp.f32 %v614_v54 }
 0x151   :  { %5219 = vrcp.f32 %v603_v50 }
 0x152   :  { %5221 = vrcp.f32 %v615_v41 }
 0x159   :  { %v5216_v55 = vpop.eup %5215 }
 0x15a   :  { %v5218_v10 = vpop.eup %5217 }
 0x15b   :  { %v5220_v54 = vpop.eup %5219  ;;  %v634_v58 = vmul.f32 0.0, %v5218_v10  ;;  %v7406_v10 = vld [vmem:[#allocation79_spill] sm:$0xff] }
 0x15c   :  { %v5222_v46 = vpop.eup %5221 }
 0x17d   :  { %v512_v47 = vpop.f32.mrb[2].mxu0 }
 0x17e   :  { %v592_v12 = vadd.f32 %v512_v47, %v300_v3  ;;  %v583_v14 = vpop.f32.mrb[2].mxu1  ;;  %v514_v11 = vpop.f32.mrb[3].mxu0  ;;  %v635_v3 = vmul.f32 0.0, %v5222_v46  ;;  %v7408_v46 = vld [vmem:[#allocation81_spill] sm:$0xff] }
 0x17f   :  { %v594_v32 = vadd.f32 %v583_v14, %v302_v38  ;;  %v593_v29 = vadd.f32 %v514_v11, %v301_v33  ;;  %v585_v30 = vpop.f32.mrb[3].mxu1 }
 0x180   :  { %5223 = vtanh.f32 %v592_v12  ;;  %v595_v28 = vadd.f32 %v585_v30, %v303_v23 }
 0x181   :  { %v3109_v56 = vmul.f32 -1.442695, %v594_v32  ;;  %5225 = vtanh.f32 %v593_v29 }
 0x182   :  { %v3110_v60 = vmul.f32 -1.442695, %v595_v28 }
 0x183   :  { %5227 = vpow2.f32 %v3109_v56 }
 0x184   :  { %5229 = vpow2.f32 %v3110_v60  ;;  %v7404_v60 = vld [vmem:[#allocation77_spill] sm:$0xff] }
 0x18a   :  { %v5224_v62 = vpop.eup %5223 }
 0x18b   :  { %v5226_v50 = vpop.eup %5225  ;;  %v636_v48 = vmul.f32 %v5224_v62, %v5216_v55  ;;  %v7405_v55 = vld [vmem:[#allocation78_spill] sm:$0xff] }
 0x18c   :  { %v637_v41 = vmul.f32 %v5226_v50, %v5220_v54  ;;  %v7407_v54 = vld [vmem:[#allocation80_spill] sm:$0xff]  ;;  %v7409_v62 = vld [vmem:[#allocation82_spill] sm:$0xff]  ;;  %v7410_v50 = vld [vmem:[#allocation83_spill] sm:$0xff] }
 0x18d   :  { %v5228_v38 = vpop.eup %5227  ;;  %v6038_v33 = vadd.f32 %v636_v48, %v634_v58  ;;  %v7411_v58 = vld [vmem:[#allocation84_spill] sm:$0xff]  ;;  %v7412_v48 = vld [vmem:[#allocation85_spill] sm:$0xff] }
 0x18e   :  { %v5230_v47 = vpop.eup %5229  ;;  %v628_v23 = vadd.f32 1.0, %v5228_v38  ;;  %v6040_v12 = vadd.f32 %v637_v41, %v635_v3  ;;  %v7413_v3 = vld [vmem:[#allocation86_spill] sm:$0xff]  ;;  %v7414_v41 = vld [vmem:[#allocation87_spill] sm:$0xff]  ;;  %v7415_v38 = vld [vmem:[#allocation88_spill] sm:$0xff] }
 0x18f   :  { %5231 = vtanh.f32 %v6038_v33  ;;  %v629_v14 = vadd.f32 1.0, %v5230_v47  ;;  %v7416_v47 = vld [vmem:[#allocation89_spill] sm:$0xff] }
 0x190   :  { %5233 = vrcp.f32 %v628_v23  ;;  %v7417_v23 = vld [vmem:[#allocation90_spill] sm:$0xff] }
 0x191   :  { %5235 = vtanh.f32 %v6040_v12 }
 0x192   :  { %5237 = vrcp.f32 %v629_v14  ;;  %v7418_v14 = vld [vmem:[#allocation91_spill] sm:$0xff] }
 0x199   :  { %v5232_v11 = vpop.eup %5231 }
 0x19a   :  { %v5234_v32 = vpop.eup %5233 }
 0x19b   :  { %v5236_v29 = vpop.eup %5235  ;;  %v6044_v56 = vmul.f32 %v5234_v32, %v5232_v11  ;;  %v7419_v11 = vld [vmem:[#allocation92_spill] sm:$0xff]  ;;  %v7420_v32 = vld [vmem:[#allocation93_spill] sm:$0xff] }
 0x19c   :  { %v5238_v30 = vpop.eup %5237 }
 0x19d   :  { %v643_v28 = vmul.f32 %v5238_v30, %v5236_v29  ;;  %v7421_v29 = vld [vmem:[#allocation94_spill] sm:$0xff]  ;;  %v7422_v30 = vld [vmem:[#allocation95_spill] sm:$0xff] }
 0x19f   :  { %717 = vmatprep.mubr.f32.mxu0 %v643_v28  ;;  %788 = vmatprep.mubr.f32.mxu1 %v643_v28 }
 0x1a0   :  { %718 = vmatmul.mubr.f32.vlgmr.msra.gmra.mrb[4].mxu0 %v6044_v56  ;;  %789 = vmatmul.mubr.f32.vlgmr.msra.gmra.mrb[4].mxu1 %v6044_v56 }
 0x1a1   :  { %3540 = vmatpush1.bf16.msra.mxu0 %v7404_v60  ;;  %3604 = vmatpush1.bf16.msra.mxu1 %v7405_v55 }
 0x1a2   :  { %859 = vmatprep.mubr.f32.mxu0 %v643_v28  ;;  %930 = vmatprep.mubr.f32.mxu1 %v643_v28  ;;  %v7423_v28 = vld [vmem:[#allocation96_spill] sm:$0xff] }
 0x1a3   :  { %3542 = vmatprep.subr.bf16.mxu0 %v7406_v10  ;;  %3606 = vmatprep.subr.bf16.mxu1 %v7407_v54 }
 0x1a5   :  { %3544 = vmatpush1.bf16.msra.mxu0 %v7408_v46  ;;  %3608 = vmatpush1.bf16.msra.mxu1 %v7409_v62 }
 0x1a6   :  { %3546 = vmatprep.subr.bf16.mxu0 %v7410_v50  ;;  %3610 = vmatprep.subr.bf16.mxu1 %v7411_v58 }
 0x1a9   :  { %3548 = vmatpush1.bf16.msra.mxu0 %v7412_v48  ;;  %3612 = vmatpush1.bf16.msra.mxu1 %v7413_v3  ;;  %v7424_v3 = vld [vmem:[#allocation97_spill] sm:$0xff] }
 0x1aa   :  { %3550 = vmatprep.subr.bf16.mxu0 %v7414_v41  ;;  %3614 = vmatprep.subr.bf16.mxu1 %v7415_v38  ;;  %v7425_v41 = vld [vmem:[#allocation98_spill] sm:$0xff]  ;;  %v7426_v38 = vld [vmem:[#allocation99_spill] sm:$0xff] }
 0x1ad   :  { %3552 = vmatpush1.bf16.msra.mxu0 %v7416_v47  ;;  %3616 = vmatpush1.bf16.msra.mxu1 %v7417_v23  ;;  %v7427_v47 = vld [vmem:[#allocation100_spill] sm:$0xff]  ;;  %v7428_v23 = vld [vmem:[#allocation101_spill] sm:$0xff] }
 0x1ae   :  { %3554 = vmatprep.subr.bf16.mxu0 %v7418_v14  ;;  %3618 = vmatprep.subr.bf16.mxu1 %v7419_v11  ;;  %v7429_v14 = vld [vmem:[#allocation102_spill] sm:$0xff]  ;;  %v7430_v11 = vld [vmem:[#allocation103_spill] sm:$0xff] }
 0x1b1   :  { %3556 = vmatpush1.bf16.msra.mxu0 %v7420_v32  ;;  %3620 = vmatpush1.bf16.msra.mxu1 %v7421_v29  ;;  %v7431_v32 = vld [vmem:[#allocation104_spill] sm:$0xff]  ;;  %v7432_v29 = vld [vmem:[#allocation105_spill] sm:$0xff] }
 0x1b2   :  { %3558 = vmatprep.subr.bf16.mxu0 %v7422_v30  ;;  %3622 = vmatprep.subr.bf16.mxu1 %v7423_v28  ;;  %v7433_v30 = vld [vmem:[#allocation106_spill] sm:$0xff]  ;;  %v7434_v28 = vld [vmem:[#allocation107_spill] sm:$0xff] }
 0x1b5   :  { %3560 = vmatpush1.bf16.msra.mxu0 %v7424_v3  ;;  %3624 = vmatpush1.bf16.msra.mxu1 %v7425_v41  ;;  %v7435_v3 = vld [vmem:[#allocation108_spill] sm:$0xff]  ;;  %v7436_v41 = vld [vmem:[#allocation109_spill] sm:$0xff] }
 0x1b6   :  { %3562 = vmatprep.subr.bf16.mxu0 %v7426_v38  ;;  %3626 = vmatprep.subr.bf16.mxu1 %v7427_v47  ;;  %v7437_v38 = vld [vmem:[#allocation110_spill] sm:$0xff]  ;;  %v7438_v47 = vld [vmem:[#allocation111_spill] sm:$0xff] }
 0x1b9   :  { %3564 = vmatpush1.bf16.msra.mxu0 %v7428_v23  ;;  %3628 = vmatpush1.bf16.msra.mxu1 %v7429_v14  ;;  %v7439_v23 = vld [vmem:[#allocation112_spill] sm:$0xff]  ;;  %v7440_v14 = vld [vmem:[#allocation113_spill] sm:$0xff] }
 0x1ba   :  { %3566 = vmatprep.subr.bf16.mxu0 %v7430_v11  ;;  %3630 = vmatprep.subr.bf16.mxu1 %v7431_v32  ;;  %v7441_v11 = vld [vmem:[#allocation114_spill] sm:$0xff]  ;;  %v7442_v32 = vld [vmem:[#allocation115_spill] sm:$0xff] }
 0x1bd   :  { %3568 = vmatpush1.bf16.msra.mxu0 %v7432_v29  ;;  %3632 = vmatpush1.bf16.msra.mxu1 %v7433_v30  ;;  %v7443_v29 = vld [vmem:[#allocation116_spill] sm:$0xff]  ;;  %v7444_v30 = vld [vmem:[#allocation117_spill] sm:$0xff] }
 0x1be   :  { %3570 = vmatprep.subr.bf16.mxu0 %v7434_v28  ;;  %3634 = vmatprep.subr.bf16.mxu1 %v7435_v3  ;;  %v7445_v28 = vld [vmem:[#allocation118_spill] sm:$0xff]  ;;  %v7446_v3 = vld [vmem:[#allocation119_spill] sm:$0xff] }
 0x1c1   :  { %3572 = vmatpush1.bf16.msra.mxu0 %v7436_v41  ;;  %3636 = vmatpush1.bf16.msra.mxu1 %v7437_v38  ;;  %v7447_v41 = vld [vmem:[#allocation120_spill] sm:$0xff]  ;;  %v7448_v38 = vld [vmem:[#allocation121_spill] sm:$0xff] }
 0x1c2   :  { %3574 = vmatprep.subr.bf16.mxu0 %v7438_v47  ;;  %3638 = vmatprep.subr.bf16.mxu1 %v7439_v23  ;;  %v7449_v47 = vld [vmem:[#allocation122_spill] sm:$0xff]  ;;  %v7450_v23 = vld [vmem:[#allocation123_spill] sm:$0xff] }
 0x1c5   :  { %3576 = vmatpush1.bf16.msra.mxu0 %v7440_v14  ;;  %3640 = vmatpush1.bf16.msra.mxu1 %v7441_v11  ;;  %v7451_v14 = vld [vmem:[#allocation124_spill] sm:$0xff]  ;;  %v7452_v11 = vld [vmem:[#allocation125_spill] sm:$0xff] }
 0x1c6   :  { %3578 = vmatprep.subr.bf16.mxu0 %v7442_v32  ;;  %3642 = vmatprep.subr.bf16.mxu1 %v7443_v29  ;;  %v7453_v32 = vld [vmem:[#allocation126_spill] sm:$0xff] }
 0x1c9   :  { %3580 = vmatpush1.bf16.msra.mxu0 %v7444_v30  ;;  %3644 = vmatpush1.bf16.msra.mxu1 %v7445_v28  ;;  %v7454_v30 = vld [vmem:[#allocation128_spill] sm:$0xff] }
 0x1ca   :  { %3582 = vmatprep.subr.bf16.mxu0 %v7446_v3  ;;  %3646 = vmatprep.subr.bf16.mxu1 %v7447_v41 }
 0x1cd   :  { %3584 = vmatpush1.bf16.msra.mxu0 %v7448_v38  ;;  %3648 = vmatpush1.bf16.msra.mxu1 %v7449_v47 }
 0x1ce   :  { %3586 = vmatprep.subr.bf16.mxu0 %v7450_v23  ;;  %3650 = vmatprep.subr.bf16.mxu1 %v7451_v14 }
 0x1d1   :  { %3588 = vmatpush1.bf16.msra.mxu0 %v7452_v11  ;;  %3652 = vmatpush1.bf16.msra.mxu1 %v7453_v32 }
 0x1d2   :  { %3590 = vmatprep.subr.bf16.mxu0 %v5931_v21  ;;  %3654 = vmatprep.subr.bf16.mxu1 %v7454_v30 }
 0x1d5   :  { %3592 = vmatpush1.bf16.msra.mxu0 %v5937_v59  ;;  %3656 = vmatpush1.bf16.msra.mxu1 %v5941_v61 }
 0x1d6   :  { %3594 = vmatprep.subr.bf16.mxu0 %v5943_v6  ;;  %3658 = vmatprep.subr.bf16.mxu1 %v5946_v0 }
 0x1d9   :  { %3596 = vmatpush1.bf16.msra.mxu0 %v5949_v15  ;;  %3660 = vmatpush1.bf16.msra.mxu1 %v5953_v42 }
 0x1da   :  { %3598 = vmatprep.subr.bf16.mxu0 %v5955_v49  ;;  %3662 = vmatprep.subr.bf16.mxu1 %v5958_v5 }
 0x1dd   :  { %3600 = vmatpush1.bf16.msra.mxu0 %v5961_v24  ;;  %3664 = vmatpush1.bf16.msra.mxu1 %v5965_v45 }
 0x1de   :  { %3666 = vmatprep.subr.bf16.mxu0 %v5582_v4  ;;  %3730 = vmatprep.subr.bf16.mxu1 %v5584_v8 }
 0x1e0   :  { %860 = vmatmul.mubr.f32.vlgmr.msra.gmra.mrb[6].mxu0 %v6044_v56  ;;  %931 = vmatmul.mubr.f32.vlgmr.msra.gmra.mrb[6].mxu1 %v6044_v56  ;;  %v7455_v56 = vld [vmem:[#allocation41_spill] sm:$0xff] }
 0x1e1   :  { %3668 = vmatpush1.bf16.msra.mxu0 %v5586_v9  ;;  %3732 = vmatpush1.bf16.msra.mxu1 %v5589_v13 }
 0x1e2   :  { %3670 = vmatprep.subr.bf16.mxu0 %v5593_v17  ;;  %3734 = vmatprep.subr.bf16.mxu1 %v5595_v18 }
 0x1e5   :  { %3672 = vmatpush1.bf16.msra.mxu0 %v5598_v22  ;;  %3736 = vmatpush1.bf16.msra.mxu1 %v5602_v26 }
 0x1e6   :  { %3674 = vmatprep.subr.bf16.mxu0 %v5604_v27  ;;  %3738 = vmatprep.subr.bf16.mxu1 %v5606_v31 }
 0x1e9   :  { %3676 = vmatpush1.bf16.msra.mxu0 %v5609_v35  ;;  %3740 = vmatpush1.bf16.msra.mxu1 %v5613_v39 }
 0x1ea   :  { %3678 = vmatprep.subr.bf16.mxu0 %v5615_v40  ;;  %3742 = vmatprep.subr.bf16.mxu1 %v5618_v44 }
 0x1ed   :  { %3680 = vmatpush1.bf16.msra.mxu0 %v5621_v51  ;;  %3744 = vmatpush1.bf16.msra.mxu1 %v5625_v52 }
 0x1ee   :  { %3682 = vmatprep.subr.bf16.mxu0 %v5627_v53  ;;  %3746 = vmatprep.subr.bf16.mxu1 %v5630_v57  ;;  %v646_v57 = vld [vmem:[#allocation2 + $0x48] sm:$0xff]  ;;  %v648_v53 = vld [vmem:[#allocation2 + $0x58] sm:$0xff] }
 0x1f1   :  { %3684 = vmatpush1.bf16.msra.mxu0 %v5633_v63  ;;  %3748 = vmatpush1.bf16.msra.mxu1 %v5637_v1  ;;  %v645_v63 = vld [vmem:[#allocation2 + $0x40] sm:$0xff] }
 0x1f2   :  { %3686 = vmatprep.subr.bf16.mxu0 %v5639_v2  ;;  %3750 = vmatprep.subr.bf16.mxu1 %v5642_v7  ;;  %v7456_v2 = vld [vmem:[#allocation42_spill] sm:$0xff]  ;;  %v7457_v7 = vld [vmem:[#allocation43_spill] sm:$0xff] }
 0x1f5   :  { %3688 = vmatpush1.bf16.msra.mxu0 %v5645_v16  ;;  %3752 = vmatpush1.bf16.msra.mxu1 %v5649_v19  ;;  %v7458_v16 = vld [vmem:[#allocation44_spill] sm:$0xff]  ;;  %v7459_v19 = vld [vmem:[#allocation45_spill] sm:$0xff] }
 0x1f6   :  { %3690 = vmatprep.subr.bf16.mxu0 %v5651_v20  ;;  %3754 = vmatprep.subr.bf16.mxu1 %v5654_v25  ;;  %v7460_v20 = vld [vmem:[#allocation46_spill] sm:$0xff]  ;;  %v7461_v25 = vld [vmem:[#allocation47_spill] sm:$0xff] }
 0x1f9   :  { %3692 = vmatpush1.bf16.msra.mxu0 %v5657_v34  ;;  %3756 = vmatpush1.bf16.msra.mxu1 %v5661_v36  ;;  %v7462_v34 = vld [vmem:[#allocation48_spill] sm:$0xff]  ;;  %v7463_v36 = vld [vmem:[#allocation49_spill] sm:$0xff] }
 0x1fa   :  { %3694 = vmatprep.subr.bf16.mxu0 %v5663_v37  ;;  %3758 = vmatprep.subr.bf16.mxu1 %v5666_v43  ;;  %v7464_v37 = vld [vmem:[#allocation50_spill] sm:$0xff]  ;;  %v7465_v43 = vld [vmem:[#allocation51_spill] sm:$0xff] }
 0x1fd   :  { %3696 = vmatpush1.bf16.msra.mxu0 %v7455_v56  ;;  %3760 = vmatpush1.bf16.msra.mxu1 %v7456_v2  ;;  %v7466_v56 = vld [vmem:[#allocation52_spill] sm:$0xff]  ;;  %v7467_v2 = vld [vmem:[#allocation53_spill] sm:$0xff] }
 0x1fe   :  { %3698 = vmatprep.subr.bf16.mxu0 %v7457_v7  ;;  %3762 = vmatprep.subr.bf16.mxu1 %v7458_v16  ;;  %v7468_v7 = vld [vmem:[#allocation54_spill] sm:$0xff]  ;;  %v7469_v16 = vld [vmem:[#allocation55_spill] sm:$0xff] }
 0x201   :  { %3700 = vmatpush1.bf16.msra.mxu0 %v7459_v19  ;;  %3764 = vmatpush1.bf16.msra.mxu1 %v7460_v20  ;;  %v7470_v19 = vld [vmem:[#allocation56_spill] sm:$0xff]  ;;  %v7471_v20 = vld [vmem:[#allocation57_spill] sm:$0xff] }
 0x202   :  { %3702 = vmatprep.subr.bf16.mxu0 %v7461_v25  ;;  %3766 = vmatprep.subr.bf16.mxu1 %v7462_v34  ;;  %v7472_v25 = vld [vmem:[#allocation58_spill] sm:$0xff]  ;;  %v7473_v34 = vld [vmem:[#allocation59_spill] sm:$0xff] }
 0x205   :  { %3704 = vmatpush1.bf16.msra.mxu0 %v7463_v36  ;;  %3768 = vmatpush1.bf16.msra.mxu1 %v7464_v37  ;;  %v7474_v36 = vld [vmem:[#allocation60_spill] sm:$0xff]  ;;  %v7475_v37 = vld [vmem:[#allocation61_spill] sm:$0xff] }
 0x206   :  { %3706 = vmatprep.subr.bf16.mxu0 %v7465_v43  ;;  %3770 = vmatprep.subr.bf16.mxu1 %v7466_v56  ;;  %v7476_v43 = vld [vmem:[#allocation62_spill] sm:$0xff]  ;;  %v7477_v56 = vld [vmem:[#allocation63_spill] sm:$0xff] }
 0x209   :  { %3708 = vmatpush1.bf16.msra.mxu0 %v7467_v2  ;;  %3772 = vmatpush1.bf16.msra.mxu1 %v7468_v7  ;;  %v7478_v2 = vld [vmem:[#allocation64_spill] sm:$0xff]  ;;  %v7479_v7 = vld [vmem:[#allocation65_spill] sm:$0xff] }
 0x20a   :  { %3710 = vmatprep.subr.bf16.mxu0 %v7469_v16  ;;  %3774 = vmatprep.subr.bf16.mxu1 %v7470_v19  ;;  %v7480_v16 = vld [vmem:[#allocation66_spill] sm:$0xff]  ;;  %v7481_v19 = vld [vmem:[#allocation67_spill] sm:$0xff] }
 0x20d   :  { %3712 = vmatpush1.bf16.msra.mxu0 %v7471_v20  ;;  %3776 = vmatpush1.bf16.msra.mxu1 %v7472_v25  ;;  %v7482_v20 = vld [vmem:[#allocation68_spill] sm:$0xff]  ;;  %v7483_v25 = vld [vmem:[#allocation69_spill] sm:$0xff] }
 0x20e   :  { %3714 = vmatprep.subr.bf16.mxu0 %v7473_v34  ;;  %3778 = vmatprep.subr.bf16.mxu1 %v7474_v36  ;;  %v7484_v34 = vld [vmem:[#allocation70_spill] sm:$0xff]  ;;  %v7485_v36 = vld [vmem:[#allocation71_spill] sm:$0xff] }
 0x211   :  { %3716 = vmatpush1.bf16.msra.mxu0 %v7475_v37  ;;  %3780 = vmatpush1.bf16.msra.mxu1 %v7476_v43  ;;  %v7486_v37 = vld [vmem:[#allocation72_spill] sm:$0xff]  ;;  %v7487_v43 = vld [vmem:[#allocation73_spill] sm:$0xff] }
 0x212   :  { %3718 = vmatprep.subr.bf16.mxu0 %v7477_v56  ;;  %3782 = vmatprep.subr.bf16.mxu1 %v7478_v2  ;;  %v7488_v56 = vld [vmem:[#allocation74_spill] sm:$0xff]  ;;  %v7489_v2 = vld [vmem:[#allocation75_spill] sm:$0xff] }
 0x215   :  { %3720 = vmatpush1.bf16.msra.mxu0 %v7479_v7  ;;  %3784 = vmatpush1.bf16.msra.mxu1 %v7480_v16  ;;  %v7490_v7 = vld [vmem:[#allocation76_spill] sm:$0xff] }
 0x216   :  { %3722 = vmatprep.subr.bf16.mxu0 %v7481_v19  ;;  %3786 = vmatprep.subr.bf16.mxu1 %v7482_v20 }
 0x219   :  { %3724 = vmatpush1.bf16.msra.mxu0 %v7483_v25  ;;  %3788 = vmatpush1.bf16.msra.mxu1 %v7484_v34  ;;  %v647_v25 = vld [vmem:[#allocation2 + $0x50] sm:$0xff] }
 0x21a   :  { %3726 = vmatprep.subr.bf16.mxu0 %v7485_v36  ;;  %3790 = vmatprep.subr.bf16.mxu1 %v7486_v37 }
 0x21d   :  { %3728 = vmatpush1.bf16.msra.mxu0 %v7487_v43  ;;  %3792 = vmatpush1.bf16.msra.mxu1 %v7488_v56 }
 0x21e   :  { %3794 = vmatprep.subr.bf16.mxu0 %v7489_v2  ;;  %3858 = vmatprep.subr.bf16.mxu1 %v7490_v7 }
 0x273   :  { %v719_v16 = vpop.f32.mrb[4].mxu0  ;;  %v790_v19 = vpop.f32.mrb[4].mxu1 }
 0x274   :  { %v721_v1 = vpop.f32.mrb[5].mxu0  ;;  %v792_v20 = vpop.f32.mrb[5].mxu1  ;;  %v937_v34 = vadd.f32 %v719_v16, %v645_v63  ;;  %v939_v36 = vadd.f32 %v790_v19, %v647_v25  ;;  %v649_v16 = vld [vmem:[#allocation2 + $0x60] sm:$0xff]  ;;  %v651_v19 = vld [vmem:[#allocation2 + $0x70] sm:$0xff] }
 0x275   :  { %v938_v52 = vadd.f32 %v721_v1, %v646_v57  ;;  %v940_v37 = vadd.f32 %v792_v20, %v648_v53  ;;  %v650_v53 = vld [vmem:[#allocation2 + $0x68] sm:$0xff]  ;;  %v652_v57 = vld [vmem:[#allocation2 + $0x78] sm:$0xff] }
 0x276   :  { %v3111_v51 = vmul.f32 -1.442695, %v937_v34  ;;  %v3113_v43 = vmul.f32 -1.442695, %v939_v36 }
 0x277   :  { %v3112_v44 = vmul.f32 -1.442695, %v938_v52  ;;  %v3114_v56 = vmul.f32 -1.442695, %v940_v37 }
 0x278   :  { %5239 = vpow2.f32 %v3111_v51 }
 0x279   :  { %5241 = vpow2.f32 %v3113_v43 }
 0x27a   :  { %5243 = vpow2.f32 %v3112_v44 }
 0x27b   :  { %5245 = vpow2.f32 %v3114_v56 }
 0x282   :  { %v5240_v7 = vpop.eup %5239 }
 0x283   :  { %v5242_v2 = vpop.eup %5241  ;;  %v951_v35 = vadd.f32 1.0, %v5240_v7 }
 0x284   :  { %v5244_v40 = vpop.eup %5243  ;;  %v963_v31 = vadd.f32 1.0, %v5242_v2 }
 0x285   :  { %v5246_v39 = vpop.eup %5245  ;;  %v952_v27 = vadd.f32 1.0, %v5244_v40  ;;  %5247 = vrcp.f32 %v951_v35 }
 0x286   :  { %v964_v63 = vadd.f32 1.0, %v5246_v39  ;;  %5249 = vrcp.f32 %v963_v31 }
 0x287   :  { %5251 = vrcp.f32 %v952_v27 }
 0x288   :  { %5253 = vrcp.f32 %v964_v63 }
 0x28f   :  { %v5248_v35 = vpop.eup %5247 }
 0x290   :  { %v5250_v40 = vpop.eup %5249 }
 0x291   :  { %v5252_v7 = vpop.eup %5251  ;;  %v983_v27 = vmul.f32 %v5250_v40, %v6038_v33  ;;  %v7495_v40 = vld [vmem:[#allocation90_spill] sm:$0xff] }
 0x292   :  { %v5254_v31 = vpop.eup %5253 }
 0x293   :  { %v984_v63 = vmul.f32 %v5254_v31, %v6040_v12  ;;  %v7497_v31 = vld [vmem:[#allocation92_spill] sm:$0xff] }
 0x2b3   :  { %v861_v52 = vpop.f32.mrb[6].mxu0  ;;  %v932_v1 = vpop.f32.mrb[6].mxu1 }
 0x2b4   :  { %v941_v51 = vadd.f32 %v861_v52, %v649_v16  ;;  %v943_v44 = vadd.f32 %v932_v1, %v651_v19  ;;  %v863_v20 = vpop.f32.mrb[7].mxu0  ;;  %v934_v25 = vpop.f32.mrb[7].mxu1 }
 0x2b5   :  { %v942_v34 = vadd.f32 %v863_v20, %v650_v53  ;;  %v944_v36 = vadd.f32 %v934_v25, %v652_v57 }
 0x2b6   :  { %5255 = vtanh.f32 %v941_v51  ;;  %v3115_v2 = vmul.f32 -1.442695, %v943_v44 }
 0x2b7   :  { %5257 = vtanh.f32 %v942_v34  ;;  %v3116_v39 = vmul.f32 -1.442695, %v944_v36  ;;  %v7491_v36 = vld [vmem:[#allocation86_spill] sm:$0xff] }
 0x2b8   :  { %5259 = vpow2.f32 %v3115_v2  ;;  %v7492_v2 = vld [vmem:[#allocation87_spill] sm:$0xff] }
 0x2b9   :  { %5261 = vpow2.f32 %v3116_v39  ;;  %v7493_v39 = vld [vmem:[#allocation88_spill] sm:$0xff] }
 0x2c0   :  { %v5256_v37 = vpop.eup %5255 }
 0x2c1   :  { %v5258_v43 = vpop.eup %5257  ;;  %v985_v56 = vmul.f32 %v5256_v37, %v5248_v35  ;;  %v7494_v35 = vld [vmem:[#allocation89_spill] sm:$0xff] }
 0x2c2   :  { %v5260_v16 = vpop.eup %5259  ;;  %v986_v19 = vmul.f32 %v5258_v43, %v5252_v7  ;;  %v7496_v7 = vld [vmem:[#allocation91_spill] sm:$0xff]  ;;  %v7498_v37 = vld [vmem:[#allocation93_spill] sm:$0xff]  ;;  %v7499_v43 = vld [vmem:[#allocation94_spill] sm:$0xff] }
 0x2c3   :  { %v5262_v53 = vpop.eup %5261  ;;  %v6180_v57 = vadd.f32 %v985_v56, %v983_v27  ;;  %v977_v52 = vadd.f32 1.0, %v5260_v16  ;;  %v7500_v27 = vld [vmem:[#allocation95_spill] sm:$0xff]  ;;  %v7501_v56 = vld [vmem:[#allocation96_spill] sm:$0xff]  ;;  %v7502_v16 = vld [vmem:[#allocation97_spill] sm:$0xff] }
 0x2c4   :  { %v6182_v1 = vadd.f32 %v986_v19, %v984_v63  ;;  %v978_v51 = vadd.f32 1.0, %v5262_v53  ;;  %v7503_v63 = vld [vmem:[#allocation98_spill] sm:$0xff]  ;;  %v7504_v19 = vld [vmem:[#allocation99_spill] sm:$0xff]  ;;  %v7505_v53 = vld [vmem:[#allocation100_spill] sm:$0xff] }
 0x2c5   :  { %5263 = vtanh.f32 %v6180_v57 }
 0x2c6   :  { %5265 = vrcp.f32 %v977_v52  ;;  %v7506_v52 = vld [vmem:[#allocation101_spill] sm:$0xff] }
 0x2c7   :  { %5267 = vtanh.f32 %v6182_v1 }
 0x2c8   :  { %5269 = vrcp.f32 %v978_v51  ;;  %v7507_v51 = vld [vmem:[#allocation102_spill] sm:$0xff] }
 0x2cf   :  { %v5264_v44 = vpop.eup %5263 }
 0x2d0   :  { %v5266_v33 = vpop.eup %5265 }
 0x2d1   :  { %v5268_v20 = vpop.eup %5267  ;;  %v6186_v12 = vmul.f32 %v5266_v33, %v5264_v44  ;;  %v7508_v44 = vld [vmem:[#allocation103_spill] sm:$0xff]  ;;  %v7509_v33 = vld [vmem:[#allocation104_spill] sm:$0xff] }
 0x2d2   :  { %v5270_v25 = vpop.eup %5269 }
 0x2d3   :  { %v992_v34 = vmul.f32 %v5270_v25, %v5268_v20  ;;  %v7510_v20 = vld [vmem:[#allocation105_spill] sm:$0xff]  ;;  %v7511_v25 = vld [vmem:[#allocation106_spill] sm:$0xff] }
 0x2d5   :  { %1066 = vmatprep.mubr.f32.mxu0 %v992_v34  ;;  %1137 = vmatprep.mubr.f32.mxu1 %v992_v34 }
 0x2d6   :  { %1067 = vmatmul.mubr.f32.vlgmr.msra.gmra.mrb[8].mxu0 %v6186_v12  ;;  %1138 = vmatmul.mubr.f32.vlgmr.msra.gmra.mrb[8].mxu1 %v6186_v12 }
 0x2d7   :  { %3796 = vmatpush1.bf16.msra.mxu0 %v7404_v60  ;;  %3860 = vmatpush1.bf16.msra.mxu1 %v7405_v55 }
 0x2d8   :  { %1208 = vmatprep.mubr.f32.mxu0 %v992_v34  ;;  %1279 = vmatprep.mubr.f32.mxu1 %v992_v34  ;;  %v7512_v34 = vld [vmem:[#allocation107_spill] sm:$0xff] }
 0x2d9   :  { %3798 = vmatprep.subr.bf16.mxu0 %v7406_v10  ;;  %3862 = vmatprep.subr.bf16.mxu1 %v7407_v54 }
 0x2db   :  { %3800 = vmatpush1.bf16.msra.mxu0 %v7408_v46  ;;  %3864 = vmatpush1.bf16.msra.mxu1 %v7409_v62 }
 0x2dc   :  { %3802 = vmatprep.subr.bf16.mxu0 %v7410_v50  ;;  %3866 = vmatprep.subr.bf16.mxu1 %v7411_v58 }
 0x2df   :  { %3804 = vmatpush1.bf16.msra.mxu0 %v7412_v48  ;;  %3868 = vmatpush1.bf16.msra.mxu1 %v7491_v36 }
 0x2e0   :  { %3806 = vmatprep.subr.bf16.mxu0 %v7492_v2  ;;  %3870 = vmatprep.subr.bf16.mxu1 %v7493_v39 }
 0x2e3   :  { %3808 = vmatpush1.bf16.msra.mxu0 %v7494_v35  ;;  %3872 = vmatpush1.bf16.msra.mxu1 %v7495_v40 }
 0x2e4   :  { %3810 = vmatprep.subr.bf16.mxu0 %v7496_v7  ;;  %3874 = vmatprep.subr.bf16.mxu1 %v7497_v31 }
 0x2e7   :  { %3812 = vmatpush1.bf16.msra.mxu0 %v7498_v37  ;;  %3876 = vmatpush1.bf16.msra.mxu1 %v7499_v43 }
 0x2e8   :  { %3814 = vmatprep.subr.bf16.mxu0 %v7500_v27  ;;  %3878 = vmatprep.subr.bf16.mxu1 %v7501_v56 }
 0x2eb   :  { %3816 = vmatpush1.bf16.msra.mxu0 %v7502_v16  ;;  %3880 = vmatpush1.bf16.msra.mxu1 %v7503_v63  ;;  %v7513_v16 = vld [vmem:[#allocation108_spill] sm:$0xff]  ;;  %v7514_v63 = vld [vmem:[#allocation109_spill] sm:$0xff] }
 0x2ec   :  { %3818 = vmatprep.subr.bf16.mxu0 %v7504_v19  ;;  %3882 = vmatprep.subr.bf16.mxu1 %v7505_v53  ;;  %v7515_v19 = vld [vmem:[#allocation110_spill] sm:$0xff]  ;;  %v7516_v53 = vld [vmem:[#allocation111_spill] sm:$0xff] }
 0x2ef   :  { %3820 = vmatpush1.bf16.msra.mxu0 %v7506_v52  ;;  %3884 = vmatpush1.bf16.msra.mxu1 %v7507_v51  ;;  %v7517_v52 = vld [vmem:[#allocation112_spill] sm:$0xff]  ;;  %v7518_v51 = vld [vmem:[#allocation113_spill] sm:$0xff] }
 0x2f0   :  { %3822 = vmatprep.subr.bf16.mxu0 %v7508_v44  ;;  %3886 = vmatprep.subr.bf16.mxu1 %v7509_v33  ;;  %v7519_v44 = vld [vmem:[#allocation114_spill] sm:$0xff]  ;;  %v7520_v33 = vld [vmem:[#allocation115_spill] sm:$0xff] }
 0x2f3   :  { %3824 = vmatpush1.bf16.msra.mxu0 %v7510_v20  ;;  %3888 = vmatpush1.bf16.msra.mxu1 %v7511_v25  ;;  %v7521_v25 = vld [vmem:[#allocation117_spill] sm:$0xff] }
 0x2f4   :  { %3826 = vmatprep.subr.bf16.mxu0 %v7512_v34  ;;  %3890 = vmatprep.subr.bf16.mxu1 %v7513_v16 }
 0x2f7   :  { %3828 = vmatpush1.bf16.msra.mxu0 %v7514_v63  ;;  %3892 = vmatpush1.bf16.msra.mxu1 %v7515_v19 }
 0x2f8   :  { %3830 = vmatprep.subr.bf16.mxu0 %v7516_v53  ;;  %3894 = vmatprep.subr.bf16.mxu1 %v7517_v52 }
 0x2fb   :  { %3832 = vmatpush1.bf16.msra.mxu0 %v7518_v51  ;;  %3896 = vmatpush1.bf16.msra.mxu1 %v7519_v44 }
 0x2fc   :  { %3834 = vmatprep.subr.bf16.mxu0 %v7520_v33  ;;  %3898 = vmatprep.subr.bf16.mxu1 %v7443_v29 }
 0x2ff   :  { %3836 = vmatpush1.bf16.msra.mxu0 %v7521_v25  ;;  %3900 = vmatpush1.bf16.msra.mxu1 %v7445_v28 }
 0x300   :  { %3838 = vmatprep.subr.bf16.mxu0 %v7446_v3  ;;  %3902 = vmatprep.subr.bf16.mxu1 %v7447_v41 }
 0x303   :  { %3840 = vmatpush1.bf16.msra.mxu0 %v7448_v38  ;;  %3904 = vmatpush1.bf16.msra.mxu1 %v7449_v47 }
 0x304   :  { %3842 = vmatprep.subr.bf16.mxu0 %v7450_v23  ;;  %3906 = vmatprep.subr.bf16.mxu1 %v7451_v14 }
 0x307   :  { %3844 = vmatpush1.bf16.msra.mxu0 %v7452_v11  ;;  %3908 = vmatpush1.bf16.msra.mxu1 %v7453_v32 }
 0x308   :  { %3846 = vmatprep.subr.bf16.mxu0 %v5931_v21  ;;  %3910 = vmatprep.subr.bf16.mxu1 %v7454_v30 }
 0x30b   :  { %3848 = vmatpush1.bf16.msra.mxu0 %v5937_v59  ;;  %3912 = vmatpush1.bf16.msra.mxu1 %v5941_v61 }
 0x30c   :  { %3850 = vmatprep.subr.bf16.mxu0 %v5943_v6  ;;  %3914 = vmatprep.subr.bf16.mxu1 %v5946_v0 }
 0x30f   :  { %3852 = vmatpush1.bf16.msra.mxu0 %v5949_v15  ;;  %3916 = vmatpush1.bf16.msra.mxu1 %v5953_v42  ;;  %v995_v42 = vld [vmem:[#allocation2 + $0x88] sm:$0xff]  ;;  %v997_v15 = vld [vmem:[#allocation2 + $0x98] sm:$0xff] }
 0x310   :  { %3854 = vmatprep.subr.bf16.mxu0 %v5955_v49  ;;  %3918 = vmatprep.subr.bf16.mxu1 %v5958_v5  ;;  %v994_v49 = vld [vmem:[#allocation2 + $0x80] sm:$0xff] }
 0x313   :  { %3856 = vmatpush1.bf16.msra.mxu0 %v5961_v24  ;;  %3920 = vmatpush1.bf16.msra.mxu1 %v5965_v45  ;;  %v7522_v45 = vld [vmem:[#allocation19_spill] sm:$0xff]  ;;  %v7525_v24 = vld [vmem:[#allocation22_spill] sm:$0xff] }
 0x314   :  { %3922 = vmatprep.subr.bf16.mxu0 %v5582_v4  ;;  %3986 = vmatprep.subr.bf16.mxu1 %v5584_v8  ;;  %v7523_v4 = vld [vmem:[#allocation20_spill] sm:$0xff]  ;;  %v7524_v8 = vld [vmem:[#allocation21_spill] sm:$0xff] }
 0x316   :  { %1209 = vmatmul.mubr.f32.vlgmr.msra.gmra.mrb[10].mxu0 %v6186_v12  ;;  %1280 = vmatmul.mubr.f32.vlgmr.msra.gmra.mrb[10].mxu1 %v6186_v12  ;;  %v7526_v12 = vld [vmem:[#allocation23_spill] sm:$0xff] }
 0x317   :  { %3924 = vmatpush1.bf16.msra.mxu0 %v5586_v9  ;;  %3988 = vmatpush1.bf16.msra.mxu1 %v5589_v13  ;;  %v7527_v9 = vld [vmem:[#allocation24_spill] sm:$0xff]  ;;  %v7528_v13 = vld [vmem:[#allocation25_spill] sm:$0xff] }
 0x318   :  { %3926 = vmatprep.subr.bf16.mxu0 %v5593_v17  ;;  %3990 = vmatprep.subr.bf16.mxu1 %v5595_v18  ;;  %v7529_v17 = vld [vmem:[#allocation26_spill] sm:$0xff]  ;;  %v7530_v18 = vld [vmem:[#allocation27_spill] sm:$0xff] }
 0x31b   :  { %3928 = vmatpush1.bf16.msra.mxu0 %v5598_v22  ;;  %3992 = vmatpush1.bf16.msra.mxu1 %v5602_v26  ;;  %v7531_v22 = vld [vmem:[#allocation28_spill] sm:$0xff]  ;;  %v7532_v26 = vld [vmem:[#allocation29_spill] sm:$0xff] }
 0x31c   :  { %3930 = vmatprep.subr.bf16.mxu0 %v7522_v45  ;;  %3994 = vmatprep.subr.bf16.mxu1 %v7523_v4  ;;  %v7533_v45 = vld [vmem:[#allocation30_spill] sm:$0xff]  ;;  %v7534_v4 = vld [vmem:[#allocation31_spill] sm:$0xff] }
 0x31f   :  { %3932 = vmatpush1.bf16.msra.mxu0 %v7524_v8  ;;  %3996 = vmatpush1.bf16.msra.mxu1 %v7525_v24  ;;  %v7535_v8 = vld [vmem:[#allocation32_spill] sm:$0xff]  ;;  %v7536_v24 = vld [vmem:[#allocation33_spill] sm:$0xff] }
 0x320   :  { %3934 = vmatprep.subr.bf16.mxu0 %v7526_v12  ;;  %3998 = vmatprep.subr.bf16.mxu1 %v7527_v9  ;;  %v7537_v12 = vld [vmem:[#allocation34_spill] sm:$0xff]  ;;  %v7538_v9 = vld [vmem:[#allocation35_spill] sm:$0xff] }
 0x323   :  { %3936 = vmatpush1.bf16.msra.mxu0 %v7528_v13  ;;  %4000 = vmatpush1.bf16.msra.mxu1 %v7529_v17  ;;  %v7539_v13 = vld [vmem:[#allocation36_spill] sm:$0xff]  ;;  %v7540_v17 = vld [vmem:[#allocation37_spill] sm:$0xff] }
 0x324   :  { %3938 = vmatprep.subr.bf16.mxu0 %v7530_v18  ;;  %4002 = vmatprep.subr.bf16.mxu1 %v7531_v22  ;;  %v7541_v18 = vld [vmem:[#allocation38_spill] sm:$0xff]  ;;  %v7542_v22 = vld [vmem:[#allocation39_spill] sm:$0xff] }
 0x327   :  { %3940 = vmatpush1.bf16.msra.mxu0 %v7532_v26  ;;  %4004 = vmatpush1.bf16.msra.mxu1 %v7533_v45  ;;  %v7543_v26 = vld [vmem:[#allocation40_spill] sm:$0xff]  ;;  %v7544_v45 = vld [vmem:[#allocation41_spill] sm:$0xff] }
 0x328   :  { %3942 = vmatprep.subr.bf16.mxu0 %v7534_v4  ;;  %4006 = vmatprep.subr.bf16.mxu1 %v7535_v8  ;;  %v7545_v4 = vld [vmem:[#allocation42_spill] sm:$0xff]  ;;  %v7546_v8 = vld [vmem:[#allocation43_spill] sm:$0xff] }
 0x32b   :  { %3944 = vmatpush1.bf16.msra.mxu0 %v7536_v24  ;;  %4008 = vmatpush1.bf16.msra.mxu1 %v7537_v12  ;;  %v7547_v24 = vld [vmem:[#allocation44_spill] sm:$0xff]  ;;  %v7548_v12 = vld [vmem:[#allocation45_spill] sm:$0xff] }
 0x32c   :  { %3946 = vmatprep.subr.bf16.mxu0 %v7538_v9  ;;  %4010 = vmatprep.subr.bf16.mxu1 %v7539_v13  ;;  %v7549_v9 = vld [vmem:[#allocation46_spill] sm:$0xff]  ;;  %v7550_v13 = vld [vmem:[#allocation47_spill] sm:$0xff] }
 0x32f   :  { %3948 = vmatpush1.bf16.msra.mxu0 %v7540_v17  ;;  %4012 = vmatpush1.bf16.msra.mxu1 %v7541_v18  ;;  %v7551_v17 = vld [vmem:[#allocation48_spill] sm:$0xff]  ;;  %v7552_v18 = vld [vmem:[#allocation49_spill] sm:$0xff] }
 0x330   :  { %3950 = vmatprep.subr.bf16.mxu0 %v7542_v22  ;;  %4014 = vmatprep.subr.bf16.mxu1 %v7543_v26  ;;  %v7553_v22 = vld [vmem:[#allocation50_spill] sm:$0xff]  ;;  %v7554_v26 = vld [vmem:[#allocation51_spill] sm:$0xff] }
 0x333   :  { %3952 = vmatpush1.bf16.msra.mxu0 %v7544_v45  ;;  %4016 = vmatpush1.bf16.msra.mxu1 %v7545_v4  ;;  %v7555_v45 = vld [vmem:[#allocation52_spill] sm:$0xff]  ;;  %v7556_v4 = vld [vmem:[#allocation53_spill] sm:$0xff] }
 0x334   :  { %3954 = vmatprep.subr.bf16.mxu0 %v7546_v8  ;;  %4018 = vmatprep.subr.bf16.mxu1 %v7547_v24  ;;  %v7557_v8 = vld [vmem:[#allocation54_spill] sm:$0xff]  ;;  %v7558_v24 = vld [vmem:[#allocation55_spill] sm:$0xff] }
 0x337   :  { %3956 = vmatpush1.bf16.msra.mxu0 %v7548_v12  ;;  %4020 = vmatpush1.bf16.msra.mxu1 %v7549_v9  ;;  %v7559_v12 = vld [vmem:[#allocation56_spill] sm:$0xff]  ;;  %v7560_v9 = vld [vmem:[#allocation57_spill] sm:$0xff] }
 0x338   :  { %3958 = vmatprep.subr.bf16.mxu0 %v7550_v13  ;;  %4022 = vmatprep.subr.bf16.mxu1 %v7551_v17  ;;  %v7561_v13 = vld [vmem:[#allocation58_spill] sm:$0xff]  ;;  %v7562_v17 = vld [vmem:[#allocation59_spill] sm:$0xff] }
 0x33b   :  { %3960 = vmatpush1.bf16.msra.mxu0 %v7552_v18  ;;  %4024 = vmatpush1.bf16.msra.mxu1 %v7553_v22  ;;  %v7563_v18 = vld [vmem:[#allocation60_spill] sm:$0xff]  ;;  %v7564_v22 = vld [vmem:[#allocation61_spill] sm:$0xff] }
 0x33c   :  { %3962 = vmatprep.subr.bf16.mxu0 %v7554_v26  ;;  %4026 = vmatprep.subr.bf16.mxu1 %v7555_v45  ;;  %v7565_v26 = vld [vmem:[#allocation62_spill] sm:$0xff]  ;;  %v7566_v45 = vld [vmem:[#allocation63_spill] sm:$0xff] }
 0x33f   :  { %3964 = vmatpush1.bf16.msra.mxu0 %v7556_v4  ;;  %4028 = vmatpush1.bf16.msra.mxu1 %v7557_v8  ;;  %v7567_v4 = vld [vmem:[#allocation64_spill] sm:$0xff]  ;;  %v7568_v8 = vld [vmem:[#allocation65_spill] sm:$0xff] }
 0x340   :  { %3966 = vmatprep.subr.bf16.mxu0 %v7558_v24  ;;  %4030 = vmatprep.subr.bf16.mxu1 %v7559_v12  ;;  %v7569_v24 = vld [vmem:[#allocation66_spill] sm:$0xff]  ;;  %v7570_v12 = vld [vmem:[#allocation67_spill] sm:$0xff] }
 0x343   :  { %3968 = vmatpush1.bf16.msra.mxu0 %v7560_v9  ;;  %4032 = vmatpush1.bf16.msra.mxu1 %v7561_v13  ;;  %v7571_v9 = vld [vmem:[#allocation68_spill] sm:$0xff]  ;;  %v7572_v13 = vld [vmem:[#allocation69_spill] sm:$0xff] }
 0x344   :  { %3970 = vmatprep.subr.bf16.mxu0 %v7562_v17  ;;  %4034 = vmatprep.subr.bf16.mxu1 %v7563_v18  ;;  %v7573_v17 = vld [vmem:[#allocation70_spill] sm:$0xff]  ;;  %v7574_v18 = vld [vmem:[#allocation71_spill] sm:$0xff] }
 0x347   :  { %3972 = vmatpush1.bf16.msra.mxu0 %v7564_v22  ;;  %4036 = vmatpush1.bf16.msra.mxu1 %v7565_v26  ;;  %v7575_v22 = vld [vmem:[#allocation72_spill] sm:$0xff]  ;;  %v7576_v26 = vld [vmem:[#allocation73_spill] sm:$0xff] }
 0x348   :  { %3974 = vmatprep.subr.bf16.mxu0 %v7566_v45  ;;  %4038 = vmatprep.subr.bf16.mxu1 %v7567_v4  ;;  %v7577_v45 = vld [vmem:[#allocation74_spill] sm:$0xff]  ;;  %v7578_v4 = vld [vmem:[#allocation75_spill] sm:$0xff] }
 0x34b   :  { %3976 = vmatpush1.bf16.msra.mxu0 %v7568_v8  ;;  %4040 = vmatpush1.bf16.msra.mxu1 %v7569_v24  ;;  %v7579_v8 = vld [vmem:[#allocation76_spill] sm:$0xff] }
 0x34c   :  { %3978 = vmatprep.subr.bf16.mxu0 %v7570_v12  ;;  %4042 = vmatprep.subr.bf16.mxu1 %v7571_v9 }
 0x34f   :  { %3980 = vmatpush1.bf16.msra.mxu0 %v7572_v13  ;;  %4044 = vmatpush1.bf16.msra.mxu1 %v7573_v17  ;;  %v996_v13 = vld [vmem:[#allocation2 + $0x90] sm:$0xff] }
 0x350   :  { %3982 = vmatprep.subr.bf16.mxu0 %v7574_v18  ;;  %4046 = vmatprep.subr.bf16.mxu1 %v7575_v22 }
 0x353   :  { %3984 = vmatpush1.bf16.msra.mxu0 %v7576_v26  ;;  %4048 = vmatpush1.bf16.msra.mxu1 %v7577_v45 }
 0x354   :  { %4050 = vmatprep.subr.bf16.mxu0 %v7578_v4  ;;  %4114 = vmatprep.subr.bf16.mxu1 %v7579_v8 }
 0x3a9   :  { %v1068_v24 = vpop.f32.mrb[8].mxu0  ;;  %v1139_v12 = vpop.f32.mrb[8].mxu1 }
 0x3aa   :  { %v1070_v5 = vpop.f32.mrb[9].mxu0  ;;  %v1141_v9 = vpop.f32.mrb[9].mxu1  ;;  %v1286_v17 = vadd.f32 %v1068_v24, %v994_v49  ;;  %v1288_v18 = vadd.f32 %v1139_v12, %v996_v13  ;;  %v998_v24 = vld [vmem:[#allocation2 + $0xa0] sm:$0xff]  ;;  %v1000_v13 = vld [vmem:[#allocation2 + $0xb0] sm:$0xff] }
 0x3ab   :  { %v1287_v0 = vadd.f32 %v1070_v5, %v995_v42  ;;  %v1289_v22 = vadd.f32 %v1141_v9, %v997_v15  ;;  %v999_v9 = vld [vmem:[#allocation2 + $0xa8] sm:$0xff] }
 0x3ac   :  { %v3117_v6 = vmul.f32 -1.442695, %v1286_v17  ;;  %v3119_v26 = vmul.f32 -1.442695, %v1288_v18  ;;  %v1001_v17 = vld [vmem:[#allocation2 + $0xb8] sm:$0xff] }
 0x3ad   :  { %v3118_v61 = vmul.f32 -1.442695, %v1287_v0  ;;  %v3120_v45 = vmul.f32 -1.442695, %v1289_v22 }
 0x3ae   :  { %5271 = vpow2.f32 %v3117_v6 }
 0x3af   :  { %5273 = vpow2.f32 %v3119_v26 }
 0x3b0   :  { %5275 = vpow2.f32 %v3118_v61 }
 0x3b1   :  { %5277 = vpow2.f32 %v3120_v45 }
 0x3b8   :  { %v5272_v8 = vpop.eup %5271 }
 0x3b9   :  { %v5274_v4 = vpop.eup %5273  ;;  %v1300_v21 = vadd.f32 1.0, %v5272_v8 }
 0x3ba   :  { %v5276_v59 = vpop.eup %5275  ;;  %v1312_v32 = vadd.f32 1.0, %v5274_v4 }
 0x3bb   :  { %v5278_v30 = vpop.eup %5277  ;;  %v1301_v11 = vadd.f32 1.0, %v5276_v59  ;;  %5279 = vrcp.f32 %v1300_v21 }
 0x3bc   :  { %v1313_v49 = vadd.f32 1.0, %v5278_v30  ;;  %5281 = vrcp.f32 %v1312_v32 }
 0x3bd   :  { %5283 = vrcp.f32 %v1301_v11 }
 0x3be   :  { %5285 = vrcp.f32 %v1313_v49 }
 0x3c5   :  { %v5280_v59 = vpop.eup %5279 }
 0x3c6   :  { %v5282_v21 = vpop.eup %5281 }
 0x3c7   :  { %v5284_v5 = vpop.eup %5283  ;;  %v1332_v11 = vmul.f32 %v5282_v21, %v6180_v57  ;;  %v7584_v21 = vld [vmem:[#allocation101_spill] sm:$0xff] }
 0x3c8   :  { %v5286_v45 = vpop.eup %5285 }
 0x3c9   :  { %v1333_v49 = vmul.f32 %v5286_v45, %v6182_v1  ;;  %v7586_v45 = vld [vmem:[#allocation103_spill] sm:$0xff] }
 0x3e9   :  { %v1210_v18 = vpop.f32.mrb[10].mxu0  ;;  %v1281_v22 = vpop.f32.mrb[10].mxu1 }
 0x3ea   :  { %v1290_v26 = vadd.f32 %v1210_v18, %v998_v24  ;;  %v1292_v15 = vadd.f32 %v1281_v22, %v1000_v13  ;;  %v1212_v61 = vpop.f32.mrb[11].mxu0  ;;  %v1283_v6 = vpop.f32.mrb[11].mxu1 }
 0x3eb   :  { %v1291_v0 = vadd.f32 %v1212_v61, %v999_v9  ;;  %v1293_v42 = vadd.f32 %v1283_v6, %v1001_v17 }
 0x3ec   :  { %5287 = vtanh.f32 %v1290_v26  ;;  %v3121_v4 = vmul.f32 -1.442695, %v1292_v15 }
 0x3ed   :  { %5289 = vtanh.f32 %v1291_v0  ;;  %v3122_v8 = vmul.f32 -1.442695, %v1293_v42  ;;  %v7580_v42 = vld [vmem:[#allocation97_spill] sm:$0xff] }
 0x3ee   :  { %5291 = vpow2.f32 %v3121_v4  ;;  %v7581_v4 = vld [vmem:[#allocation98_spill] sm:$0xff] }
 0x3ef   :  { %5293 = vpow2.f32 %v3122_v8  ;;  %v7582_v8 = vld [vmem:[#allocation99_spill] sm:$0xff] }
 0x3f6   :  { %v5288_v32 = vpop.eup %5287 }
 0x3f7   :  { %v5290_v30 = vpop.eup %5289  ;;  %v1334_v12 = vmul.f32 %v5288_v32, %v5280_v59  ;;  %v7583_v59 = vld [vmem:[#allocation100_spill] sm:$0xff] }
 0x3f8   :  { %v5292_v24 = vpop.eup %5291  ;;  %v1335_v13 = vmul.f32 %v5290_v30, %v5284_v5  ;;  %v7585_v5 = vld [vmem:[#allocation102_spill] sm:$0xff]  ;;  %v7587_v32 = vld [vmem:[#allocation104_spill] sm:$0xff] }
 0x3f9   :  { %v5294_v9 = vpop.eup %5293  ;;  %v6322_v17 = vadd.f32 %v1334_v12, %v1332_v11  ;;  %v1326_v18 = vadd.f32 1.0, %v5292_v24  ;;  %v7588_v30 = vld [vmem:[#allocation106_spill] sm:$0xff]  ;;  %v7589_v11 = vld [vmem:[#allocation125_spill] sm:$0xff]  ;;  %v7591_v24 = vld [vmem:[#allocation127_spill] sm:$0xff] }
 0x3fa   :  { %v6324_v22 = vadd.f32 %v1335_v13, %v1333_v49  ;;  %v1327_v26 = vadd.f32 1.0, %v5294_v9  ;;  %v7590_v12 = vld [vmem:[#allocation126_spill] sm:$0xff]  ;;  %v7592_v49 = vld [vmem:[#allocation128_spill] sm:$0xff]  ;;  %v7593_v13 = vld [vmem:[#allocation129_spill] sm:$0xff] }
 0x3fb   :  { %5295 = vtanh.f32 %v6322_v17  ;;  %v7594_v9 = vld [vmem:[#allocation130_spill] sm:$0xff] }
 0x3fc   :  { %5297 = vrcp.f32 %v1326_v18  ;;  %v7595_v18 = vld [vmem:[#allocation131_spill] sm:$0xff] }
 0x3fd   :  { %5299 = vtanh.f32 %v6324_v22 }
 0x3fe   :  { %5301 = vrcp.f32 %v1327_v26  ;;  %v7596_v26 = vld [vmem:[#allocation132_spill] sm:$0xff] }
 0x405   :  { %v5296_v15 = vpop.eup %5295 }
 0x406   :  { %v5298_v57 = vpop.eup %5297 }
 0x407   :  { %v5300_v61 = vpop.eup %5299  ;;  %v6328_v1 = vmul.f32 %v5298_v57, %v5296_v15  ;;  %v7597_v15 = vld [vmem:[#allocation133_spill] sm:$0xff]  ;;  %v7598_v57 = vld [vmem:[#allocation134_spill] sm:$0xff] }
 0x408   :  { %v5302_v6 = vpop.eup %5301 }
 0x409   :  { %v1341_v0 = vmul.f32 %v5302_v6, %v5300_v61  ;;  %v7599_v61 = vld [vmem:[#allocation135_spill] sm:$0xff]  ;;  %v7600_v6 = vld [vmem:[#allocation136_spill] sm:$0xff] }
 0x40b   :  { %1415 = vmatprep.mubr.f32.mxu0 %v1341_v0  ;;  %1486 = vmatprep.mubr.f32.mxu1 %v1341_v0 }
 0x40c   :  { %1416 = vmatmul.mubr.f32.vlgmr.msra.gmra.mrb[12].mxu0 %v6328_v1  ;;  %1487 = vmatmul.mubr.f32.vlgmr.msra.gmra.mrb[12].mxu1 %v6328_v1 }
 0x40d   :  { %4052 = vmatpush1.bf16.msra.mxu0 %v7404_v60  ;;  %4116 = vmatpush1.bf16.msra.mxu1 %v7405_v55 }
 0x40e   :  { %1557 = vmatprep.mubr.f32.mxu0 %v1341_v0  ;;  %1628 = vmatprep.mubr.f32.mxu1 %v1341_v0  ;;  %v7601_v0 = vld [vmem:[#allocation137_spill] sm:$0xff] }
 0x40f   :  { %4054 = vmatprep.subr.bf16.mxu0 %v7406_v10  ;;  %4118 = vmatprep.subr.bf16.mxu1 %v7407_v54 }
 0x411   :  { %4056 = vmatpush1.bf16.msra.mxu0 %v7408_v46  ;;  %4120 = vmatpush1.bf16.msra.mxu1 %v7409_v62 }
 0x412   :  { %4058 = vmatprep.subr.bf16.mxu0 %v7410_v50  ;;  %4122 = vmatprep.subr.bf16.mxu1 %v7411_v58 }
 0x415   :  { %4060 = vmatpush1.bf16.msra.mxu0 %v7412_v48  ;;  %4124 = vmatpush1.bf16.msra.mxu1 %v7491_v36 }
 0x416   :  { %4062 = vmatprep.subr.bf16.mxu0 %v7492_v2  ;;  %4126 = vmatprep.subr.bf16.mxu1 %v7493_v39 }
 0x419   :  { %4064 = vmatpush1.bf16.msra.mxu0 %v7494_v35  ;;  %4128 = vmatpush1.bf16.msra.mxu1 %v7495_v40 }
 0x41a   :  { %4066 = vmatprep.subr.bf16.mxu0 %v7496_v7  ;;  %4130 = vmatprep.subr.bf16.mxu1 %v7497_v31 }
 0x41d   :  { %4068 = vmatpush1.bf16.msra.mxu0 %v7498_v37  ;;  %4132 = vmatpush1.bf16.msra.mxu1 %v7499_v43 }
 0x41e   :  { %4070 = vmatprep.subr.bf16.mxu0 %v7500_v27  ;;  %4134 = vmatprep.subr.bf16.mxu1 %v7501_v56 }
 0x421   :  { %4072 = vmatpush1.bf16.msra.mxu0 %v7580_v42  ;;  %4136 = vmatpush1.bf16.msra.mxu1 %v7581_v4 }
 0x422   :  { %4074 = vmatprep.subr.bf16.mxu0 %v7582_v8  ;;  %4138 = vmatprep.subr.bf16.mxu1 %v7583_v59 }
 0x425   :  { %4076 = vmatpush1.bf16.msra.mxu0 %v7584_v21  ;;  %4140 = vmatpush1.bf16.msra.mxu1 %v7585_v5 }
 0x426   :  { %4078 = vmatprep.subr.bf16.mxu0 %v7586_v45  ;;  %4142 = vmatprep.subr.bf16.mxu1 %v7587_v32 }
 0x429   :  { %4080 = vmatpush1.bf16.msra.mxu0 %v7510_v20  ;;  %4144 = vmatpush1.bf16.msra.mxu1 %v7588_v30 }
 0x42a   :  { %4082 = vmatprep.subr.bf16.mxu0 %v7512_v34  ;;  %4146 = vmatprep.subr.bf16.mxu1 %v7513_v16 }
 0x42d   :  { %4084 = vmatpush1.bf16.msra.mxu0 %v7514_v63  ;;  %4148 = vmatpush1.bf16.msra.mxu1 %v7515_v19 }
 0x42e   :  { %4086 = vmatprep.subr.bf16.mxu0 %v7516_v53  ;;  %4150 = vmatprep.subr.bf16.mxu1 %v7517_v52 }
 0x431   :  { %4088 = vmatpush1.bf16.msra.mxu0 %v7518_v51  ;;  %4152 = vmatpush1.bf16.msra.mxu1 %v7519_v44 }
 0x432   :  { %4090 = vmatprep.subr.bf16.mxu0 %v7520_v33  ;;  %4154 = vmatprep.subr.bf16.mxu1 %v7443_v29 }
 0x435   :  { %4092 = vmatpush1.bf16.msra.mxu0 %v7521_v25  ;;  %4156 = vmatpush1.bf16.msra.mxu1 %v7445_v28 }
 0x436   :  { %4094 = vmatprep.subr.bf16.mxu0 %v7446_v3  ;;  %4158 = vmatprep.subr.bf16.mxu1 %v7447_v41 }
 0x439   :  { %4096 = vmatpush1.bf16.msra.mxu0 %v7448_v38  ;;  %4160 = vmatpush1.bf16.msra.mxu1 %v7449_v47 }
 0x43a   :  { %4098 = vmatprep.subr.bf16.mxu0 %v7450_v23  ;;  %4162 = vmatprep.subr.bf16.mxu1 %v7451_v14  ;;  %v1346_v14 = vld [vmem:[#allocation2 + $0xd8] sm:$0xff] }
 0x43d   :  { %4100 = vmatpush1.bf16.msra.mxu0 %v7589_v11  ;;  %4164 = vmatpush1.bf16.msra.mxu1 %v7590_v12  ;;  %v1343_v12 = vld [vmem:[#allocation2 + $0xc0] sm:$0xff]  ;;  %v1344_v11 = vld [vmem:[#allocation2 + $0xc8] sm:$0xff] }
 0x43e   :  { %4102 = vmatprep.subr.bf16.mxu0 %v7591_v24  ;;  %4166 = vmatprep.subr.bf16.mxu1 %v7592_v49  ;;  %v7602_v24 = vld [vmem:[#allocation138_spill] sm:$0xff]  ;;  %v7603_v49 = vld [vmem:[#allocation11_spill] sm:$0xff] }
 0x441   :  { %4104 = vmatpush1.bf16.msra.mxu0 %v7593_v13  ;;  %4168 = vmatpush1.bf16.msra.mxu1 %v7594_v9  ;;  %v7604_v13 = vld [vmem:[#allocation12_spill] sm:$0xff] }
 0x442   :  { %4106 = vmatprep.subr.bf16.mxu0 %v7595_v18  ;;  %4170 = vmatprep.subr.bf16.mxu1 %v7596_v26  ;;  %v7605_v26 = vld [vmem:[#allocation13_spill] sm:$0xff]  ;;  %v7614_v18 = vld [vmem:[#allocation22_spill] sm:$0xff] }
 0x445   :  { %4108 = vmatpush1.bf16.msra.mxu0 %v7597_v15  ;;  %4172 = vmatpush1.bf16.msra.mxu1 %v7598_v57  ;;  %v7606_v15 = vld [vmem:[#allocation14_spill] sm:$0xff]  ;;  %v7607_v57 = vld [vmem:[#allocation15_spill] sm:$0xff] }
 0x446   :  { %4110 = vmatprep.subr.bf16.mxu0 %v7599_v61  ;;  %4174 = vmatprep.subr.bf16.mxu1 %v7600_v6  ;;  %v7608_v61 = vld [vmem:[#allocation16_spill] sm:$0xff]  ;;  %v7609_v6 = vld [vmem:[#allocation17_spill] sm:$0xff] }
 0x449   :  { %4112 = vmatpush1.bf16.msra.mxu0 %v7601_v0  ;;  %4176 = vmatpush1.bf16.msra.mxu1 %v7602_v24  ;;  %v7610_v0 = vld [vmem:[#allocation18_spill] sm:$0xff]  ;;  %v7611_v24 = vld [vmem:[#allocation19_spill] sm:$0xff] }
 0x44a   :  { %4178 = vmatprep.subr.bf16.mxu0 %v7603_v49  ;;  %4242 = vmatprep.subr.bf16.mxu1 %v7604_v13  ;;  %v7612_v49 = vld [vmem:[#allocation20_spill] sm:$0xff]  ;;  %v7613_v13 = vld [vmem:[#allocation21_spill] sm:$0xff] }
 0x44c   :  { %1558 = vmatmul.mubr.f32.vlgmr.msra.gmra.mrb[14].mxu0 %v6328_v1  ;;  %1629 = vmatmul.mubr.f32.vlgmr.msra.gmra.mrb[14].mxu1 %v6328_v1  ;;  %v7615_v1 = vld [vmem:[#allocation23_spill] sm:$0xff] }
 0x44d   :  { %4180 = vmatpush1.bf16.msra.mxu0 %v7605_v26  ;;  %4244 = vmatpush1.bf16.msra.mxu1 %v7606_v15  ;;  %v7616_v26 = vld [vmem:[#allocation24_spill] sm:$0xff]  ;;  %v7617_v15 = vld [vmem:[#allocation25_spill] sm:$0xff] }
 0x44e   :  { %4182 = vmatprep.subr.bf16.mxu0 %v7607_v57  ;;  %4246 = vmatprep.subr.bf16.mxu1 %v7608_v61  ;;  %v7618_v57 = vld [vmem:[#allocation26_spill] sm:$0xff]  ;;  %v7619_v61 = vld [vmem:[#allocation27_spill] sm:$0xff] }
 0x451   :  { %4184 = vmatpush1.bf16.msra.mxu0 %v7609_v6  ;;  %4248 = vmatpush1.bf16.msra.mxu1 %v7610_v0  ;;  %v7620_v6 = vld [vmem:[#allocation28_spill] sm:$0xff]  ;;  %v7621_v0 = vld [vmem:[#allocation29_spill] sm:$0xff] }
 0x452   :  { %4186 = vmatprep.subr.bf16.mxu0 %v7611_v24  ;;  %4250 = vmatprep.subr.bf16.mxu1 %v7612_v49  ;;  %v7622_v24 = vld [vmem:[#allocation30_spill] sm:$0xff]  ;;  %v7623_v49 = vld [vmem:[#allocation31_spill] sm:$0xff] }
 0x455   :  { %4188 = vmatpush1.bf16.msra.mxu0 %v7613_v13  ;;  %4252 = vmatpush1.bf16.msra.mxu1 %v7614_v18  ;;  %v7624_v13 = vld [vmem:[#allocation32_spill] sm:$0xff]  ;;  %v7625_v18 = vld [vmem:[#allocation33_spill] sm:$0xff] }
 0x456   :  { %4190 = vmatprep.subr.bf16.mxu0 %v7615_v1  ;;  %4254 = vmatprep.subr.bf16.mxu1 %v7616_v26  ;;  %v7626_v1 = vld [vmem:[#allocation34_spill] sm:$0xff]  ;;  %v7627_v26 = vld [vmem:[#allocation35_spill] sm:$0xff] }
 0x459   :  { %4192 = vmatpush1.bf16.msra.mxu0 %v7617_v15  ;;  %4256 = vmatpush1.bf16.msra.mxu1 %v7618_v57  ;;  %v7628_v15 = vld [vmem:[#allocation36_spill] sm:$0xff]  ;;  %v7629_v57 = vld [vmem:[#allocation37_spill] sm:$0xff] }
 0x45a   :  { %4194 = vmatprep.subr.bf16.mxu0 %v7619_v61  ;;  %4258 = vmatprep.subr.bf16.mxu1 %v7620_v6  ;;  %v7630_v61 = vld [vmem:[#allocation38_spill] sm:$0xff]  ;;  %v7631_v6 = vld [vmem:[#allocation39_spill] sm:$0xff] }
 0x45d   :  { %4196 = vmatpush1.bf16.msra.mxu0 %v7621_v0  ;;  %4260 = vmatpush1.bf16.msra.mxu1 %v7622_v24  ;;  %v7632_v0 = vld [vmem:[#allocation40_spill] sm:$0xff]  ;;  %v7633_v24 = vld [vmem:[#allocation41_spill] sm:$0xff] }
 0x45e   :  { %4198 = vmatprep.subr.bf16.mxu0 %v7623_v49  ;;  %4262 = vmatprep.subr.bf16.mxu1 %v7624_v13  ;;  %v7634_v49 = vld [vmem:[#allocation42_spill] sm:$0xff]  ;;  %v7635_v13 = vld [vmem:[#allocation43_spill] sm:$0xff] }
 0x461   :  { %4200 = vmatpush1.bf16.msra.mxu0 %v7625_v18  ;;  %4264 = vmatpush1.bf16.msra.mxu1 %v7626_v1  ;;  %v7636_v18 = vld [vmem:[#allocation44_spill] sm:$0xff]  ;;  %v7637_v1 = vld [vmem:[#allocation45_spill] sm:$0xff] }
 0x462   :  { %4202 = vmatprep.subr.bf16.mxu0 %v7627_v26  ;;  %4266 = vmatprep.subr.bf16.mxu1 %v7628_v15  ;;  %v7638_v26 = vld [vmem:[#allocation46_spill] sm:$0xff]  ;;  %v7639_v15 = vld [vmem:[#allocation47_spill] sm:$0xff] }
 0x465   :  { %4204 = vmatpush1.bf16.msra.mxu0 %v7629_v57  ;;  %4268 = vmatpush1.bf16.msra.mxu1 %v7630_v61  ;;  %v7640_v57 = vld [vmem:[#allocation48_spill] sm:$0xff]  ;;  %v7641_v61 = vld [vmem:[#allocation49_spill] sm:$0xff] }
 0x466   :  { %4206 = vmatprep.subr.bf16.mxu0 %v7631_v6  ;;  %4270 = vmatprep.subr.bf16.mxu1 %v7632_v0  ;;  %v7642_v6 = vld [vmem:[#allocation50_spill] sm:$0xff]  ;;  %v7643_v0 = vld [vmem:[#allocation51_spill] sm:$0xff] }
 0x469   :  { %4208 = vmatpush1.bf16.msra.mxu0 %v7633_v24  ;;  %4272 = vmatpush1.bf16.msra.mxu1 %v7634_v49  ;;  %v7644_v24 = vld [vmem:[#allocation52_spill] sm:$0xff]  ;;  %v7645_v49 = vld [vmem:[#allocation53_spill] sm:$0xff] }
 0x46a   :  { %4210 = vmatprep.subr.bf16.mxu0 %v7635_v13  ;;  %4274 = vmatprep.subr.bf16.mxu1 %v7636_v18  ;;  %v7646_v13 = vld [vmem:[#allocation54_spill] sm:$0xff]  ;;  %v7647_v18 = vld [vmem:[#allocation55_spill] sm:$0xff] }
 0x46d   :  { %4212 = vmatpush1.bf16.msra.mxu0 %v7637_v1  ;;  %4276 = vmatpush1.bf16.msra.mxu1 %v7638_v26  ;;  %v7648_v1 = vld [vmem:[#allocation56_spill] sm:$0xff]  ;;  %v7649_v26 = vld [vmem:[#allocation57_spill] sm:$0xff] }
 0x46e   :  { %4214 = vmatprep.subr.bf16.mxu0 %v7639_v15  ;;  %4278 = vmatprep.subr.bf16.mxu1 %v7640_v57  ;;  %v7650_v15 = vld [vmem:[#allocation58_spill] sm:$0xff]  ;;  %v7651_v57 = vld [vmem:[#allocation59_spill] sm:$0xff] }
 0x471   :  { %4216 = vmatpush1.bf16.msra.mxu0 %v7641_v61  ;;  %4280 = vmatpush1.bf16.msra.mxu1 %v7642_v6  ;;  %v7652_v61 = vld [vmem:[#allocation60_spill] sm:$0xff]  ;;  %v7653_v6 = vld [vmem:[#allocation61_spill] sm:$0xff] }
 0x472   :  { %4218 = vmatprep.subr.bf16.mxu0 %v7643_v0  ;;  %4282 = vmatprep.subr.bf16.mxu1 %v7644_v24  ;;  %v7654_v0 = vld [vmem:[#allocation62_spill] sm:$0xff]  ;;  %v7655_v24 = vld [vmem:[#allocation63_spill] sm:$0xff] }
 0x475   :  { %4220 = vmatpush1.bf16.msra.mxu0 %v7645_v49  ;;  %4284 = vmatpush1.bf16.msra.mxu1 %v7646_v13  ;;  %v7656_v49 = vld [vmem:[#allocation64_spill] sm:$0xff]  ;;  %v7657_v13 = vld [vmem:[#allocation65_spill] sm:$0xff] }
 0x476   :  { %4222 = vmatprep.subr.bf16.mxu0 %v7647_v18  ;;  %4286 = vmatprep.subr.bf16.mxu1 %v7648_v1  ;;  %v7658_v18 = vld [vmem:[#allocation66_spill] sm:$0xff]  ;;  %v7659_v1 = vld [vmem:[#allocation67_spill] sm:$0xff] }
 0x479   :  { %4224 = vmatpush1.bf16.msra.mxu0 %v7649_v26  ;;  %4288 = vmatpush1.bf16.msra.mxu1 %v7650_v15  ;;  %v7660_v26 = vld [vmem:[#allocation68_spill] sm:$0xff]  ;;  %v7661_v15 = vld [vmem:[#allocation69_spill] sm:$0xff] }
 0x47a   :  { %4226 = vmatprep.subr.bf16.mxu0 %v7651_v57  ;;  %4290 = vmatprep.subr.bf16.mxu1 %v7652_v61  ;;  %v7662_v57 = vld [vmem:[#allocation70_spill] sm:$0xff]  ;;  %v7663_v61 = vld [vmem:[#allocation71_spill] sm:$0xff] }
 0x47d   :  { %4228 = vmatpush1.bf16.msra.mxu0 %v7653_v6  ;;  %4292 = vmatpush1.bf16.msra.mxu1 %v7654_v0  ;;  %v7664_v6 = vld [vmem:[#allocation72_spill] sm:$0xff]  ;;  %v7665_v0 = vld [vmem:[#allocation73_spill] sm:$0xff] }
 0x47e   :  { %4230 = vmatprep.subr.bf16.mxu0 %v7655_v24  ;;  %4294 = vmatprep.subr.bf16.mxu1 %v7656_v49  ;;  %v7666_v24 = vld [vmem:[#allocation74_spill] sm:$0xff]  ;;  %v7667_v49 = vld [vmem:[#allocation75_spill] sm:$0xff] }
 0x481   :  { %4232 = vmatpush1.bf16.msra.mxu0 %v7657_v13  ;;  %4296 = vmatpush1.bf16.msra.mxu1 %v7658_v18  ;;  %v7668_v13 = vld [vmem:[#allocation76_spill] sm:$0xff] }
 0x482   :  { %4234 = vmatprep.subr.bf16.mxu0 %v7659_v1  ;;  %4298 = vmatprep.subr.bf16.mxu1 %v7660_v26 }
 0x485   :  { %4236 = vmatpush1.bf16.msra.mxu0 %v7661_v15  ;;  %4300 = vmatpush1.bf16.msra.mxu1 %v7662_v57  ;;  %v1345_v15 = vld [vmem:[#allocation2 + $0xd0] sm:$0xff] }
 0x486   :  { %4238 = vmatprep.subr.bf16.mxu0 %v7663_v61  ;;  %4302 = vmatprep.subr.bf16.mxu1 %v7664_v6 }
 0x489   :  { %4240 = vmatpush1.bf16.msra.mxu0 %v7665_v0  ;;  %4304 = vmatpush1.bf16.msra.mxu1 %v7666_v24 }
 0x48a   :  { %4306 = vmatprep.subr.bf16.mxu0 %v7667_v49  ;;  %4370 = vmatprep.subr.bf16.mxu1 %v7668_v13 }
 0x4df   :  { %v1417_v18 = vpop.f32.mrb[12].mxu0  ;;  %v1488_v1 = vpop.f32.mrb[12].mxu1 }
 0x4e0   :  { %v1419_v9 = vpop.f32.mrb[13].mxu0  ;;  %v1490_v26 = vpop.f32.mrb[13].mxu1  ;;  %v1635_v57 = vadd.f32 %v1417_v18, %v1343_v12  ;;  %v1637_v61 = vadd.f32 %v1488_v1, %v1345_v15  ;;  %v1347_v18 = vld [vmem:[#allocation2 + $0xe0] sm:$0xff]  ;;  %v1349_v15 = vld [vmem:[#allocation2 + $0xf0] sm:$0xff] }
 0x4e1   :  { %v1636_v23 = vadd.f32 %v1419_v9, %v1344_v11  ;;  %v1638_v6 = vadd.f32 %v1490_v26, %v1346_v14  ;;  %v1348_v14 = vld [vmem:[#allocation2 + $0xe8] sm:$0xff]  ;;  %v1350_v11 = vld [vmem:[#allocation2 + $0xf8] sm:$0xff] }
 0x4e2   :  { %v3123_v47 = vmul.f32 -1.442695, %v1635_v57  ;;  %v3125_v0 = vmul.f32 -1.442695, %v1637_v61 }
 0x4e3   :  { %v3124_v38 = vmul.f32 -1.442695, %v1636_v23  ;;  %v3126_v24 = vmul.f32 -1.442695, %v1638_v6 }
 0x4e4   :  { %5303 = vpow2.f32 %v3123_v47 }
 0x4e5   :  { %5305 = vpow2.f32 %v3125_v0 }
 0x4e6   :  { %5307 = vpow2.f32 %v3124_v38 }
 0x4e7   :  { %5309 = vpow2.f32 %v3126_v24 }
 0x4ee   :  { %v5304_v13 = vpop.eup %5303 }
 0x4ef   :  { %v5306_v49 = vpop.eup %5305  ;;  %v1649_v28 = vadd.f32 1.0, %v5304_v13 }
 0x4f0   :  { %v5308_v41 = vpop.eup %5307  ;;  %v1661_v25 = vadd.f32 1.0, %v5306_v49 }
 0x4f1   :  { %v5310_v3 = vpop.eup %5309  ;;  %v1650_v29 = vadd.f32 1.0, %v5308_v41  ;;  %5311 = vrcp.f32 %v1649_v28 }
 0x4f2   :  { %v1662_v12 = vadd.f32 1.0, %v5310_v3  ;;  %5313 = vrcp.f32 %v1661_v25 }
 0x4f3   :  { %5315 = vrcp.f32 %v1650_v29 }
 0x4f4   :  { %5317 = vrcp.f32 %v1662_v12 }
 0x4fb   :  { %v5312_v41 = vpop.eup %5311 }
 0x4fc   :  { %v5314_v28 = vpop.eup %5313 }
 0x4fd   :  { %v5316_v13 = vpop.eup %5315  ;;  %v1681_v29 = vmul.f32 %v5314_v28, %v6322_v17  ;;  %v7673_v28 = vld [vmem:[#allocation120_spill] sm:$0xff] }
 0x4fe   :  { %v5318_v25 = vpop.eup %5317 }
 0x4ff   :  { %v1682_v12 = vmul.f32 %v5318_v25, %v6324_v22  ;;  %v7675_v25 = vld [vmem:[#allocation122_spill] sm:$0xff] }
 0x51f   :  { %v1559_v23 = vpop.f32.mrb[14].mxu0  ;;  %v1630_v9 = vpop.f32.mrb[14].mxu1 }
 0x520   :  { %v1639_v47 = vadd.f32 %v1559_v23, %v1347_v18  ;;  %v1641_v38 = vadd.f32 %v1630_v9, %v1349_v15  ;;  %v1561_v24 = vpop.f32.mrb[15].mxu0  ;;  %v1632_v26 = vpop.f32.mrb[15].mxu1 }
 0x521   :  { %v1640_v57 = vadd.f32 %v1561_v24, %v1348_v14  ;;  %v1642_v61 = vadd.f32 %v1632_v26, %v1350_v11 }
 0x522   :  { %5319 = vtanh.f32 %v1639_v47  ;;  %v3127_v49 = vmul.f32 -1.442695, %v1641_v38 }
 0x523   :  { %5321 = vtanh.f32 %v1640_v57  ;;  %v3128_v3 = vmul.f32 -1.442695, %v1642_v61  ;;  %v7669_v61 = vld [vmem:[#allocation116_spill] sm:$0xff] }
 0x524   :  { %5323 = vpow2.f32 %v3127_v49  ;;  %v7670_v49 = vld [vmem:[#allocation117_spill] sm:$0xff] }
 0x525   :  { %5325 = vpow2.f32 %v3128_v3  ;;  %v7671_v3 = vld [vmem:[#allocation118_spill] sm:$0xff] }
 0x52c   :  { %v5320_v6 = vpop.eup %5319 }
 0x52d   :  { %v5322_v0 = vpop.eup %5321  ;;  %v1683_v1 = vmul.f32 %v5320_v6, %v5312_v41  ;;  %v7672_v41 = vld [vmem:[#allocation119_spill] sm:$0xff] }
 0x52e   :  { %v5324_v18 = vpop.eup %5323  ;;  %v1684_v15 = vmul.f32 %v5322_v0, %v5316_v13  ;;  %v7674_v13 = vld [vmem:[#allocation121_spill] sm:$0xff]  ;;  %v7676_v6 = vld [vmem:[#allocation123_spill] sm:$0xff]  ;;  %v7677_v0 = vld [vmem:[#allocation124_spill] sm:$0xff] }
 0x52f   :  { %v5326_v14 = vpop.eup %5325  ;;  %v6464_v11 = vadd.f32 %v1683_v1, %v1681_v29  ;;  %v1675_v23 = vadd.f32 1.0, %v5324_v18  ;;  %v7678_v29 = vld [vmem:[#allocation125_spill] sm:$0xff]  ;;  %v7679_v1 = vld [vmem:[#allocation126_spill] sm:$0xff]  ;;  %v7680_v18 = vld [vmem:[#allocation127_spill] sm:$0xff] }
 0x530   :  { %v6466_v9 = vadd.f32 %v1684_v15, %v1682_v12  ;;  %v1676_v47 = vadd.f32 1.0, %v5326_v14  ;;  %v7681_v12 = vld [vmem:[#allocation128_spill] sm:$0xff]  ;;  %v7682_v15 = vld [vmem:[#allocation129_spill] sm:$0xff]  ;;  %v7683_v14 = vld [vmem:[#allocation130_spill] sm:$0xff] }
 0x531   :  { %5327 = vtanh.f32 %v6464_v11 }
 0x532   :  { %5329 = vrcp.f32 %v1675_v23  ;;  %v7684_v23 = vld [vmem:[#allocation131_spill] sm:$0xff] }
 0x533   :  { %5331 = vtanh.f32 %v6466_v9 }
 0x534   :  { %5333 = vrcp.f32 %v1676_v47  ;;  %v7685_v47 = vld [vmem:[#allocation132_spill] sm:$0xff] }
 0x53b   :  { %v5328_v38 = vpop.eup %5327 }
 0x53c   :  { %v5330_v17 = vpop.eup %5329 }
 0x53d   :  { %v5332_v24 = vpop.eup %5331  ;;  %v6470_v22 = vmul.f32 %v5330_v17, %v5328_v38  ;;  %v7686_v38 = vld [vmem:[#allocation133_spill] sm:$0xff]  ;;  %v7687_v17 = vld [vmem:[#allocation134_spill] sm:$0xff] }
 0x53e   :  { %v5334_v26 = vpop.eup %5333 }
 0x53f   :  { %v1690_v57 = vmul.f32 %v5334_v26, %v5332_v24  ;;  %v7688_v24 = vld [vmem:[#allocation135_spill] sm:$0xff]  ;;  %v7689_v26 = vld [vmem:[#allocation136_spill] sm:$0xff] }
 0x541   :  { %1764 = vmatprep.mubr.f32.mxu0 %v1690_v57  ;;  %1835 = vmatprep.mubr.f32.mxu1 %v1690_v57 }
 0x542   :  { %1765 = vmatmul.mubr.f32.vlgmr.msra.gmra.mrb[16].mxu0 %v6470_v22  ;;  %1836 = vmatmul.mubr.f32.vlgmr.msra.gmra.mrb[16].mxu1 %v6470_v22 }
 0x543   :  { %4308 = vmatpush1.bf16.msra.mxu0 %v7404_v60  ;;  %4372 = vmatpush1.bf16.msra.mxu1 %v7405_v55 }
 0x544   :  { %1906 = vmatprep.mubr.f32.mxu0 %v1690_v57  ;;  %1977 = vmatprep.mubr.f32.mxu1 %v1690_v57  ;;  %v7690_v57 = vld [vmem:[#allocation137_spill] sm:$0xff] }
 0x545   :  { %4310 = vmatprep.subr.bf16.mxu0 %v7406_v10  ;;  %4374 = vmatprep.subr.bf16.mxu1 %v7407_v54 }
 0x547   :  { %4312 = vmatpush1.bf16.msra.mxu0 %v7408_v46  ;;  %4376 = vmatpush1.bf16.msra.mxu1 %v7409_v62 }
 0x548   :  { %4314 = vmatprep.subr.bf16.mxu0 %v7410_v50  ;;  %4378 = vmatprep.subr.bf16.mxu1 %v7411_v58 }
 0x54b   :  { %4316 = vmatpush1.bf16.msra.mxu0 %v7412_v48  ;;  %4380 = vmatpush1.bf16.msra.mxu1 %v7491_v36 }
 0x54c   :  { %4318 = vmatprep.subr.bf16.mxu0 %v7492_v2  ;;  %4382 = vmatprep.subr.bf16.mxu1 %v7493_v39 }
 0x54f   :  { %4320 = vmatpush1.bf16.msra.mxu0 %v7494_v35  ;;  %4384 = vmatpush1.bf16.msra.mxu1 %v7495_v40 }
 0x550   :  { %4322 = vmatprep.subr.bf16.mxu0 %v7496_v7  ;;  %4386 = vmatprep.subr.bf16.mxu1 %v7497_v31 }
 0x553   :  { %4324 = vmatpush1.bf16.msra.mxu0 %v7498_v37  ;;  %4388 = vmatpush1.bf16.msra.mxu1 %v7499_v43 }
 0x554   :  { %4326 = vmatprep.subr.bf16.mxu0 %v7500_v27  ;;  %4390 = vmatprep.subr.bf16.mxu1 %v7501_v56 }
 0x557   :  { %4328 = vmatpush1.bf16.msra.mxu0 %v7580_v42  ;;  %4392 = vmatpush1.bf16.msra.mxu1 %v7581_v4 }
 0x558   :  { %4330 = vmatprep.subr.bf16.mxu0 %v7582_v8  ;;  %4394 = vmatprep.subr.bf16.mxu1 %v7583_v59 }
 0x55b   :  { %4332 = vmatpush1.bf16.msra.mxu0 %v7584_v21  ;;  %4396 = vmatpush1.bf16.msra.mxu1 %v7585_v5 }
 0x55c   :  { %4334 = vmatprep.subr.bf16.mxu0 %v7586_v45  ;;  %4398 = vmatprep.subr.bf16.mxu1 %v7587_v32 }
 0x55f   :  { %4336 = vmatpush1.bf16.msra.mxu0 %v7510_v20  ;;  %4400 = vmatpush1.bf16.msra.mxu1 %v7588_v30 }
 0x560   :  { %4338 = vmatprep.subr.bf16.mxu0 %v7512_v34  ;;  %4402 = vmatprep.subr.bf16.mxu1 %v7513_v16 }
 0x563   :  { %4340 = vmatpush1.bf16.msra.mxu0 %v7514_v63  ;;  %4404 = vmatpush1.bf16.msra.mxu1 %v7515_v19 }
 0x564   :  { %4342 = vmatprep.subr.bf16.mxu0 %v7516_v53  ;;  %4406 = vmatprep.subr.bf16.mxu1 %v7517_v52 }
 0x567   :  { %4344 = vmatpush1.bf16.msra.mxu0 %v7518_v51  ;;  %4408 = vmatpush1.bf16.msra.mxu1 %v7519_v44 }
 0x568   :  { %4346 = vmatprep.subr.bf16.mxu0 %v7520_v33  ;;  %4410 = vmatprep.subr.bf16.mxu1 %v7669_v61 }
 0x56b   :  { %4348 = vmatpush1.bf16.msra.mxu0 %v7670_v49  ;;  %4412 = vmatpush1.bf16.msra.mxu1 %v7671_v3 }
 0x56c   :  { %4350 = vmatprep.subr.bf16.mxu0 %v7672_v41  ;;  %4414 = vmatprep.subr.bf16.mxu1 %v7673_v28 }
 0x56f   :  { %4352 = vmatpush1.bf16.msra.mxu0 %v7674_v13  ;;  %4416 = vmatpush1.bf16.msra.mxu1 %v7675_v25 }
 0x570   :  { %4354 = vmatprep.subr.bf16.mxu0 %v7676_v6  ;;  %4418 = vmatprep.subr.bf16.mxu1 %v7677_v0  ;;  %v1695_v0 = vld [vmem:[#allocation2 + $0x118] sm:$0xff] }
 0x573   :  { %4356 = vmatpush1.bf16.msra.mxu0 %v7678_v29  ;;  %4420 = vmatpush1.bf16.msra.mxu1 %v7679_v1  ;;  %v1692_v1 = vld [vmem:[#allocation2 + $0x100] sm:$0xff]  ;;  %v1693_v29 = vld [vmem:[#allocation2 + $0x108] sm:$0xff] }
 0x574   :  { %4358 = vmatprep.subr.bf16.mxu0 %v7680_v18  ;;  %4422 = vmatprep.subr.bf16.mxu1 %v7681_v12  ;;  %v7691_v18 = vld [vmem:[#allocation138_spill] sm:$0xff]  ;;  %v7692_v12 = vld [vmem:[#allocation11_spill] sm:$0xff] }
 0x577   :  { %4360 = vmatpush1.bf16.msra.mxu0 %v7682_v15  ;;  %4424 = vmatpush1.bf16.msra.mxu1 %v7683_v14  ;;  %v7693_v15 = vld [vmem:[#allocation12_spill] sm:$0xff] }
 0x578   :  { %4362 = vmatprep.subr.bf16.mxu0 %v7684_v23  ;;  %4426 = vmatprep.subr.bf16.mxu1 %v7685_v47  ;;  %v7694_v47 = vld [vmem:[#allocation13_spill] sm:$0xff]  ;;  %v7703_v23 = vld [vmem:[#allocation22_spill] sm:$0xff] }
 0x57b   :  { %4364 = vmatpush1.bf16.msra.mxu0 %v7686_v38  ;;  %4428 = vmatpush1.bf16.msra.mxu1 %v7687_v17  ;;  %v7695_v38 = vld [vmem:[#allocation14_spill] sm:$0xff]  ;;  %v7696_v17 = vld [vmem:[#allocation15_spill] sm:$0xff] }
 0x57c   :  { %4366 = vmatprep.subr.bf16.mxu0 %v7688_v24  ;;  %4430 = vmatprep.subr.bf16.mxu1 %v7689_v26  ;;  %v7697_v24 = vld [vmem:[#allocation16_spill] sm:$0xff]  ;;  %v7698_v26 = vld [vmem:[#allocation17_spill] sm:$0xff] }
 0x57f   :  { %4368 = vmatpush1.bf16.msra.mxu0 %v7690_v57  ;;  %4432 = vmatpush1.bf16.msra.mxu1 %v7691_v18  ;;  %v7699_v57 = vld [vmem:[#allocation18_spill] sm:$0xff]  ;;  %v7700_v18 = vld [vmem:[#allocation19_spill] sm:$0xff] }
 0x580   :  { %4434 = vmatprep.subr.bf16.mxu0 %v7692_v12  ;;  %4498 = vmatprep.subr.bf16.mxu1 %v7693_v15  ;;  %v7701_v12 = vld [vmem:[#allocation20_spill] sm:$0xff]  ;;  %v7702_v15 = vld [vmem:[#allocation21_spill] sm:$0xff] }
 0x582   :  { %1907 = vmatmul.mubr.f32.vlgmr.msra.gmra.mrb[18].mxu0 %v6470_v22  ;;  %1978 = vmatmul.mubr.f32.vlgmr.msra.gmra.mrb[18].mxu1 %v6470_v22  ;;  %v7704_v22 = vld [vmem:[#allocation23_spill] sm:$0xff] }
 0x583   :  { %4436 = vmatpush1.bf16.msra.mxu0 %v7694_v47  ;;  %4500 = vmatpush1.bf16.msra.mxu1 %v7695_v38  ;;  %v7705_v47 = vld [vmem:[#allocation24_spill] sm:$0xff]  ;;  %v7706_v38 = vld [vmem:[#allocation25_spill] sm:$0xff] }
 0x584   :  { %4438 = vmatprep.subr.bf16.mxu0 %v7696_v17  ;;  %4502 = vmatprep.subr.bf16.mxu1 %v7697_v24  ;;  %v7707_v17 = vld [vmem:[#allocation26_spill] sm:$0xff]  ;;  %v7708_v24 = vld [vmem:[#allocation27_spill] sm:$0xff] }
 0x587   :  { %4440 = vmatpush1.bf16.msra.mxu0 %v7698_v26  ;;  %4504 = vmatpush1.bf16.msra.mxu1 %v7699_v57  ;;  %v7709_v26 = vld [vmem:[#allocation28_spill] sm:$0xff]  ;;  %v7710_v57 = vld [vmem:[#allocation29_spill] sm:$0xff] }
 0x588   :  { %4442 = vmatprep.subr.bf16.mxu0 %v7700_v18  ;;  %4506 = vmatprep.subr.bf16.mxu1 %v7701_v12  ;;  %v7711_v18 = vld [vmem:[#allocation30_spill] sm:$0xff]  ;;  %v7712_v12 = vld [vmem:[#allocation31_spill] sm:$0xff] }
 0x58b   :  { %4444 = vmatpush1.bf16.msra.mxu0 %v7702_v15  ;;  %4508 = vmatpush1.bf16.msra.mxu1 %v7703_v23  ;;  %v7713_v15 = vld [vmem:[#allocation32_spill] sm:$0xff]  ;;  %v7714_v23 = vld [vmem:[#allocation33_spill] sm:$0xff] }
 0x58c   :  { %4446 = vmatprep.subr.bf16.mxu0 %v7704_v22  ;;  %4510 = vmatprep.subr.bf16.mxu1 %v7705_v47  ;;  %v7715_v22 = vld [vmem:[#allocation34_spill] sm:$0xff]  ;;  %v7716_v47 = vld [vmem:[#allocation35_spill] sm:$0xff] }
 0x58f   :  { %4448 = vmatpush1.bf16.msra.mxu0 %v7706_v38  ;;  %4512 = vmatpush1.bf16.msra.mxu1 %v7707_v17  ;;  %v7717_v38 = vld [vmem:[#allocation36_spill] sm:$0xff]  ;;  %v7718_v17 = vld [vmem:[#allocation37_spill] sm:$0xff] }
 0x590   :  { %4450 = vmatprep.subr.bf16.mxu0 %v7708_v24  ;;  %4514 = vmatprep.subr.bf16.mxu1 %v7709_v26  ;;  %v7719_v24 = vld [vmem:[#allocation38_spill] sm:$0xff]  ;;  %v7720_v26 = vld [vmem:[#allocation39_spill] sm:$0xff] }
 0x593   :  { %4452 = vmatpush1.bf16.msra.mxu0 %v7710_v57  ;;  %4516 = vmatpush1.bf16.msra.mxu1 %v7711_v18  ;;  %v7721_v57 = vld [vmem:[#allocation40_spill] sm:$0xff]  ;;  %v7722_v18 = vld [vmem:[#allocation41_spill] sm:$0xff] }
 0x594   :  { %4454 = vmatprep.subr.bf16.mxu0 %v7712_v12  ;;  %4518 = vmatprep.subr.bf16.mxu1 %v7713_v15  ;;  %v7723_v12 = vld [vmem:[#allocation42_spill] sm:$0xff]  ;;  %v7724_v15 = vld [vmem:[#allocation43_spill] sm:$0xff] }
 0x597   :  { %4456 = vmatpush1.bf16.msra.mxu0 %v7714_v23  ;;  %4520 = vmatpush1.bf16.msra.mxu1 %v7715_v22  ;;  %v7725_v23 = vld [vmem:[#allocation44_spill] sm:$0xff]  ;;  %v7726_v22 = vld [vmem:[#allocation45_spill] sm:$0xff] }
 0x598   :  { %4458 = vmatprep.subr.bf16.mxu0 %v7716_v47  ;;  %4522 = vmatprep.subr.bf16.mxu1 %v7717_v38  ;;  %v7727_v47 = vld [vmem:[#allocation46_spill] sm:$0xff]  ;;  %v7728_v38 = vld [vmem:[#allocation47_spill] sm:$0xff] }
 0x59b   :  { %4460 = vmatpush1.bf16.msra.mxu0 %v7718_v17  ;;  %4524 = vmatpush1.bf16.msra.mxu1 %v7719_v24  ;;  %v7729_v17 = vld [vmem:[#allocation48_spill] sm:$0xff]  ;;  %v7730_v24 = vld [vmem:[#allocation49_spill] sm:$0xff] }
 0x59c   :  { %4462 = vmatprep.subr.bf16.mxu0 %v7720_v26  ;;  %4526 = vmatprep.subr.bf16.mxu1 %v7721_v57  ;;  %v7731_v26 = vld [vmem:[#allocation50_spill] sm:$0xff]  ;;  %v7732_v57 = vld [vmem:[#allocation51_spill] sm:$0xff] }
 0x59f   :  { %4464 = vmatpush1.bf16.msra.mxu0 %v7722_v18  ;;  %4528 = vmatpush1.bf16.msra.mxu1 %v7723_v12  ;;  %v7733_v18 = vld [vmem:[#allocation52_spill] sm:$0xff]  ;;  %v7734_v12 = vld [vmem:[#allocation53_spill] sm:$0xff] }
 0x5a0   :  { %4466 = vmatprep.subr.bf16.mxu0 %v7724_v15  ;;  %4530 = vmatprep.subr.bf16.mxu1 %v7725_v23  ;;  %v7735_v15 = vld [vmem:[#allocation54_spill] sm:$0xff]  ;;  %v7736_v23 = vld [vmem:[#allocation55_spill] sm:$0xff] }
 0x5a3   :  { %4468 = vmatpush1.bf16.msra.mxu0 %v7726_v22  ;;  %4532 = vmatpush1.bf16.msra.mxu1 %v7727_v47  ;;  %v7737_v22 = vld [vmem:[#allocation56_spill] sm:$0xff]  ;;  %v7738_v47 = vld [vmem:[#allocation57_spill] sm:$0xff] }
 0x5a4   :  { %4470 = vmatprep.subr.bf16.mxu0 %v7728_v38  ;;  %4534 = vmatprep.subr.bf16.mxu1 %v7729_v17  ;;  %v7739_v38 = vld [vmem:[#allocation58_spill] sm:$0xff]  ;;  %v7740_v17 = vld [vmem:[#allocation59_spill] sm:$0xff] }
 0x5a7   :  { %4472 = vmatpush1.bf16.msra.mxu0 %v7730_v24  ;;  %4536 = vmatpush1.bf16.msra.mxu1 %v7731_v26  ;;  %v7741_v24 = vld [vmem:[#allocation60_spill] sm:$0xff]  ;;  %v7742_v26 = vld [vmem:[#allocation61_spill] sm:$0xff] }
 0x5a8   :  { %4474 = vmatprep.subr.bf16.mxu0 %v7732_v57  ;;  %4538 = vmatprep.subr.bf16.mxu1 %v7733_v18  ;;  %v7743_v57 = vld [vmem:[#allocation62_spill] sm:$0xff]  ;;  %v7744_v18 = vld [vmem:[#allocation63_spill] sm:$0xff] }
 0x5ab   :  { %4476 = vmatpush1.bf16.msra.mxu0 %v7734_v12  ;;  %4540 = vmatpush1.bf16.msra.mxu1 %v7735_v15  ;;  %v7745_v12 = vld [vmem:[#allocation64_spill] sm:$0xff]  ;;  %v7746_v15 = vld [vmem:[#allocation65_spill] sm:$0xff] }
 0x5ac   :  { %4478 = vmatprep.subr.bf16.mxu0 %v7736_v23  ;;  %4542 = vmatprep.subr.bf16.mxu1 %v7737_v22  ;;  %v7747_v23 = vld [vmem:[#allocation66_spill] sm:$0xff]  ;;  %v7748_v22 = vld [vmem:[#allocation67_spill] sm:$0xff] }
 0x5af   :  { %4480 = vmatpush1.bf16.msra.mxu0 %v7738_v47  ;;  %4544 = vmatpush1.bf16.msra.mxu1 %v7739_v38  ;;  %v7749_v47 = vld [vmem:[#allocation68_spill] sm:$0xff]  ;;  %v7750_v38 = vld [vmem:[#allocation69_spill] sm:$0xff] }
 0x5b0   :  { %4482 = vmatprep.subr.bf16.mxu0 %v7740_v17  ;;  %4546 = vmatprep.subr.bf16.mxu1 %v7741_v24  ;;  %v7751_v17 = vld [vmem:[#allocation70_spill] sm:$0xff]  ;;  %v7752_v24 = vld [vmem:[#allocation71_spill] sm:$0xff] }
 0x5b3   :  { %4484 = vmatpush1.bf16.msra.mxu0 %v7742_v26  ;;  %4548 = vmatpush1.bf16.msra.mxu1 %v7743_v57  ;;  %v7753_v26 = vld [vmem:[#allocation72_spill] sm:$0xff]  ;;  %v7754_v57 = vld [vmem:[#allocation73_spill] sm:$0xff] }
 0x5b4   :  { %4486 = vmatprep.subr.bf16.mxu0 %v7744_v18  ;;  %4550 = vmatprep.subr.bf16.mxu1 %v7745_v12  ;;  %v7755_v18 = vld [vmem:[#allocation74_spill] sm:$0xff]  ;;  %v7756_v12 = vld [vmem:[#allocation75_spill] sm:$0xff] }
 0x5b7   :  { %4488 = vmatpush1.bf16.msra.mxu0 %v7746_v15  ;;  %4552 = vmatpush1.bf16.msra.mxu1 %v7747_v23  ;;  %v7757_v15 = vld [vmem:[#allocation76_spill] sm:$0xff] }
 0x5b8   :  { %4490 = vmatprep.subr.bf16.mxu0 %v7748_v22  ;;  %4554 = vmatprep.subr.bf16.mxu1 %v7749_v47 }
 0x5bb   :  { %4492 = vmatpush1.bf16.msra.mxu0 %v7750_v38  ;;  %4556 = vmatpush1.bf16.msra.mxu1 %v7751_v17  ;;  %v1694_v38 = vld [vmem:[#allocation2 + $0x110] sm:$0xff] }
 0x5bc   :  { %4494 = vmatprep.subr.bf16.mxu0 %v7752_v24  ;;  %4558 = vmatprep.subr.bf16.mxu1 %v7753_v26 }
 0x5bf   :  { %4496 = vmatpush1.bf16.msra.mxu0 %v7754_v57  ;;  %4560 = vmatpush1.bf16.msra.mxu1 %v7755_v18 }
 0x5c0   :  { %4562 = vmatprep.subr.bf16.mxu0 %v7756_v12  ;;  %4626 = vmatprep.subr.bf16.mxu1 %v7757_v15 }
 0x615   :  { %v1766_v23 = vpop.f32.mrb[16].mxu0  ;;  %v1837_v22 = vpop.f32.mrb[16].mxu1 }
 0x616   :  { %v1768_v14 = vpop.f32.mrb[17].mxu0  ;;  %v1839_v47 = vpop.f32.mrb[17].mxu1  ;;  %v1984_v17 = vadd.f32 %v1766_v23, %v1692_v1  ;;  %v1986_v24 = vadd.f32 %v1837_v22, %v1694_v38  ;;  %v1696_v23 = vld [vmem:[#allocation2 + $0x120] sm:$0xff]  ;;  %v1698_v38 = vld [vmem:[#allocation2 + $0x130] sm:$0xff] }
 0x617   :  { %v1985_v6 = vadd.f32 %v1768_v14, %v1693_v29  ;;  %v1987_v26 = vadd.f32 %v1839_v47, %v1695_v0  ;;  %v1697_v0 = vld [vmem:[#allocation2 + $0x128] sm:$0xff]  ;;  %v1699_v29 = vld [vmem:[#allocation2 + $0x138] sm:$0xff] }
 0x618   :  { %v3129_v25 = vmul.f32 -1.442695, %v1984_v17  ;;  %v3131_v57 = vmul.f32 -1.442695, %v1986_v24 }
 0x619   :  { %v3130_v13 = vmul.f32 -1.442695, %v1985_v6  ;;  %v3132_v18 = vmul.f32 -1.442695, %v1987_v26 }
 0x61a   :  { %5335 = vpow2.f32 %v3129_v25 }
 0x61b   :  { %5337 = vpow2.f32 %v3131_v57 }
 0x61c   :  { %5339 = vpow2.f32 %v3130_v13 }
 0x61d   :  { %5341 = vpow2.f32 %v3132_v18 }
 0x624   :  { %v5336_v15 = vpop.eup %5335 }
 0x625   :  { %v5338_v12 = vpop.eup %5337  ;;  %v1998_v3 = vadd.f32 1.0, %v5336_v15 }
 0x626   :  { %v5340_v28 = vpop.eup %5339  ;;  %v2010_v49 = vadd.f32 1.0, %v5338_v12 }
 0x627   :  { %v5342_v41 = vpop.eup %5341  ;;  %v1999_v61 = vadd.f32 1.0, %v5340_v28  ;;  %5343 = vrcp.f32 %v1998_v3 }
 0x628   :  { %v2011_v1 = vadd.f32 1.0, %v5342_v41  ;;  %5345 = vrcp.f32 %v2010_v49 }
 0x629   :  { %5347 = vrcp.f32 %v1999_v61 }
 0x62a   :  { %5349 = vrcp.f32 %v2011_v1 }
 0x631   :  { %v5344_v3 = vpop.eup %5343 }
 0x632   :  { %v5346_v28 = vpop.eup %5345 }
 0x633   :  { %v5348_v15 = vpop.eup %5347  ;;  %v2030_v61 = vmul.f32 %v5346_v28, %v6464_v11  ;;  %v7762_v28 = vld [vmem:[#allocation120_spill] sm:$0xff] }
 0x634   :  { %v5350_v49 = vpop.eup %5349 }
 0x635   :  { %v2031_v1 = vmul.f32 %v5350_v49, %v6466_v9  ;;  %v7764_v49 = vld [vmem:[#allocation122_spill] sm:$0xff] }
 0x655   :  { %v1908_v6 = vpop.f32.mrb[18].mxu0  ;;  %v1979_v14 = vpop.f32.mrb[18].mxu1 }
 0x656   :  { %v1988_v25 = vadd.f32 %v1908_v6, %v1696_v23  ;;  %v1990_v13 = vadd.f32 %v1979_v14, %v1698_v38  ;;  %v1910_v18 = vpop.f32.mrb[19].mxu0  ;;  %v1981_v47 = vpop.f32.mrb[19].mxu1 }
 0x657   :  { %v1989_v17 = vadd.f32 %v1910_v18, %v1697_v0  ;;  %v1991_v24 = vadd.f32 %v1981_v47, %v1699_v29 }
 0x658   :  { %5351 = vtanh.f32 %v1988_v25  ;;  %v3133_v12 = vmul.f32 -1.442695, %v1990_v13 }
 0x659   :  { %5353 = vtanh.f32 %v1989_v17  ;;  %v3134_v41 = vmul.f32 -1.442695, %v1991_v24  ;;  %v7758_v24 = vld [vmem:[#allocation116_spill] sm:$0xff] }
 0x65a   :  { %5355 = vpow2.f32 %v3133_v12  ;;  %v7759_v12 = vld [vmem:[#allocation117_spill] sm:$0xff] }
 0x65b   :  { %5357 = vpow2.f32 %v3134_v41  ;;  %v7760_v41 = vld [vmem:[#allocation118_spill] sm:$0xff] }
 0x662   :  { %v5352_v26 = vpop.eup %5351 }
 0x663   :  { %v5354_v57 = vpop.eup %5353  ;;  %v2032_v22 = vmul.f32 %v5352_v26, %v5344_v3  ;;  %v7761_v3 = vld [vmem:[#allocation119_spill] sm:$0xff] }
 0x664   :  { %v5356_v23 = vpop.eup %5355  ;;  %v2033_v38 = vmul.f32 %v5354_v57, %v5348_v15  ;;  %v7763_v15 = vld [vmem:[#allocation121_spill] sm:$0xff]  ;;  %v7765_v26 = vld [vmem:[#allocation123_spill] sm:$0xff]  ;;  %v7766_v57 = vld [vmem:[#allocation124_spill] sm:$0xff] }
 0x665   :  { %v5358_v0 = vpop.eup %5357  ;;  %v6606_v29 = vadd.f32 %v2032_v22, %v2030_v61  ;;  %v2024_v6 = vadd.f32 1.0, %v5356_v23  ;;  %v7767_v61 = vld [vmem:[#allocation125_spill] sm:$0xff]  ;;  %v7768_v22 = vld [vmem:[#allocation126_spill] sm:$0xff]  ;;  %v7769_v23 = vld [vmem:[#allocation127_spill] sm:$0xff] }
 0x666   :  { %v6608_v14 = vadd.f32 %v2033_v38, %v2031_v1  ;;  %v2025_v25 = vadd.f32 1.0, %v5358_v0  ;;  %v7770_v1 = vld [vmem:[#allocation128_spill] sm:$0xff]  ;;  %v7771_v38 = vld [vmem:[#allocation129_spill] sm:$0xff]  ;;  %v7772_v0 = vld [vmem:[#allocation130_spill] sm:$0xff] }
 0x667   :  { %5359 = vtanh.f32 %v6606_v29 }
 0x668   :  { %5361 = vrcp.f32 %v2024_v6  ;;  %v7773_v6 = vld [vmem:[#allocation131_spill] sm:$0xff] }
 0x669   :  { %5363 = vtanh.f32 %v6608_v14 }
 0x66a   :  { %5365 = vrcp.f32 %v2025_v25  ;;  %v7774_v25 = vld [vmem:[#allocation132_spill] sm:$0xff] }
 0x671   :  { %v5360_v13 = vpop.eup %5359 }
 0x672   :  { %v5362_v11 = vpop.eup %5361 }
 0x673   :  { %v5364_v18 = vpop.eup %5363  ;;  %v6612_v9 = vmul.f32 %v5362_v11, %v5360_v13  ;;  %v7775_v13 = vld [vmem:[#allocation133_spill] sm:$0xff]  ;;  %v7776_v11 = vld [vmem:[#allocation134_spill] sm:$0xff] }
 0x674   :  { %v5366_v47 = vpop.eup %5365 }
 0x675   :  { %v2039_v17 = vmul.f32 %v5366_v47, %v5364_v18  ;;  %v7777_v18 = vld [vmem:[#allocation135_spill] sm:$0xff]  ;;  %v7778_v47 = vld [vmem:[#allocation136_spill] sm:$0xff] }
 0x677   :  { %2113 = vmatprep.mubr.f32.mxu0 %v2039_v17  ;;  %2184 = vmatprep.mubr.f32.mxu1 %v2039_v17 }
 0x678   :  { %2114 = vmatmul.mubr.f32.vlgmr.msra.gmra.mrb[20].mxu0 %v6612_v9  ;;  %2185 = vmatmul.mubr.f32.vlgmr.msra.gmra.mrb[20].mxu1 %v6612_v9 }
 0x679   :  { %4564 = vmatpush1.bf16.msra.mxu0 %v7404_v60  ;;  %4628 = vmatpush1.bf16.msra.mxu1 %v7405_v55 }
 0x67a   :  { %2255 = vmatprep.mubr.f32.mxu0 %v2039_v17  ;;  %2326 = vmatprep.mubr.f32.mxu1 %v2039_v17  ;;  %v7779_v17 = vld [vmem:[#allocation137_spill] sm:$0xff] }
 0x67b   :  { %4566 = vmatprep.subr.bf16.mxu0 %v7406_v10  ;;  %4630 = vmatprep.subr.bf16.mxu1 %v7407_v54 }
 0x67d   :  { %4568 = vmatpush1.bf16.msra.mxu0 %v7408_v46  ;;  %4632 = vmatpush1.bf16.msra.mxu1 %v7409_v62 }
 0x67e   :  { %4570 = vmatprep.subr.bf16.mxu0 %v7410_v50  ;;  %4634 = vmatprep.subr.bf16.mxu1 %v7411_v58 }
 0x681   :  { %4572 = vmatpush1.bf16.msra.mxu0 %v7412_v48  ;;  %4636 = vmatpush1.bf16.msra.mxu1 %v7491_v36 }
 0x682   :  { %4574 = vmatprep.subr.bf16.mxu0 %v7492_v2  ;;  %4638 = vmatprep.subr.bf16.mxu1 %v7493_v39 }
 0x685   :  { %4576 = vmatpush1.bf16.msra.mxu0 %v7494_v35  ;;  %4640 = vmatpush1.bf16.msra.mxu1 %v7495_v40 }
 0x686   :  { %4578 = vmatprep.subr.bf16.mxu0 %v7496_v7  ;;  %4642 = vmatprep.subr.bf16.mxu1 %v7497_v31 }
 0x689   :  { %4580 = vmatpush1.bf16.msra.mxu0 %v7498_v37  ;;  %4644 = vmatpush1.bf16.msra.mxu1 %v7499_v43 }
 0x68a   :  { %4582 = vmatprep.subr.bf16.mxu0 %v7500_v27  ;;  %4646 = vmatprep.subr.bf16.mxu1 %v7501_v56 }
 0x68d   :  { %4584 = vmatpush1.bf16.msra.mxu0 %v7580_v42  ;;  %4648 = vmatpush1.bf16.msra.mxu1 %v7581_v4 }
 0x68e   :  { %4586 = vmatprep.subr.bf16.mxu0 %v7582_v8  ;;  %4650 = vmatprep.subr.bf16.mxu1 %v7583_v59 }
 0x691   :  { %4588 = vmatpush1.bf16.msra.mxu0 %v7584_v21  ;;  %4652 = vmatpush1.bf16.msra.mxu1 %v7585_v5 }
 0x692   :  { %4590 = vmatprep.subr.bf16.mxu0 %v7586_v45  ;;  %4654 = vmatprep.subr.bf16.mxu1 %v7587_v32 }
 0x695   :  { %4592 = vmatpush1.bf16.msra.mxu0 %v7510_v20  ;;  %4656 = vmatpush1.bf16.msra.mxu1 %v7588_v30 }
 0x696   :  { %4594 = vmatprep.subr.bf16.mxu0 %v7512_v34  ;;  %4658 = vmatprep.subr.bf16.mxu1 %v7513_v16 }
 0x699   :  { %4596 = vmatpush1.bf16.msra.mxu0 %v7514_v63  ;;  %4660 = vmatpush1.bf16.msra.mxu1 %v7515_v19 }
 0x69a   :  { %4598 = vmatprep.subr.bf16.mxu0 %v7516_v53  ;;  %4662 = vmatprep.subr.bf16.mxu1 %v7517_v52 }
 0x69d   :  { %4600 = vmatpush1.bf16.msra.mxu0 %v7518_v51  ;;  %4664 = vmatpush1.bf16.msra.mxu1 %v7519_v44 }
 0x69e   :  { %4602 = vmatprep.subr.bf16.mxu0 %v7520_v33  ;;  %4666 = vmatprep.subr.bf16.mxu1 %v7758_v24 }
 0x6a1   :  { %4604 = vmatpush1.bf16.msra.mxu0 %v7759_v12  ;;  %4668 = vmatpush1.bf16.msra.mxu1 %v7760_v41 }
 0x6a2   :  { %4606 = vmatprep.subr.bf16.mxu0 %v7761_v3  ;;  %4670 = vmatprep.subr.bf16.mxu1 %v7762_v28 }
 0x6a5   :  { %4608 = vmatpush1.bf16.msra.mxu0 %v7763_v15  ;;  %4672 = vmatpush1.bf16.msra.mxu1 %v7764_v49 }
 0x6a6   :  { %4610 = vmatprep.subr.bf16.mxu0 %v7765_v26  ;;  %4674 = vmatprep.subr.bf16.mxu1 %v7766_v57  ;;  %v2044_v57 = vld [vmem:[#allocation2 + $0x158] sm:$0xff] }
 0x6a9   :  { %4612 = vmatpush1.bf16.msra.mxu0 %v7767_v61  ;;  %4676 = vmatpush1.bf16.msra.mxu1 %v7768_v22  ;;  %v2041_v22 = vld [vmem:[#allocation2 + $0x140] sm:$0xff]  ;;  %v2042_v61 = vld [vmem:[#allocation2 + $0x148] sm:$0xff] }
 0x6aa   :  { %4614 = vmatprep.subr.bf16.mxu0 %v7769_v23  ;;  %4678 = vmatprep.subr.bf16.mxu1 %v7770_v1  ;;  %v7780_v23 = vld [vmem:[#allocation138_spill] sm:$0xff]  ;;  %v7781_v1 = vld [vmem:[#allocation11_spill] sm:$0xff] }
 0x6ad   :  { %4616 = vmatpush1.bf16.msra.mxu0 %v7771_v38  ;;  %4680 = vmatpush1.bf16.msra.mxu1 %v7772_v0  ;;  %v7782_v38 = vld [vmem:[#allocation12_spill] sm:$0xff] }
 0x6ae   :  { %4618 = vmatprep.subr.bf16.mxu0 %v7773_v6  ;;  %4682 = vmatprep.subr.bf16.mxu1 %v7774_v25  ;;  %v7783_v25 = vld [vmem:[#allocation13_spill] sm:$0xff]  ;;  %v7792_v6 = vld [vmem:[#allocation22_spill] sm:$0xff] }
 0x6b1   :  { %4620 = vmatpush1.bf16.msra.mxu0 %v7775_v13  ;;  %4684 = vmatpush1.bf16.msra.mxu1 %v7776_v11  ;;  %v7784_v13 = vld [vmem:[#allocation14_spill] sm:$0xff]  ;;  %v7785_v11 = vld [vmem:[#allocation15_spill] sm:$0xff] }
 0x6b2   :  { %4622 = vmatprep.subr.bf16.mxu0 %v7777_v18  ;;  %4686 = vmatprep.subr.bf16.mxu1 %v7778_v47  ;;  %v7786_v18 = vld [vmem:[#allocation16_spill] sm:$0xff]  ;;  %v7787_v47 = vld [vmem:[#allocation17_spill] sm:$0xff] }
 0x6b5   :  { %4624 = vmatpush1.bf16.msra.mxu0 %v7779_v17  ;;  %4688 = vmatpush1.bf16.msra.mxu1 %v7780_v23  ;;  %v7788_v17 = vld [vmem:[#allocation18_spill] sm:$0xff]  ;;  %v7789_v23 = vld [vmem:[#allocation19_spill] sm:$0xff] }
 0x6b6   :  { %4690 = vmatprep.subr.bf16.mxu0 %v7781_v1  ;;  %4754 = vmatprep.subr.bf16.mxu1 %v7782_v38  ;;  %v7790_v1 = vld [vmem:[#allocation20_spill] sm:$0xff]  ;;  %v7791_v38 = vld [vmem:[#allocation21_spill] sm:$0xff] }
 0x6b8   :  { %2256 = vmatmul.mubr.f32.vlgmr.msra.gmra.mrb[22].mxu0 %v6612_v9  ;;  %2327 = vmatmul.mubr.f32.vlgmr.msra.gmra.mrb[22].mxu1 %v6612_v9  ;;  %v7793_v9 = vld [vmem:[#allocation23_spill] sm:$0xff] }
 0x6b9   :  { %4692 = vmatpush1.bf16.msra.mxu0 %v7783_v25  ;;  %4756 = vmatpush1.bf16.msra.mxu1 %v7784_v13  ;;  %v7794_v25 = vld [vmem:[#allocation24_spill] sm:$0xff]  ;;  %v7795_v13 = vld [vmem:[#allocation25_spill] sm:$0xff] }
 0x6ba   :  { %4694 = vmatprep.subr.bf16.mxu0 %v7785_v11  ;;  %4758 = vmatprep.subr.bf16.mxu1 %v7786_v18  ;;  %v7796_v11 = vld [vmem:[#allocation26_spill] sm:$0xff]  ;;  %v7797_v18 = vld [vmem:[#allocation27_spill] sm:$0xff] }
 0x6bd   :  { %4696 = vmatpush1.bf16.msra.mxu0 %v7787_v47  ;;  %4760 = vmatpush1.bf16.msra.mxu1 %v7788_v17  ;;  %v7798_v47 = vld [vmem:[#allocation28_spill] sm:$0xff]  ;;  %v7799_v17 = vld [vmem:[#allocation29_spill] sm:$0xff] }
 0x6be   :  { %4698 = vmatprep.subr.bf16.mxu0 %v7789_v23  ;;  %4762 = vmatprep.subr.bf16.mxu1 %v7790_v1  ;;  %v7800_v23 = vld [vmem:[#allocation30_spill] sm:$0xff]  ;;  %v7801_v1 = vld [vmem:[#allocation31_spill] sm:$0xff] }
 0x6c1   :  { %4700 = vmatpush1.bf16.msra.mxu0 %v7791_v38  ;;  %4764 = vmatpush1.bf16.msra.mxu1 %v7792_v6  ;;  %v7802_v38 = vld [vmem:[#allocation32_spill] sm:$0xff]  ;;  %v7803_v6 = vld [vmem:[#allocation33_spill] sm:$0xff] }
 0x6c2   :  { %4702 = vmatprep.subr.bf16.mxu0 %v7793_v9  ;;  %4766 = vmatprep.subr.bf16.mxu1 %v7794_v25  ;;  %v7804_v9 = vld [vmem:[#allocation34_spill] sm:$0xff]  ;;  %v7805_v25 = vld [vmem:[#allocation35_spill] sm:$0xff] }
 0x6c5   :  { %4704 = vmatpush1.bf16.msra.mxu0 %v7795_v13  ;;  %4768 = vmatpush1.bf16.msra.mxu1 %v7796_v11  ;;  %v7806_v13 = vld [vmem:[#allocation36_spill] sm:$0xff]  ;;  %v7807_v11 = vld [vmem:[#allocation37_spill] sm:$0xff] }
 0x6c6   :  { %4706 = vmatprep.subr.bf16.mxu0 %v7797_v18  ;;  %4770 = vmatprep.subr.bf16.mxu1 %v7798_v47  ;;  %v7808_v18 = vld [vmem:[#allocation38_spill] sm:$0xff]  ;;  %v7809_v47 = vld [vmem:[#allocation39_spill] sm:$0xff] }
 0x6c9   :  { %4708 = vmatpush1.bf16.msra.mxu0 %v7799_v17  ;;  %4772 = vmatpush1.bf16.msra.mxu1 %v7800_v23  ;;  %v7810_v17 = vld [vmem:[#allocation40_spill] sm:$0xff]  ;;  %v7811_v23 = vld [vmem:[#allocation41_spill] sm:$0xff] }
 0x6ca   :  { %4710 = vmatprep.subr.bf16.mxu0 %v7801_v1  ;;  %4774 = vmatprep.subr.bf16.mxu1 %v7802_v38  ;;  %v7812_v1 = vld [vmem:[#allocation42_spill] sm:$0xff]  ;;  %v7813_v38 = vld [vmem:[#allocation43_spill] sm:$0xff] }
 0x6cd   :  { %4712 = vmatpush1.bf16.msra.mxu0 %v7803_v6  ;;  %4776 = vmatpush1.bf16.msra.mxu1 %v7804_v9  ;;  %v7814_v6 = vld [vmem:[#allocation44_spill] sm:$0xff]  ;;  %v7815_v9 = vld [vmem:[#allocation45_spill] sm:$0xff] }
 0x6ce   :  { %4714 = vmatprep.subr.bf16.mxu0 %v7805_v25  ;;  %4778 = vmatprep.subr.bf16.mxu1 %v7806_v13  ;;  %v7816_v25 = vld [vmem:[#allocation46_spill] sm:$0xff]  ;;  %v7817_v13 = vld [vmem:[#allocation47_spill] sm:$0xff] }
 0x6d1   :  { %4716 = vmatpush1.bf16.msra.mxu0 %v7807_v11  ;;  %4780 = vmatpush1.bf16.msra.mxu1 %v7808_v18  ;;  %v7818_v11 = vld [vmem:[#allocation48_spill] sm:$0xff]  ;;  %v7819_v18 = vld [vmem:[#allocation49_spill] sm:$0xff] }
 0x6d2   :  { %4718 = vmatprep.subr.bf16.mxu0 %v7809_v47  ;;  %4782 = vmatprep.subr.bf16.mxu1 %v7810_v17  ;;  %v7820_v47 = vld [vmem:[#allocation50_spill] sm:$0xff]  ;;  %v7821_v17 = vld [vmem:[#allocation51_spill] sm:$0xff] }
 0x6d5   :  { %4720 = vmatpush1.bf16.msra.mxu0 %v7811_v23  ;;  %4784 = vmatpush1.bf16.msra.mxu1 %v7812_v1  ;;  %v7822_v23 = vld [vmem:[#allocation52_spill] sm:$0xff]  ;;  %v7823_v1 = vld [vmem:[#allocation53_spill] sm:$0xff] }
 0x6d6   :  { %4722 = vmatprep.subr.bf16.mxu0 %v7813_v38  ;;  %4786 = vmatprep.subr.bf16.mxu1 %v7814_v6  ;;  %v7824_v38 = vld [vmem:[#allocation54_spill] sm:$0xff]  ;;  %v7825_v6 = vld [vmem:[#allocation55_spill] sm:$0xff] }
 0x6d9   :  { %4724 = vmatpush1.bf16.msra.mxu0 %v7815_v9  ;;  %4788 = vmatpush1.bf16.msra.mxu1 %v7816_v25  ;;  %v7826_v9 = vld [vmem:[#allocation56_spill] sm:$0xff]  ;;  %v7827_v25 = vld [vmem:[#allocation57_spill] sm:$0xff] }
 0x6da   :  { %4726 = vmatprep.subr.bf16.mxu0 %v7817_v13  ;;  %4790 = vmatprep.subr.bf16.mxu1 %v7818_v11  ;;  %v7828_v13 = vld [vmem:[#allocation58_spill] sm:$0xff]  ;;  %v7829_v11 = vld [vmem:[#allocation59_spill] sm:$0xff] }
 0x6dd   :  { %4728 = vmatpush1.bf16.msra.mxu0 %v7819_v18  ;;  %4792 = vmatpush1.bf16.msra.mxu1 %v7820_v47  ;;  %v7830_v18 = vld [vmem:[#allocation60_spill] sm:$0xff]  ;;  %v7831_v47 = vld [vmem:[#allocation61_spill] sm:$0xff] }
 0x6de   :  { %4730 = vmatprep.subr.bf16.mxu0 %v7821_v17  ;;  %4794 = vmatprep.subr.bf16.mxu1 %v7822_v23  ;;  %v7832_v17 = vld [vmem:[#allocation62_spill] sm:$0xff]  ;;  %v7833_v23 = vld [vmem:[#allocation63_spill] sm:$0xff] }
 0x6e1   :  { %4732 = vmatpush1.bf16.msra.mxu0 %v7823_v1  ;;  %4796 = vmatpush1.bf16.msra.mxu1 %v7824_v38  ;;  %v7834_v1 = vld [vmem:[#allocation64_spill] sm:$0xff]  ;;  %v7835_v38 = vld [vmem:[#allocation65_spill] sm:$0xff] }
 0x6e2   :  { %4734 = vmatprep.subr.bf16.mxu0 %v7825_v6  ;;  %4798 = vmatprep.subr.bf16.mxu1 %v7826_v9  ;;  %v7836_v6 = vld [vmem:[#allocation66_spill] sm:$0xff]  ;;  %v7837_v9 = vld [vmem:[#allocation67_spill] sm:$0xff] }
 0x6e5   :  { %4736 = vmatpush1.bf16.msra.mxu0 %v7827_v25  ;;  %4800 = vmatpush1.bf16.msra.mxu1 %v7828_v13  ;;  %v7838_v25 = vld [vmem:[#allocation68_spill] sm:$0xff]  ;;  %v7839_v13 = vld [vmem:[#allocation69_spill] sm:$0xff] }
 0x6e6   :  { %4738 = vmatprep.subr.bf16.mxu0 %v7829_v11  ;;  %4802 = vmatprep.subr.bf16.mxu1 %v7830_v18  ;;  %v7840_v11 = vld [vmem:[#allocation70_spill] sm:$0xff]  ;;  %v7841_v18 = vld [vmem:[#allocation71_spill] sm:$0xff] }
 0x6e9   :  { %4740 = vmatpush1.bf16.msra.mxu0 %v7831_v47  ;;  %4804 = vmatpush1.bf16.msra.mxu1 %v7832_v17  ;;  %v7842_v47 = vld [vmem:[#allocation72_spill] sm:$0xff]  ;;  %v7843_v17 = vld [vmem:[#allocation73_spill] sm:$0xff] }
 0x6ea   :  { %4742 = vmatprep.subr.bf16.mxu0 %v7833_v23  ;;  %4806 = vmatprep.subr.bf16.mxu1 %v7834_v1  ;;  %v7844_v23 = vld [vmem:[#allocation74_spill] sm:$0xff]  ;;  %v7845_v1 = vld [vmem:[#allocation75_spill] sm:$0xff] }
 0x6ed   :  { %4744 = vmatpush1.bf16.msra.mxu0 %v7835_v38  ;;  %4808 = vmatpush1.bf16.msra.mxu1 %v7836_v6  ;;  %v7846_v38 = vld [vmem:[#allocation76_spill] sm:$0xff] }
 0x6ee   :  { %4746 = vmatprep.subr.bf16.mxu0 %v7837_v9  ;;  %4810 = vmatprep.subr.bf16.mxu1 %v7838_v25 }
 0x6f1   :  { %4748 = vmatpush1.bf16.msra.mxu0 %v7839_v13  ;;  %4812 = vmatpush1.bf16.msra.mxu1 %v7840_v11  ;;  %v2043_v13 = vld [vmem:[#allocation2 + $0x150] sm:$0xff] }
 0x6f2   :  { %4750 = vmatprep.subr.bf16.mxu0 %v7841_v18  ;;  %4814 = vmatprep.subr.bf16.mxu1 %v7842_v47 }
 0x6f5   :  { %4752 = vmatpush1.bf16.msra.mxu0 %v7843_v17  ;;  %4816 = vmatpush1.bf16.msra.mxu1 %v7844_v23 }
 0x6f6   :  { %4818 = vmatprep.subr.bf16.mxu0 %v7845_v1  ;;  %4882 = vmatprep.subr.bf16.mxu1 %v7846_v38 }
 0x74b   :  { %v2115_v6 = vpop.f32.mrb[20].mxu0  ;;  %v2186_v9 = vpop.f32.mrb[20].mxu1 }
 0x74c   :  { %v2117_v0 = vpop.f32.mrb[21].mxu0  ;;  %v2188_v25 = vpop.f32.mrb[21].mxu1  ;;  %v2333_v11 = vadd.f32 %v2115_v6, %v2041_v22  ;;  %v2335_v18 = vadd.f32 %v2186_v9, %v2043_v13  ;;  %v2045_v6 = vld [vmem:[#allocation2 + $0x160] sm:$0xff]  ;;  %v2047_v13 = vld [vmem:[#allocation2 + $0x170] sm:$0xff] }
 0x74d   :  { %v2334_v26 = vadd.f32 %v2117_v0, %v2042_v61  ;;  %v2336_v47 = vadd.f32 %v2188_v25, %v2044_v57  ;;  %v2046_v57 = vld [vmem:[#allocation2 + $0x168] sm:$0xff]  ;;  %v2048_v61 = vld [vmem:[#allocation2 + $0x178] sm:$0xff] }
 0x74e   :  { %v3135_v49 = vmul.f32 -1.442695, %v2333_v11  ;;  %v3137_v17 = vmul.f32 -1.442695, %v2335_v18 }
 0x74f   :  { %v3136_v15 = vmul.f32 -1.442695, %v2334_v26  ;;  %v3138_v23 = vmul.f32 -1.442695, %v2336_v47 }
 0x750   :  { %5367 = vpow2.f32 %v3135_v49 }
 0x751   :  { %5369 = vpow2.f32 %v3137_v17 }
 0x752   :  { %5371 = vpow2.f32 %v3136_v15 }
 0x753   :  { %5373 = vpow2.f32 %v3138_v23 }
 0x75a   :  { %v5368_v38 = vpop.eup %5367 }
 0x75b   :  { %v5370_v1 = vpop.eup %5369  ;;  %v2347_v41 = vadd.f32 1.0, %v5368_v38 }
 0x75c   :  { %v5372_v28 = vpop.eup %5371  ;;  %v2359_v12 = vadd.f32 1.0, %v5370_v1 }
 0x75d   :  { %v5374_v3 = vpop.eup %5373  ;;  %v2348_v24 = vadd.f32 1.0, %v5372_v28  ;;  %5375 = vrcp.f32 %v2347_v41 }
 0x75e   :  { %v2360_v22 = vadd.f32 1.0, %v5374_v3  ;;  %5377 = vrcp.f32 %v2359_v12 }
 0x75f   :  { %5379 = vrcp.f32 %v2348_v24 }
 0x760   :  { %5381 = vrcp.f32 %v2360_v22 }
 0x767   :  { %v5376_v41 = vpop.eup %5375 }
 0x768   :  { %v5378_v28 = vpop.eup %5377 }
 0x769   :  { %v5380_v38 = vpop.eup %5379  ;;  %v2379_v24 = vmul.f32 %v5378_v28, %v6606_v29  ;;  %v7851_v28 = vld [vmem:[#allocation120_spill] sm:$0xff] }
 0x76a   :  { %v5382_v12 = vpop.eup %5381 }
 0x76b   :  { %v2380_v22 = vmul.f32 %v5382_v12, %v6608_v14  ;;  %v7853_v12 = vld [vmem:[#allocation122_spill] sm:$0xff] }
 0x78b   :  { %v2257_v26 = vpop.f32.mrb[22].mxu0  ;;  %v2328_v0 = vpop.f32.mrb[22].mxu1 }
 0x78c   :  { %v2337_v49 = vadd.f32 %v2257_v26, %v2045_v6  ;;  %v2339_v15 = vadd.f32 %v2328_v0, %v2047_v13  ;;  %v2259_v23 = vpop.f32.mrb[23].mxu0  ;;  %v2330_v25 = vpop.f32.mrb[23].mxu1 }
 0x78d   :  { %v2338_v11 = vadd.f32 %v2259_v23, %v2046_v57  ;;  %v2340_v18 = vadd.f32 %v2330_v25, %v2048_v61 }
 0x78e   :  { %5383 = vtanh.f32 %v2337_v49  ;;  %v3139_v1 = vmul.f32 -1.442695, %v2339_v15 }
 0x78f   :  { %5385 = vtanh.f32 %v2338_v11  ;;  %v3140_v3 = vmul.f32 -1.442695, %v2340_v18  ;;  %v7847_v18 = vld [vmem:[#allocation116_spill] sm:$0xff] }
 0x790   :  { %5387 = vpow2.f32 %v3139_v1  ;;  %v7848_v1 = vld [vmem:[#allocation117_spill] sm:$0xff] }
 0x791   :  { %5389 = vpow2.f32 %v3140_v3  ;;  %v7849_v3 = vld [vmem:[#allocation118_spill] sm:$0xff] }
 0x798   :  { %v5384_v47 = vpop.eup %5383 }
 0x799   :  { %v5386_v17 = vpop.eup %5385  ;;  %v2381_v9 = vmul.f32 %v5384_v47, %v5376_v41  ;;  %v7850_v41 = vld [vmem:[#allocation119_spill] sm:$0xff] }
 0x79a   :  { %v5388_v6 = vpop.eup %5387  ;;  %v2382_v13 = vmul.f32 %v5386_v17, %v5380_v38  ;;  %v7852_v38 = vld [vmem:[#allocation121_spill] sm:$0xff]  ;;  %v7854_v47 = vld [vmem:[#allocation123_spill] sm:$0xff]  ;;  %v7855_v17 = vld [vmem:[#allocation124_spill] sm:$0xff] }
 0x79b   :  { %v5390_v57 = vpop.eup %5389  ;;  %v6748_v61 = vadd.f32 %v2381_v9, %v2379_v24  ;;  %v2373_v26 = vadd.f32 1.0, %v5388_v6  ;;  %v7856_v24 = vld [vmem:[#allocation125_spill] sm:$0xff]  ;;  %v7857_v9 = vld [vmem:[#allocation126_spill] sm:$0xff]  ;;  %v7858_v6 = vld [vmem:[#allocation127_spill] sm:$0xff] }
 0x79c   :  { %v6750_v0 = vadd.f32 %v2382_v13, %v2380_v22  ;;  %v2374_v49 = vadd.f32 1.0, %v5390_v57  ;;  %v7859_v22 = vld [vmem:[#allocation128_spill] sm:$0xff]  ;;  %v7860_v13 = vld [vmem:[#allocation129_spill] sm:$0xff]  ;;  %v7861_v57 = vld [vmem:[#allocation130_spill] sm:$0xff] }
 0x79d   :  { %5391 = vtanh.f32 %v6748_v61 }
 0x79e   :  { %5393 = vrcp.f32 %v2373_v26  ;;  %v7862_v26 = vld [vmem:[#allocation131_spill] sm:$0xff] }
 0x79f   :  { %5395 = vtanh.f32 %v6750_v0 }
 0x7a0   :  { %5397 = vrcp.f32 %v2374_v49  ;;  %v7863_v49 = vld [vmem:[#allocation132_spill] sm:$0xff] }
 0x7a7   :  { %v5392_v15 = vpop.eup %5391 }
 0x7a8   :  { %v5394_v29 = vpop.eup %5393 }
 0x7a9   :  { %v5396_v23 = vpop.eup %5395  ;;  %v6754_v14 = vmul.f32 %v5394_v29, %v5392_v15  ;;  %v7864_v15 = vld [vmem:[#allocation133_spill] sm:$0xff]  ;;  %v7865_v29 = vld [vmem:[#allocation134_spill] sm:$0xff] }
 0x7aa   :  { %v5398_v25 = vpop.eup %5397 }
 0x7ab   :  { %v2388_v11 = vmul.f32 %v5398_v25, %v5396_v23  ;;  %v7866_v23 = vld [vmem:[#allocation135_spill] sm:$0xff]  ;;  %v7867_v25 = vld [vmem:[#allocation136_spill] sm:$0xff] }
 0x7ad   :  { %2462 = vmatprep.mubr.f32.mxu0 %v2388_v11  ;;  %2533 = vmatprep.mubr.f32.mxu1 %v2388_v11 }
 0x7ae   :  { %2463 = vmatmul.mubr.f32.vlgmr.msra.gmra.mrb[24].mxu0 %v6754_v14  ;;  %2534 = vmatmul.mubr.f32.vlgmr.msra.gmra.mrb[24].mxu1 %v6754_v14 }
 0x7af   :  { %4820 = vmatpush1.bf16.msra.mxu0 %v7404_v60  ;;  %4884 = vmatpush1.bf16.msra.mxu1 %v7405_v55 }
 0x7b0   :  { %2604 = vmatprep.mubr.f32.mxu0 %v2388_v11  ;;  %2675 = vmatprep.mubr.f32.mxu1 %v2388_v11  ;;  %v7868_v11 = vld [vmem:[#allocation137_spill] sm:$0xff] }
 0x7b1   :  { %4822 = vmatprep.subr.bf16.mxu0 %v7406_v10  ;;  %4886 = vmatprep.subr.bf16.mxu1 %v7407_v54 }
 0x7b3   :  { %4824 = vmatpush1.bf16.msra.mxu0 %v7408_v46  ;;  %4888 = vmatpush1.bf16.msra.mxu1 %v7409_v62 }
 0x7b4   :  { %4826 = vmatprep.subr.bf16.mxu0 %v7410_v50  ;;  %4890 = vmatprep.subr.bf16.mxu1 %v7411_v58 }
 0x7b7   :  { %4828 = vmatpush1.bf16.msra.mxu0 %v7412_v48  ;;  %4892 = vmatpush1.bf16.msra.mxu1 %v7491_v36 }
 0x7b8   :  { %4830 = vmatprep.subr.bf16.mxu0 %v7492_v2  ;;  %4894 = vmatprep.subr.bf16.mxu1 %v7493_v39 }
 0x7bb   :  { %4832 = vmatpush1.bf16.msra.mxu0 %v7494_v35  ;;  %4896 = vmatpush1.bf16.msra.mxu1 %v7495_v40 }
 0x7bc   :  { %4834 = vmatprep.subr.bf16.mxu0 %v7496_v7  ;;  %4898 = vmatprep.subr.bf16.mxu1 %v7497_v31 }
 0x7bf   :  { %4836 = vmatpush1.bf16.msra.mxu0 %v7498_v37  ;;  %4900 = vmatpush1.bf16.msra.mxu1 %v7499_v43 }
 0x7c0   :  { %4838 = vmatprep.subr.bf16.mxu0 %v7500_v27  ;;  %4902 = vmatprep.subr.bf16.mxu1 %v7501_v56 }
 0x7c3   :  { %4840 = vmatpush1.bf16.msra.mxu0 %v7580_v42  ;;  %4904 = vmatpush1.bf16.msra.mxu1 %v7581_v4 }
 0x7c4   :  { %4842 = vmatprep.subr.bf16.mxu0 %v7582_v8  ;;  %4906 = vmatprep.subr.bf16.mxu1 %v7583_v59 }
 0x7c7   :  { %4844 = vmatpush1.bf16.msra.mxu0 %v7584_v21  ;;  %4908 = vmatpush1.bf16.msra.mxu1 %v7585_v5 }
 0x7c8   :  { %4846 = vmatprep.subr.bf16.mxu0 %v7586_v45  ;;  %4910 = vmatprep.subr.bf16.mxu1 %v7587_v32 }
 0x7cb   :  { %4848 = vmatpush1.bf16.msra.mxu0 %v7510_v20  ;;  %4912 = vmatpush1.bf16.msra.mxu1 %v7588_v30 }
 0x7cc   :  { %4850 = vmatprep.subr.bf16.mxu0 %v7512_v34  ;;  %4914 = vmatprep.subr.bf16.mxu1 %v7513_v16 }
 0x7cf   :  { %4852 = vmatpush1.bf16.msra.mxu0 %v7514_v63  ;;  %4916 = vmatpush1.bf16.msra.mxu1 %v7515_v19 }
 0x7d0   :  { %4854 = vmatprep.subr.bf16.mxu0 %v7516_v53  ;;  %4918 = vmatprep.subr.bf16.mxu1 %v7517_v52 }
 0x7d3   :  { %4856 = vmatpush1.bf16.msra.mxu0 %v7518_v51  ;;  %4920 = vmatpush1.bf16.msra.mxu1 %v7519_v44 }
 0x7d4   :  { %4858 = vmatprep.subr.bf16.mxu0 %v7520_v33  ;;  %4922 = vmatprep.subr.bf16.mxu1 %v7847_v18 }
 0x7d7   :  { %4860 = vmatpush1.bf16.msra.mxu0 %v7848_v1  ;;  %4924 = vmatpush1.bf16.msra.mxu1 %v7849_v3 }
 0x7d8   :  { %4862 = vmatprep.subr.bf16.mxu0 %v7850_v41  ;;  %4926 = vmatprep.subr.bf16.mxu1 %v7851_v28 }
 0x7db   :  { %4864 = vmatpush1.bf16.msra.mxu0 %v7852_v38  ;;  %4928 = vmatpush1.bf16.msra.mxu1 %v7853_v12 }
 0x7dc   :  { %4866 = vmatprep.subr.bf16.mxu0 %v7854_v47  ;;  %4930 = vmatprep.subr.bf16.mxu1 %v7855_v17  ;;  %v2393_v17 = vld [vmem:[#allocation2 + $0x198] sm:$0xff] }
 0x7df   :  { %4868 = vmatpush1.bf16.msra.mxu0 %v7856_v24  ;;  %4932 = vmatpush1.bf16.msra.mxu1 %v7857_v9  ;;  %v2390_v9 = vld [vmem:[#allocation2 + $0x180] sm:$0xff]  ;;  %v2391_v24 = vld [vmem:[#allocation2 + $0x188] sm:$0xff] }
 0x7e0   :  { %4870 = vmatprep.subr.bf16.mxu0 %v7858_v6  ;;  %4934 = vmatprep.subr.bf16.mxu1 %v7859_v22  ;;  %v7869_v6 = vld [vmem:[#allocation138_spill] sm:$0xff]  ;;  %v7870_v22 = vld [vmem:[#allocation11_spill] sm:$0xff] }
 0x7e3   :  { %4872 = vmatpush1.bf16.msra.mxu0 %v7860_v13  ;;  %4936 = vmatpush1.bf16.msra.mxu1 %v7861_v57  ;;  %v7871_v13 = vld [vmem:[#allocation12_spill] sm:$0xff] }
 0x7e4   :  { %4874 = vmatprep.subr.bf16.mxu0 %v7862_v26  ;;  %4938 = vmatprep.subr.bf16.mxu1 %v7863_v49  ;;  %v7872_v49 = vld [vmem:[#allocation13_spill] sm:$0xff]  ;;  %v7881_v26 = vld [vmem:[#allocation22_spill] sm:$0xff] }
 0x7e7   :  { %4876 = vmatpush1.bf16.msra.mxu0 %v7864_v15  ;;  %4940 = vmatpush1.bf16.msra.mxu1 %v7865_v29  ;;  %v7873_v15 = vld [vmem:[#allocation14_spill] sm:$0xff]  ;;  %v7874_v29 = vld [vmem:[#allocation15_spill] sm:$0xff] }
 0x7e8   :  { %4878 = vmatprep.subr.bf16.mxu0 %v7866_v23  ;;  %4942 = vmatprep.subr.bf16.mxu1 %v7867_v25  ;;  %v7875_v23 = vld [vmem:[#allocation16_spill] sm:$0xff]  ;;  %v7876_v25 = vld [vmem:[#allocation17_spill] sm:$0xff] }
 0x7eb   :  { %4880 = vmatpush1.bf16.msra.mxu0 %v7868_v11  ;;  %4944 = vmatpush1.bf16.msra.mxu1 %v7869_v6  ;;  %v7877_v11 = vld [vmem:[#allocation18_spill] sm:$0xff]  ;;  %v7878_v6 = vld [vmem:[#allocation19_spill] sm:$0xff] }
 0x7ec   :  { %4946 = vmatprep.subr.bf16.mxu0 %v7870_v22  ;;  %5010 = vmatprep.subr.bf16.mxu1 %v7871_v13  ;;  %v7879_v22 = vld [vmem:[#allocation20_spill] sm:$0xff]  ;;  %v7880_v13 = vld [vmem:[#allocation21_spill] sm:$0xff] }
 0x7ee   :  { %2605 = vmatmul.mubr.f32.vlgmr.msra.gmra.mrb[26].mxu0 %v6754_v14  ;;  %2676 = vmatmul.mubr.f32.vlgmr.msra.gmra.mrb[26].mxu1 %v6754_v14  ;;  %v7882_v14 = vld [vmem:[#allocation23_spill] sm:$0xff] }
 0x7ef   :  { %4948 = vmatpush1.bf16.msra.mxu0 %v7872_v49  ;;  %5012 = vmatpush1.bf16.msra.mxu1 %v7873_v15  ;;  %v7883_v49 = vld [vmem:[#allocation24_spill] sm:$0xff]  ;;  %v7884_v15 = vld [vmem:[#allocation25_spill] sm:$0xff] }
 0x7f0   :  { %4950 = vmatprep.subr.bf16.mxu0 %v7874_v29  ;;  %5014 = vmatprep.subr.bf16.mxu1 %v7875_v23  ;;  %v7885_v29 = vld [vmem:[#allocation26_spill] sm:$0xff]  ;;  %v7886_v23 = vld [vmem:[#allocation27_spill] sm:$0xff] }
 0x7f3   :  { %4952 = vmatpush1.bf16.msra.mxu0 %v7876_v25  ;;  %5016 = vmatpush1.bf16.msra.mxu1 %v7877_v11  ;;  %v7887_v25 = vld [vmem:[#allocation28_spill] sm:$0xff]  ;;  %v7888_v11 = vld [vmem:[#allocation29_spill] sm:$0xff] }
 0x7f4   :  { %4954 = vmatprep.subr.bf16.mxu0 %v7878_v6  ;;  %5018 = vmatprep.subr.bf16.mxu1 %v7879_v22  ;;  %v7889_v6 = vld [vmem:[#allocation30_spill] sm:$0xff]  ;;  %v7890_v22 = vld [vmem:[#allocation31_spill] sm:$0xff] }
 0x7f7   :  { %4956 = vmatpush1.bf16.msra.mxu0 %v7880_v13  ;;  %5020 = vmatpush1.bf16.msra.mxu1 %v7881_v26  ;;  %v7891_v13 = vld [vmem:[#allocation32_spill] sm:$0xff]  ;;  %v7892_v26 = vld [vmem:[#allocation33_spill] sm:$0xff] }
 0x7f8   :  { %4958 = vmatprep.subr.bf16.mxu0 %v7882_v14  ;;  %5022 = vmatprep.subr.bf16.mxu1 %v7883_v49  ;;  %v7893_v14 = vld [vmem:[#allocation34_spill] sm:$0xff]  ;;  %v7894_v49 = vld [vmem:[#allocation35_spill] sm:$0xff] }
 0x7fb   :  { %4960 = vmatpush1.bf16.msra.mxu0 %v7884_v15  ;;  %5024 = vmatpush1.bf16.msra.mxu1 %v7885_v29  ;;  %v7895_v15 = vld [vmem:[#allocation36_spill] sm:$0xff]  ;;  %v7896_v29 = vld [vmem:[#allocation37_spill] sm:$0xff] }
 0x7fc   :  { %4962 = vmatprep.subr.bf16.mxu0 %v7886_v23  ;;  %5026 = vmatprep.subr.bf16.mxu1 %v7887_v25  ;;  %v7897_v23 = vld [vmem:[#allocation38_spill] sm:$0xff]  ;;  %v7898_v25 = vld [vmem:[#allocation39_spill] sm:$0xff] }
 0x7ff   :  { %4964 = vmatpush1.bf16.msra.mxu0 %v7888_v11  ;;  %5028 = vmatpush1.bf16.msra.mxu1 %v7889_v6  ;;  %v7899_v11 = vld [vmem:[#allocation40_spill] sm:$0xff]  ;;  %v7900_v6 = vld [vmem:[#allocation41_spill] sm:$0xff] }
 0x800   :  { %4966 = vmatprep.subr.bf16.mxu0 %v7890_v22  ;;  %5030 = vmatprep.subr.bf16.mxu1 %v7891_v13  ;;  %v7901_v22 = vld [vmem:[#allocation42_spill] sm:$0xff]  ;;  %v7902_v13 = vld [vmem:[#allocation43_spill] sm:$0xff] }
 0x803   :  { %4968 = vmatpush1.bf16.msra.mxu0 %v7892_v26  ;;  %5032 = vmatpush1.bf16.msra.mxu1 %v7893_v14  ;;  %v7903_v26 = vld [vmem:[#allocation44_spill] sm:$0xff]  ;;  %v7904_v14 = vld [vmem:[#allocation45_spill] sm:$0xff] }
 0x804   :  { %4970 = vmatprep.subr.bf16.mxu0 %v7894_v49  ;;  %5034 = vmatprep.subr.bf16.mxu1 %v7895_v15  ;;  %v7905_v49 = vld [vmem:[#allocation46_spill] sm:$0xff]  ;;  %v7906_v15 = vld [vmem:[#allocation47_spill] sm:$0xff] }
 0x807   :  { %4972 = vmatpush1.bf16.msra.mxu0 %v7896_v29  ;;  %5036 = vmatpush1.bf16.msra.mxu1 %v7897_v23  ;;  %v7907_v29 = vld [vmem:[#allocation48_spill] sm:$0xff]  ;;  %v7908_v23 = vld [vmem:[#allocation49_spill] sm:$0xff] }
 0x808   :  { %4974 = vmatprep.subr.bf16.mxu0 %v7898_v25  ;;  %5038 = vmatprep.subr.bf16.mxu1 %v7899_v11  ;;  %v7909_v25 = vld [vmem:[#allocation50_spill] sm:$0xff]  ;;  %v7910_v11 = vld [vmem:[#allocation51_spill] sm:$0xff] }
 0x80b   :  { %4976 = vmatpush1.bf16.msra.mxu0 %v7900_v6  ;;  %5040 = vmatpush1.bf16.msra.mxu1 %v7901_v22  ;;  %v7911_v6 = vld [vmem:[#allocation52_spill] sm:$0xff]  ;;  %v7912_v22 = vld [vmem:[#allocation53_spill] sm:$0xff] }
 0x80c   :  { %4978 = vmatprep.subr.bf16.mxu0 %v7902_v13  ;;  %5042 = vmatprep.subr.bf16.mxu1 %v7903_v26  ;;  %v7913_v13 = vld [vmem:[#allocation54_spill] sm:$0xff]  ;;  %v7914_v26 = vld [vmem:[#allocation55_spill] sm:$0xff] }
 0x80f   :  { %4980 = vmatpush1.bf16.msra.mxu0 %v7904_v14  ;;  %5044 = vmatpush1.bf16.msra.mxu1 %v7905_v49  ;;  %v7915_v14 = vld [vmem:[#allocation56_spill] sm:$0xff]  ;;  %v7916_v49 = vld [vmem:[#allocation57_spill] sm:$0xff] }
 0x810   :  { %4982 = vmatprep.subr.bf16.mxu0 %v7906_v15  ;;  %5046 = vmatprep.subr.bf16.mxu1 %v7907_v29  ;;  %v7917_v15 = vld [vmem:[#allocation58_spill] sm:$0xff]  ;;  %v7918_v29 = vld [vmem:[#allocation59_spill] sm:$0xff] }
 0x813   :  { %4984 = vmatpush1.bf16.msra.mxu0 %v7908_v23  ;;  %5048 = vmatpush1.bf16.msra.mxu1 %v7909_v25  ;;  %v7919_v23 = vld [vmem:[#allocation60_spill] sm:$0xff]  ;;  %v7920_v25 = vld [vmem:[#allocation61_spill] sm:$0xff] }
 0x814   :  { %4986 = vmatprep.subr.bf16.mxu0 %v7910_v11  ;;  %5050 = vmatprep.subr.bf16.mxu1 %v7911_v6  ;;  %v7921_v11 = vld [vmem:[#allocation62_spill] sm:$0xff]  ;;  %v7922_v6 = vld [vmem:[#allocation63_spill] sm:$0xff] }
 0x817   :  { %4988 = vmatpush1.bf16.msra.mxu0 %v7912_v22  ;;  %5052 = vmatpush1.bf16.msra.mxu1 %v7913_v13  ;;  %v7923_v22 = vld [vmem:[#allocation64_spill] sm:$0xff]  ;;  %v7924_v13 = vld [vmem:[#allocation65_spill] sm:$0xff] }
 0x818   :  { %4990 = vmatprep.subr.bf16.mxu0 %v7914_v26  ;;  %5054 = vmatprep.subr.bf16.mxu1 %v7915_v14  ;;  %v7925_v26 = vld [vmem:[#allocation66_spill] sm:$0xff]  ;;  %v7926_v14 = vld [vmem:[#allocation67_spill] sm:$0xff] }
 0x81b   :  { %4992 = vmatpush1.bf16.msra.mxu0 %v7916_v49  ;;  %5056 = vmatpush1.bf16.msra.mxu1 %v7917_v15  ;;  %v7927_v49 = vld [vmem:[#allocation68_spill] sm:$0xff]  ;;  %v7928_v15 = vld [vmem:[#allocation69_spill] sm:$0xff] }
 0x81c   :  { %4994 = vmatprep.subr.bf16.mxu0 %v7918_v29  ;;  %5058 = vmatprep.subr.bf16.mxu1 %v7919_v23  ;;  %v7929_v29 = vld [vmem:[#allocation70_spill] sm:$0xff]  ;;  %v7930_v23 = vld [vmem:[#allocation71_spill] sm:$0xff] }
 0x81f   :  { %4996 = vmatpush1.bf16.msra.mxu0 %v7920_v25  ;;  %5060 = vmatpush1.bf16.msra.mxu1 %v7921_v11  ;;  %v7931_v25 = vld [vmem:[#allocation72_spill] sm:$0xff]  ;;  %v7932_v11 = vld [vmem:[#allocation73_spill] sm:$0xff] }
 0x820   :  { %4998 = vmatprep.subr.bf16.mxu0 %v7922_v6  ;;  %5062 = vmatprep.subr.bf16.mxu1 %v7923_v22  ;;  %v7933_v6 = vld [vmem:[#allocation74_spill] sm:$0xff]  ;;  %v7934_v22 = vld [vmem:[#allocation75_spill] sm:$0xff] }
 0x823   :  { %5000 = vmatpush1.bf16.msra.mxu0 %v7924_v13  ;;  %5064 = vmatpush1.bf16.msra.mxu1 %v7925_v26  ;;  %v7935_v13 = vld [vmem:[#allocation76_spill] sm:$0xff] }
 0x824   :  { %5002 = vmatprep.subr.bf16.mxu0 %v7926_v14  ;;  %5066 = vmatprep.subr.bf16.mxu1 %v7927_v49 }
 0x827   :  { %5004 = vmatpush1.bf16.msra.mxu0 %v7928_v15  ;;  %5068 = vmatpush1.bf16.msra.mxu1 %v7929_v29  ;;  %v2392_v15 = vld [vmem:[#allocation2 + $0x190] sm:$0xff] }
 0x828   :  { %5006 = vmatprep.subr.bf16.mxu0 %v7930_v23  ;;  %5070 = vmatprep.subr.bf16.mxu1 %v7931_v25 }
 0x82b   :  { %5008 = vmatpush1.bf16.msra.mxu0 %v7932_v11  ;;  %5072 = vmatpush1.bf16.msra.mxu1 %v7933_v6 }
 0x82c   :  { %5074 = vmatprep.subr.bf16.mxu0 %v7934_v22  ;;  %5138 = vmatprep.subr.bf16.mxu1 %v7935_v13 }
 0x881   :  { %v2464_v26 = vpop.f32.mrb[24].mxu0  ;;  %v2535_v14 = vpop.f32.mrb[24].mxu1 }
 0x882   :  { %v2466_v57 = vpop.f32.mrb[25].mxu0  ;;  %v2537_v49 = vpop.f32.mrb[25].mxu1  ;;  %v2682_v29 = vadd.f32 %v2464_v26, %v2390_v9  ;;  %v2684_v23 = vadd.f32 %v2535_v14, %v2392_v15  ;;  %v2394_v26 = vld [vmem:[#allocation2 + $0x1a0] sm:$0xff]  ;;  %v2396_v14 = vld [vmem:[#allocation2 + $0x1b0] sm:$0xff] }
 0x883   :  { %v2683_v47 = vadd.f32 %v2466_v57, %v2391_v24  ;;  %v2685_v25 = vadd.f32 %v2537_v49, %v2393_v17  ;;  %v2395_v17 = vld [vmem:[#allocation2 + $0x1a8] sm:$0xff]  ;;  %v2397_v24 = vld [vmem:[#allocation2 + $0x1b8] sm:$0xff] }
 0x884   :  { %v3141_v12 = vmul.f32 -1.442695, %v2682_v29  ;;  %v3143_v11 = vmul.f32 -1.442695, %v2684_v23 }
 0x885   :  { %v3142_v38 = vmul.f32 -1.442695, %v2683_v47  ;;  %v3144_v6 = vmul.f32 -1.442695, %v2685_v25 }
 0x886   :  { %5399 = vpow2.f32 %v3141_v12 }
 0x887   :  { %5401 = vpow2.f32 %v3143_v11 }
 0x888   :  { %5403 = vpow2.f32 %v3142_v38 }
 0x889   :  { %5405 = vpow2.f32 %v3144_v6 }
 0x890   :  { %v5400_v22 = vpop.eup %5399 }
 0x891   :  { %v5402_v13 = vpop.eup %5401  ;;  %v2696_v3 = vadd.f32 1.0, %v5400_v22 }
 0x892   :  { %v5404_v28 = vpop.eup %5403  ;;  %v2708_v1 = vadd.f32 1.0, %v5402_v13 }
 0x893   :  { %v5406_v41 = vpop.eup %5405  ;;  %v2697_v18 = vadd.f32 1.0, %v5404_v28  ;;  %5407 = vrcp.f32 %v2696_v3 }
 0x894   :  { %v2709_v9 = vadd.f32 1.0, %v5406_v41  ;;  %5409 = vrcp.f32 %v2708_v1 }
 0x895   :  { %5411 = vrcp.f32 %v2697_v18 }
 0x896   :  { %5413 = vrcp.f32 %v2709_v9 }
 0x89d   :  { %v5408_v3 = vpop.eup %5407 }
 0x89e   :  { %v5410_v28 = vpop.eup %5409 }
 0x89f   :  { %v5412_v11 = vpop.eup %5411  ;;  %v2728_v18 = vmul.f32 %v5410_v28, %v6748_v61 }
 0x8a0   :  { %v5414_v1 = vpop.eup %5413 }
 0x8a1   :  { %v2729_v9 = vmul.f32 %v5414_v1, %v6750_v0 }
 0x8c1   :  { %v2606_v47 = vpop.f32.mrb[26].mxu0  ;;  %v2677_v57 = vpop.f32.mrb[26].mxu1 }
 0x8c2   :  { %v2686_v12 = vadd.f32 %v2606_v47, %v2394_v26  ;;  %v2688_v38 = vadd.f32 %v2677_v57, %v2396_v14  ;;  %v2608_v49 = vpop.f32.mrb[27].mxu0  ;;  %v2679_v15 = vpop.f32.mrb[27].mxu1 }
 0x8c3   :  { %v2687_v29 = vadd.f32 %v2608_v49, %v2395_v17  ;;  %v2689_v23 = vadd.f32 %v2679_v15, %v2397_v24 }
 0x8c4   :  { %5415 = vtanh.f32 %v2686_v12  ;;  %v3145_v25 = vmul.f32 -1.442695, %v2688_v38 }
 0x8c5   :  { %5417 = vtanh.f32 %v2687_v29  ;;  %v3146_v41 = vmul.f32 -1.442695, %v2689_v23 }
 0x8c6   :  { %5419 = vpow2.f32 %v3145_v25 }
 0x8c7   :  { %5421 = vpow2.f32 %v3146_v41 }
 0x8ce   :  { %v5416_v6 = vpop.eup %5415 }
 0x8cf   :  { %v5418_v22 = vpop.eup %5417  ;;  %v2730_v13 = vmul.f32 %v5416_v6, %v5408_v3 }
 0x8d0   :  { %v5420_v26 = vpop.eup %5419  ;;  %v2731_v14 = vmul.f32 %v5418_v22, %v5412_v11  ;;  %v2743_v22 = vld [vmem:[#allocation2 + $0x1e0] sm:$0xff] }
 0x8d1   :  { %v5422_v17 = vpop.eup %5421  ;;  %v6890_v24 = vadd.f32 %v2730_v13, %v2728_v18  ;;  %v2722_v47 = vadd.f32 1.0, %v5420_v26  ;;  %v2745_v18 = vld [vmem:[#allocation2 + $0x1f0] sm:$0xff]  ;;  %v2744_v13 = vld [vmem:[#allocation2 + $0x1e8] sm:$0xff]  ;;  %v2746_v26 = vld [vmem:[#allocation2 + $0x1f8] sm:$0xff] }
 0x8d2   :  { %v6892_v57 = vadd.f32 %v2731_v14, %v2729_v9  ;;  %v2723_v12 = vadd.f32 1.0, %v5422_v17 }
 0x8d3   :  { %5423 = vtanh.f32 %v6890_v24 }
 0x8d4   :  { %5425 = vrcp.f32 %v2722_v47 }
 0x8d5   :  { %5427 = vtanh.f32 %v6892_v57 }
 0x8d6   :  { %5429 = vrcp.f32 %v2723_v12 }
 0x8dd   :  { %v5424_v38 = vpop.eup %5423 }
 0x8de   :  { %v5426_v61 = vpop.eup %5425 }
 0x8df   :  { %v5428_v49 = vpop.eup %5427  ;;  %v6896_v0 = vmul.f32 %v5426_v61, %v5424_v38 }
 0x8e0   :  { %v5430_v15 = vpop.eup %5429 }
 0x8e1   :  { %v2737_v29 = vmul.f32 %v5430_v15, %v5428_v49 }
 0x8e3   :  { %2811 = vmatprep.mubr.f32.mxu0 %v2737_v29  ;;  %2882 = vmatprep.mubr.f32.mxu1 %v2737_v29 }
 0x8e4   :  { %2812 = vmatmul.mubr.f32.vlgmr.msra.gmra.mrb[28].mxu0 %v6896_v0  ;;  %2883 = vmatmul.mubr.f32.vlgmr.msra.gmra.mrb[28].mxu1 %v6896_v0 }
 0x8e5   :  { %5076 = vmatpush1.bf16.msra.mxu0 %v7404_v60  ;;  %5140 = vmatpush1.bf16.msra.mxu1 %v7405_v55  ;;  %v7936_v60 = vld [vmem:[#allocation116_spill] sm:$0xff]  ;;  %v7937_v55 = vld [vmem:[#allocation117_spill] sm:$0xff] }
 0x8e6   :  { %2953 = vmatprep.mubr.f32.mxu0 %v2737_v29  ;;  %3024 = vmatprep.mubr.f32.mxu1 %v2737_v29 }
 0x8e7   :  { %5078 = vmatprep.subr.bf16.mxu0 %v7406_v10  ;;  %5142 = vmatprep.subr.bf16.mxu1 %v7407_v54  ;;  %v7938_v10 = vld [vmem:[#allocation118_spill] sm:$0xff]  ;;  %v7939_v54 = vld [vmem:[#allocation119_spill] sm:$0xff] }
 0x8e9   :  { %5080 = vmatpush1.bf16.msra.mxu0 %v7408_v46  ;;  %5144 = vmatpush1.bf16.msra.mxu1 %v7409_v62  ;;  %v7940_v46 = vld [vmem:[#allocation120_spill] sm:$0xff]  ;;  %v7941_v62 = vld [vmem:[#allocation121_spill] sm:$0xff] }
 0x8ea   :  { %5082 = vmatprep.subr.bf16.mxu0 %v7410_v50  ;;  %5146 = vmatprep.subr.bf16.mxu1 %v7411_v58  ;;  %v7942_v50 = vld [vmem:[#allocation122_spill] sm:$0xff]  ;;  %v7943_v58 = vld [vmem:[#allocation123_spill] sm:$0xff] }
 0x8ed   :  { %5084 = vmatpush1.bf16.msra.mxu0 %v7412_v48  ;;  %5148 = vmatpush1.bf16.msra.mxu1 %v7491_v36  ;;  %v7944_v48 = vld [vmem:[#allocation124_spill] sm:$0xff]  ;;  %v7945_v36 = vld [vmem:[#allocation125_spill] sm:$0xff] }
 0x8ee   :  { %5086 = vmatprep.subr.bf16.mxu0 %v7492_v2  ;;  %5150 = vmatprep.subr.bf16.mxu1 %v7493_v39  ;;  %v7946_v2 = vld [vmem:[#allocation126_spill] sm:$0xff]  ;;  %v7947_v39 = vld [vmem:[#allocation127_spill] sm:$0xff] }
 0x8f1   :  { %5088 = vmatpush1.bf16.msra.mxu0 %v7494_v35  ;;  %5152 = vmatpush1.bf16.msra.mxu1 %v7495_v40  ;;  %v7948_v35 = vld [vmem:[#allocation128_spill] sm:$0xff]  ;;  %v7949_v40 = vld [vmem:[#allocation129_spill] sm:$0xff] }
 0x8f2   :  { %5090 = vmatprep.subr.bf16.mxu0 %v7496_v7  ;;  %5154 = vmatprep.subr.bf16.mxu1 %v7497_v31  ;;  %v7950_v7 = vld [vmem:[#allocation130_spill] sm:$0xff]  ;;  %v7951_v31 = vld [vmem:[#allocation131_spill] sm:$0xff] }
 0x8f5   :  { %5092 = vmatpush1.bf16.msra.mxu0 %v7498_v37  ;;  %5156 = vmatpush1.bf16.msra.mxu1 %v7499_v43  ;;  %v7952_v37 = vld [vmem:[#allocation132_spill] sm:$0xff]  ;;  %v7953_v43 = vld [vmem:[#allocation133_spill] sm:$0xff] }
 0x8f6   :  { %5094 = vmatprep.subr.bf16.mxu0 %v7500_v27  ;;  %5158 = vmatprep.subr.bf16.mxu1 %v7501_v56  ;;  %v7954_v27 = vld [vmem:[#allocation134_spill] sm:$0xff]  ;;  %v7955_v56 = vld [vmem:[#allocation135_spill] sm:$0xff] }
 0x8f9   :  { %5096 = vmatpush1.bf16.msra.mxu0 %v7580_v42  ;;  %5160 = vmatpush1.bf16.msra.mxu1 %v7581_v4  ;;  %v2742_v4 = vld [vmem:[#allocation2 + $0x1d8] sm:$0xff] }
 0x8fa   :  { %5098 = vmatprep.subr.bf16.mxu0 %v7582_v8  ;;  %5162 = vmatprep.subr.bf16.mxu1 %v7583_v59 }
 0x8fd   :  { %5100 = vmatpush1.bf16.msra.mxu0 %v7584_v21  ;;  %5164 = vmatpush1.bf16.msra.mxu1 %v7585_v5 }
 0x8fe   :  { %5102 = vmatprep.subr.bf16.mxu0 %v7586_v45  ;;  %5166 = vmatprep.subr.bf16.mxu1 %v7587_v32 }
 0x901   :  { %5104 = vmatpush1.bf16.msra.mxu0 %v7510_v20  ;;  %5168 = vmatpush1.bf16.msra.mxu1 %v7588_v30  ;;  %v2741_v20 = vld [vmem:[#allocation2 + $0x1d0] sm:$0xff] }
 0x902   :  { %5106 = vmatprep.subr.bf16.mxu0 %v7512_v34  ;;  %5170 = vmatprep.subr.bf16.mxu1 %v7513_v16  ;;  %v7956_v16 = vld [vmem:[#allocation136_spill] sm:$0xff]  ;;  %v2740_v34 = vld [vmem:[#allocation2 + $0x1c8] sm:$0xff] }
 0x905   :  { %5108 = vmatpush1.bf16.msra.mxu0 %v7514_v63  ;;  %5172 = vmatpush1.bf16.msra.mxu1 %v7515_v19  ;;  %v7957_v63 = vld [vmem:[#allocation137_spill] sm:$0xff]  ;;  %v7958_v19 = vld [vmem:[#allocation138_spill] sm:$0xff] }
 0x906   :  { %5110 = vmatprep.subr.bf16.mxu0 %v7516_v53  ;;  %5174 = vmatprep.subr.bf16.mxu1 %v7517_v52 }
 0x909   :  { %5112 = vmatpush1.bf16.msra.mxu0 %v7518_v51  ;;  %5176 = vmatpush1.bf16.msra.mxu1 %v7519_v44 }
 0x90a   :  { %5114 = vmatprep.subr.bf16.mxu0 %v7520_v33  ;;  %5178 = vmatprep.subr.bf16.mxu1 %v7936_v60  ;;  %v2739_v33 = vld [vmem:[#allocation2 + $0x1c0] sm:$0xff] }
 0x90d   :  { %5116 = vmatpush1.bf16.msra.mxu0 %v7937_v55  ;;  %5180 = vmatpush1.bf16.msra.mxu1 %v7938_v10 }
 0x90e   :  { %5118 = vmatprep.subr.bf16.mxu0 %v7939_v54  ;;  %5182 = vmatprep.subr.bf16.mxu1 %v7940_v46 }
 0x911   :  { %5120 = vmatpush1.bf16.msra.mxu0 %v7941_v62  ;;  %5184 = vmatpush1.bf16.msra.mxu1 %v7942_v50 }
 0x912   :  { %5122 = vmatprep.subr.bf16.mxu0 %v7943_v58  ;;  %5186 = vmatprep.subr.bf16.mxu1 %v7944_v48 }
 0x915   :  { %5124 = vmatpush1.bf16.msra.mxu0 %v7945_v36  ;;  %5188 = vmatpush1.bf16.msra.mxu1 %v7946_v2 }
 0x916   :  { %5126 = vmatprep.subr.bf16.mxu0 %v7947_v39  ;;  %5190 = vmatprep.subr.bf16.mxu1 %v7948_v35 }
 0x919   :  { %5128 = vmatpush1.bf16.msra.mxu0 %v7949_v40  ;;  %5192 = vmatpush1.bf16.msra.mxu1 %v7950_v7 }
 0x91a   :  { %5130 = vmatprep.subr.bf16.mxu0 %v7951_v31  ;;  %5194 = vmatprep.subr.bf16.mxu1 %v7952_v37 }
 0x91d   :  { %5132 = vmatpush1.bf16.msra.mxu0 %v7953_v43  ;;  %5196 = vmatpush1.bf16.msra.mxu1 %v7954_v27 }
 0x91e   :  { %5134 = vmatprep.subr.bf16.mxu0 %v7955_v56  ;;  %5198 = vmatprep.subr.bf16.mxu1 %v7956_v16 }
 0x921   :  { %5136 = vmatpush1.bf16.msra.mxu0 %v7957_v63  ;;  %5200 = vmatpush1.bf16.msra.mxu1 %v7958_v19 }
 0x924   :  { %2954 = vmatmul.mubr.f32.vlgmr.msra.gmra.mrb[30].mxu0 %v6896_v0  ;;  %3025 = vmatmul.mubr.f32.vlgmr.msra.gmra.mrb[30].mxu1 %v6896_v0 }
 0x9b7   :  { %v2813_v53 = vpop.f32.mrb[28].mxu0  ;;  %v2884_v52 = vpop.f32.mrb[28].mxu1 }
 0x9b8   :  { %v2815_v51 = vpop.f32.mrb[29].mxu0  ;;  %v2886_v44 = vpop.f32.mrb[29].mxu1  ;;  %v3031_v42 = vadd.f32 %v2813_v53, %v2739_v33  ;;  %v3033_v8 = vadd.f32 %v2884_v52, %v2741_v20 }
 0x9b9   :  { %v3032_v59 = vadd.f32 %v2815_v51, %v2740_v34  ;;  %v3034_v21 = vadd.f32 %v2886_v44, %v2742_v4 }
 0x9ba   :  { %v3147_v5 = vmul.f32 -1.442695, %v3031_v42  ;;  %v3149_v45 = vmul.f32 -1.442695, %v3033_v8 }
 0x9bb   :  { %v3148_v32 = vmul.f32 -1.442695, %v3032_v59  ;;  %v3150_v30 = vmul.f32 -1.442695, %v3034_v21 }
 0x9bc   :  { %5431 = vpow2.f32 %v3147_v5 }
 0x9bd   :  { %5433 = vpow2.f32 %v3149_v45 }
 0x9be   :  { %5435 = vpow2.f32 %v3148_v32 }
 0x9bf   :  { %5437 = vpow2.f32 %v3150_v30 }
 0x9c6   :  { %v5432_v23 = vpop.eup %5431 }
 0x9c7   :  { %v5434_v25 = vpop.eup %5433  ;;  %v3045_v28 = vadd.f32 1.0, %v5432_v23 }
 0x9c8   :  { %v5436_v41 = vpop.eup %5435  ;;  %v3057_v11 = vadd.f32 1.0, %v5434_v25 }
 0x9c9   :  { %v5438_v3 = vpop.eup %5437  ;;  %v3046_v1 = vadd.f32 1.0, %v5436_v41  ;;  %5439 = vrcp.f32 %v3045_v28 }
 0x9ca   :  { %v3058_v6 = vadd.f32 1.0, %v5438_v3  ;;  %5441 = vrcp.f32 %v3057_v11 }
 0x9cb   :  { %5443 = vrcp.f32 %v3046_v1 }
 0x9cc   :  { %5445 = vrcp.f32 %v3058_v6 }
 0x9d3   :  { %v5440_v0 = vpop.eup %5439 }
 0x9d4   :  { %v5442_v60 = vpop.eup %5441 }
 0x9d5   :  { %v5444_v55 = vpop.eup %5443  ;;  %v3077_v62 = vmul.f32 %v5442_v60, %v6890_v24 }
 0x9d6   :  { %v5446_v10 = vpop.eup %5445 }
 0x9d7   :  { %v3078_v48 = vmul.f32 %v5446_v10, %v6892_v57 }
 0x9f7   :  { %v2955_v9 = vpop.f32.mrb[30].mxu0  ;;  %v3026_v14 = vpop.f32.mrb[30].mxu1 }
 0x9f8   :  { %v3035_v17 = vadd.f32 %v2955_v9, %v2743_v22  ;;  %v3037_v47 = vadd.f32 %v3026_v14, %v2745_v18  ;;  %v2957_v12 = vpop.f32.mrb[31].mxu0  ;;  %v3028_v38 = vpop.f32.mrb[31].mxu1 }
 0x9f9   :  { %v3036_v61 = vadd.f32 %v2957_v12, %v2744_v13  ;;  %v3038_v49 = vadd.f32 %v3028_v38, %v2746_v26 }
 0x9fa   :  { %5447 = vtanh.f32 %v3035_v17  ;;  %v3151_v15 = vmul.f32 -1.442695, %v3037_v47 }
 0x9fb   :  { %5449 = vtanh.f32 %v3036_v61  ;;  %v3152_v29 = vmul.f32 -1.442695, %v3038_v49 }
 0x9fc   :  { %5451 = vpow2.f32 %v3151_v15 }
 0x9fd   :  { %5453 = vpow2.f32 %v3152_v29 }
 0xa04   :  { %v5448_v54 = vpop.eup %5447 }
 0xa05   :  { %v5450_v46 = vpop.eup %5449  ;;  %v3079_v50 = vmul.f32 %v5448_v54, %v5440_v0 }
 0xa06   :  { %v5452_v58 = vpop.eup %5451  ;;  %v3080_v36 = vmul.f32 %v5450_v46, %v5444_v55 }
 0xa07   :  { %v5454_v2 = vpop.eup %5453  ;;  %v3081_v39 = vadd.f32 %v3079_v50, %v3077_v62  ;;  %v3071_v35 = vadd.f32 1.0, %v5452_v58 }
 0xa08   :  { %v3082_v40 = vadd.f32 %v3080_v36, %v3078_v48  ;;  %v3072_v7 = vadd.f32 1.0, %v5454_v2 }
 0xa09   :  { %5455 = vtanh.f32 %v3081_v39 }
 0xa0a   :  { %5457 = vrcp.f32 %v3071_v35 }
 0xa0b   :  { %5459 = vtanh.f32 %v3082_v40 }
 0xa0c   :  { %5461 = vrcp.f32 %v3072_v7 }
 0xa13   :  { %v5456_v31 = vpop.eup %5455 }
 0xa14   :  { %v5458_v37 = vpop.eup %5457 }
 0xa15   :  { %v5460_v43 = vpop.eup %5459  ;;  %v3085_v24 = vmul.f32 %v5458_v37, %v5456_v31 }
 0xa16   :  { %v5462_v27 = vpop.eup %5461 }
 0xa17   :  { %v3086_v56 = vmul.f32 %v5462_v27, %v5460_v43  ;;  %3087 = vst [vmem:[#allocation7] sm:$0xff] %v3085_v24 }
 0xa19   :  { %3088 = vst [vmem:[#allocation7 + $0x8] sm:$0xff] %v3086_v56 }
 0xa1a   :  { %5518 = shalt.err (!%p5515_p6)
}
 0xa1b   :  { %s5519_s10 = scalar_lea.hbm %s6980_s2, 256 }
 0xa1c   :  { %p5520_p7 = scmp.ne.s32.totalorder %s6980_s2, %s5519_s10  ;;  %p5523_p8 = scmp.lt.u32.totalorder %s5519_s10, %s6980_s2 }
 0xa1e   :  { %p5525_p9 = pnand %p5523_p8, %p5520_p7 }
 0xa20   :  { %5528 = shalt.err (!%p5525_p9)
}
 0xa21   :  { %3098 = dma.vmem_to_hbm [thread:$0]  %s3096_s6, 256, %s6980_s2, [#allocation4]  }
 0xa22   :  { %5533 = dma.done.wait [#allocation4], 256  }
 0xa23   :  { %5534 = vsyncadd [#allocation4], 4294967040 }
 0xa24   :  { %3102 = vsyncpa [#allocation3], 1 }
 0xa25   :  { %3103 = vsyncpa [#allocation6], 1 }
 0xa26   :  { %3104 = vsyncpa [#allocation4], 1 }

</bundles_post_ra>
